<compile_context>
chip_gen: v5e
topology: v5e:2x2
jax: 0.10.0
libtpu: 0.0.40
codegen_flags: <defaults>
</compile_context>

<pallas_src>
import numpy as np
import jax
import jax.numpy as jnp
from jax import lax
from jax.experimental import pallas as pl
from jax.experimental.pallas import tpu as pltpu


# ----------------------------------------------------------------------------
# Small static helpers
# ----------------------------------------------------------------------------
def _conv_out(n):
    """Output size of a 3x3 / stride 2 / pad 1 conv."""
    return (n - 1) // 2 + 1


def _bilinear_mat(out_size, in_size):
    """1-D interp matrix matching F.interpolate(bilinear, align_corners=True)."""
    a = np.zeros((out_size, in_size), np.float32)
    for o in range(out_size):
        src = 0.0 if out_size == 1 else o * (in_size - 1) / (out_size - 1)
        i0 = min(int(np.floor(src)), in_size - 1)
        i1 = min(i0 + 1, in_size - 1)
        f = src - i0
        a[o, i0] += 1.0 - f
        a[o, i1] += f
    return a


# Sublane offset of the first interior (non-pad) column inside the padded
# scratch buffers; chosen so the interior store is (8,128)-tile aligned.
_COL0 = 8


# ----------------------------------------------------------------------------
# Pallas kernel (closure over static spatial sizes)
# ----------------------------------------------------------------------------
def _make_kernel(H, W, CT):
    H1, W1 = _conv_out(H), _conv_out(W)
    H2, W2 = _conv_out(H1), _conv_out(W1)
    H3, W3 = _conv_out(H2), _conv_out(W2)

    def dwconv_bn_relu(inp, pad_ref, w_ref, b_ref, Hi, Wi, Ho, Wo):
        # Zero only the pad border the taps actually read; the interior is
        # fully overwritten below, and columns < _COL0-1 are never read.
        zrow = jnp.zeros((1, Wi + 2, CT), jnp.float32)
        zcol = jnp.zeros((Hi, 1, CT), jnp.float32)
        pad_ref[0:1, _COL0 - 1:_COL0 + Wi + 1, :] = zrow
        pad_ref[Hi + 1:Hi + 2, _COL0 - 1:_COL0 + Wi + 1, :] = zrow
        pad_ref[1:Hi + 1, _COL0 - 1:_COL0, :] = zcol
        pad_ref[1:Hi + 1, _COL0 + Wi:_COL0 + Wi + 1, :] = zcol
        pad_ref[1:Hi + 1, _COL0:_COL0 + Wi, :] = inp.astype(jnp.float32)

        w = w_ref[...]                                  # (9, CT), BN scale folded
        bias = b_ref[...].reshape(1, 1, CT)             # (1, 1, CT)
        acc = None
        for kh in range(3):
            for kw in range(3):
                k = kh * 3 + kw
                tap = pad_ref[pl.ds(kh, Ho, stride=2),
                              pl.ds(kw + _COL0 - 1, Wo, stride=2), :]
                term = tap * w[k].reshape(1, 1, CT)
                acc = term if acc is None else acc + term
        return jnp.maximum(acc + bias, 0.0)             # folded BN + ReLU

    def kernel(x_ref, w1_ref, b1_ref, w2_ref, b2_ref, w3_ref, b3_ref,
               ah_ref, aw_ref, o_ref, pad1, pad2, pad3):
        y = dwconv_bn_relu(x_ref[0], pad1, w1_ref, b1_ref, H, W, H1, W1)
        y = dwconv_bn_relu(y, pad2, w2_ref, b2_ref, H1, W1, H2, W2)
        y3 = dwconv_bn_relu(y, pad3, w3_ref, b3_ref, H2, W2, H3, W3)  # (H3,W3,CT)

        # Separable align_corners=True bilinear upsample, fully vectorized.
        ah = ah_ref[...]                                # (H, H3, 1)
        aw = aw_ref[...]                                # (W3, W, 1)
        tmp = None                                      # (H, W3, CT)
        for i in range(H3):
            t = ah[:, i:i + 1, :] * y3[i:i + 1]         # (H,1,1)*(1,W3,CT)
            tmp = t if tmp is None else tmp + t
        up = None                                       # (H, W, CT)
        for j in range(W3):
            t = aw[j:j + 1] * tmp[:, j:j + 1, :]        # (1,W,1)*(H,1,CT)
            up = t if up is None else up + t

        # Fused sigmoid gating + residual, single lane-dense store.
        mask = jax.nn.sigmoid(up)
        o_ref[0] = (x_ref[0] * (1.0 + mask)).astype(o_ref.dtype)

    return kernel


# ----------------------------------------------------------------------------
# Wrapper (NCHW in / NCHW out, like the PyTorch module)
# ----------------------------------------------------------------------------
def local_attention_forward(x_nchw, conv_weights, bn_scales, bn_biases,
                            *, c_tile=128):
    b, c, h, w = x_nchw.shape
    cp = ((c + c_tile - 1) // c_tile) * c_tile          # lane-dense channel pad
    h1, w1 = _conv_out(h), _conv_out(w)
    h2, w2 = _conv_out(h1), _conv_out(w1)
    h3, w3 = _conv_out(h2), _conv_out(w2)

    x_nhwc = jnp.transpose(x_nchw, (0, 2, 3, 1))
    if cp != c:
        x_nhwc = jnp.pad(x_nhwc, ((0, 0), (0, 0), (0, 0), (0, cp - c)))

    ah_in = jnp.asarray(_bilinear_mat(h, h3)).reshape(h, h3, 1)
    aw_in = jnp.asarray(_bilinear_mat(w, w3).T).reshape(w3, w, 1)

    def pad_c(a):
        return jnp.pad(a, ((0, 0), (0, cp - c))) if cp != c else a

    args = [x_nhwc]
    in_specs = [pl.BlockSpec((1, h, w, c_tile), lambda bi, ci: (bi, 0, 0, ci))]
    for wt, sc, be in zip(conv_weights, bn_scales, bn_biases):
        # Fold eval-mode BN scale into the 9 depthwise tap weights.
        taps = jnp.transpose(wt.reshape(c, 9), (1, 0)) * sc[None, :]   # (9, c)
        args += [pad_c(taps), pad_c(be.reshape(1, c))]
        in_specs += [pl.BlockSpec((9, c_tile), lambda bi, ci: (0, ci)),
                     pl.BlockSpec((1, c_tile), lambda bi, ci: (0, ci))]
    args += [ah_in, aw_in]
    in_specs += [pl.BlockSpec((h, h3, 1), lambda bi, ci: (0, 0, 0)),
                 pl.BlockSpec((w3, w, 1), lambda bi, ci: (0, 0, 0))]

    kernel = _make_kernel(h, w, c_tile)

    out = pl.pallas_call(
        kernel,
        out_shape=jax.ShapeDtypeStruct((b, h, w, cp), x_nchw.dtype),
        grid_spec=pltpu.PrefetchScalarGridSpec(
            num_scalar_prefetch=0,
            grid=(b, cp // c_tile),
            in_specs=in_specs,
            out_specs=pl.BlockSpec((1, h, w, c_tile),
                                   lambda bi, ci: (bi, 0, 0, ci)),
            scratch_shapes=[
                pltpu.VMEM((h + 2, w + _COL0 + 1, c_tile), jnp.float32),
                pltpu.VMEM((h1 + 2, w1 + _COL0 + 1, c_tile), jnp.float32),
                pltpu.VMEM((h2 + 2, w2 + _COL0 + 1, c_tile), jnp.float32),
            ]),
        compiler_params=pltpu.CompilerParams(
            dimension_semantics=("parallel", "parallel"),
            vmem_limit_bytes=32 * 1024 * 1024),
    )(*args)

    out = out[..., :c]                                   # drop channel padding
    return jnp.transpose(out, (0, 3, 1, 2))


# ----------------------------------------------------------------------------
# Pure-JAX reference (independent conv path) for a correctness check
# ----------------------------------------------------------------------------
def _ref_forward(x, conv_weights, bn_scales, bn_biases):
    b, c, h, w = x.shape
    y = x
    for wt, sc, bi in zip(conv_weights, bn_scales, bn_biases):
        y = lax.conv_general_dilated(
            y, wt, window_strides=(2, 2), padding=((1, 1), (1, 1)),
            feature_group_count=c,
            dimension_numbers=('NCHW', 'OIHW', 'NCHW'))
        y = y * sc[None, :, None, None] + bi[None, :, None, None]
        y = jnp.maximum(y, 0.0)
    h3, w3 = y.shape[2], y.shape[3]
    a_h = jnp.asarray(_bilinear_mat(h, h3))
    a_w = jnp.asarray(_bilinear_mat(w, w3))
    y_up = jnp.einsum('hH,bcHW,wW->bchw', a_h, y, a_w)
    mask = jax.nn.sigmoid(y_up)
    return x + x * mask


if __name__ == "__main__":
    B, C, H, W = 2, 8, 16, 16
    key = jax.random.PRNGKey(0)
    kx, kw1, kw2, kw3 = jax.random.split(key, 4)

    x = jax.random.normal(kx, (B, C, H, W), jnp.float32)

    # Deterministic synthetic parameters (ConvModule: depthwise conv without
    # bias because norm follows; BatchNorm folded with eval-mode running stats).
    conv_weights = [0.3 * jax.random.normal(k, (C, 1, 3, 3), jnp.float32)
                    for k in (kw1, kw2, kw3)]
    eps = 1e-5
    cidx = jnp.arange(C, dtype=jnp.float32)
    gammas = [1.0 + 0.1 * jnp.sin(cidx + i) for i in range(3)]
    betas = [0.05 * jnp.cos(cidx + i) for i in range(3)]
    run_means = [0.02 * cidx for _ in range(3)]
    run_vars = [1.0 + 0.03 * cidx for _ in range(3)]
    bn_scales = [g / jnp.sqrt(v + eps) for g, v in zip(gammas, run_vars)]
    bn_biases = [b_ - m * s for b_, m, s in zip(betas, run_means, bn_scales)]

    out = local_attention_forward(x, conv_weights, bn_scales, bn_biases)
    out = jax.block_until_ready(out)

    ref = _ref_forward(x, conv_weights, bn_scales, bn_biases)
    assert out.shape == (B, C, H, W)
    err = float(jnp.max(jnp.abs(out - ref)))
    assert jnp.allclose(out, ref, atol=2e-2, rtol=2e-2), err

    print("KERNEL_OK")
</pallas_src>

<mosaic_0001>
module attributes {stable_mosaic.version = 11 : i64} {
  func.func @kernel(%arg0: i32, %arg1: i32, %arg2: memref<1x16x16x128xf32, #tpu.memory_space<vmem>>, %arg3: memref<9x128xf32, #tpu.memory_space<vmem>>, %arg4: memref<1x128xf32, #tpu.memory_space<vmem>>, %arg5: memref<9x128xf32, #tpu.memory_space<vmem>>, %arg6: memref<1x128xf32, #tpu.memory_space<vmem>>, %arg7: memref<9x128xf32, #tpu.memory_space<vmem>>, %arg8: memref<1x128xf32, #tpu.memory_space<vmem>>, %arg9: memref<16x2x1xf32, #tpu.memory_space<vmem>>, %arg10: memref<2x16x1xf32, #tpu.memory_space<vmem>>, %arg11: memref<1x16x16x128xf32, #tpu.memory_space<vmem>>, %arg12: memref<18x25x128xf32, #tpu.memory_space<vmem>>, %arg13: memref<10x17x128xf32, #tpu.memory_space<vmem>>, %arg14: memref<6x13x128xf32, #tpu.memory_space<vmem>>) attributes {dimension_semantics = [#tpu.dimension_semantics<parallel>, #tpu.dimension_semantics<parallel>], iteration_bounds = array<i64: 2, 1>, scalar_prefetch = 0 : i64, scratch_operands = 3 : i64, tpu.core_type = #tpu.core_type<tc>, window_params = [{transform_indices = @transform_0, window_bounds = array<i64: 1, 16, 16, 128>}, {transform_indices = @transform_1, window_bounds = array<i64: 9, 128>}, {transform_indices = @transform_2, window_bounds = array<i64: 1, 128>}, {transform_indices = @transform_3, window_bounds = array<i64: 9, 128>}, {transform_indices = @transform_4, window_bounds = array<i64: 1, 128>}, {transform_indices = @transform_5, window_bounds = array<i64: 9, 128>}, {transform_indices = @transform_6, window_bounds = array<i64: 1, 128>}, {pipeline_mode = #tpu.pipeline_mode<synchronous>, transform_indices = @transform_7, window_bounds = array<i64: 16, 2, 1>}, {pipeline_mode = #tpu.pipeline_mode<synchronous>, transform_indices = @transform_8, window_bounds = array<i64: 2, 16, 1>}, {transform_indices = @transform_9, window_bounds = array<i64: 1, 16, 16, 128>}]} {
    %c0 = arith.constant 0 : index
    %c0_0 = arith.constant 0 : index
    %c0_1 = arith.constant 0 : index
    %c0_2 = arith.constant 0 : index
    %0 = vector.load %arg2[%c0, %c0_0, %c0_1, %c0_2] : memref<1x16x16x128xf32, #tpu.memory_space<vmem>>, vector<1x16x16x128xf32>
    %1 = vector.shape_cast %0 : vector<1x16x16x128xf32> to vector<16x16x128xf32>
    %cst = arith.constant 0.000000e+00 : f32
    %2 = vector.broadcast %cst : f32 to vector<1x18x128xf32>
    %cst_3 = arith.constant 0.000000e+00 : f32
    %3 = vector.broadcast %cst_3 : f32 to vector<16x1x128xf32>
    %c0_4 = arith.constant 0 : index
    %c7 = arith.constant 7 : index
    %c0_5 = arith.constant 0 : index
    %4 = vector.load %arg12[%c0_4, %c7, %c0_5] : memref<18x25x128xf32, #tpu.memory_space<vmem>>, vector<1x18x128xf32>
    tpu.vector_store %arg12[%c0_4, %c7, %c0_5], %2 {strides = array<i32>} : memref<18x25x128xf32, #tpu.memory_space<vmem>>, vector<1x18x128xf32>,
    %c17 = arith.constant 17 : index
    %c7_6 = arith.constant 7 : index
    %c0_7 = arith.constant 0 : index
    %5 = vector.load %arg12[%c17, %c7_6, %c0_7] : memref<18x25x128xf32, #tpu.memory_space<vmem>>, vector<1x18x128xf32>
    tpu.vector_store %arg12[%c17, %c7_6, %c0_7], %2 {strides = array<i32>} : memref<18x25x128xf32, #tpu.memory_space<vmem>>, vector<1x18x128xf32>,
    %c1 = arith.constant 1 : index
    %c7_8 = arith.constant 7 : index
    %c0_9 = arith.constant 0 : index
    %6 = vector.load %arg12[%c1, %c7_8, %c0_9] : memref<18x25x128xf32, #tpu.memory_space<vmem>>, vector<16x1x128xf32>
    tpu.vector_store %arg12[%c1, %c7_8, %c0_9], %3 {strides = array<i32>} : memref<18x25x128xf32, #tpu.memory_space<vmem>>, vector<16x1x128xf32>,
    %c1_10 = arith.constant 1 : index
    %c24 = arith.constant 24 : index
    %c0_11 = arith.constant 0 : index
    %7 = vector.load %arg12[%c1_10, %c24, %c0_11] : memref<18x25x128xf32, #tpu.memory_space<vmem>>, vector<16x1x128xf32>
    tpu.vector_store %arg12[%c1_10, %c24, %c0_11], %3 {strides = array<i32>} : memref<18x25x128xf32, #tpu.memory_space<vmem>>, vector<16x1x128xf32>,
    %c1_12 = arith.constant 1 : index
    %c8 = arith.constant 8 : index
    %c0_13 = arith.constant 0 : index
    %8 = vector.load %arg12[%c1_12, %c8, %c0_13] : memref<18x25x128xf32, #tpu.memory_space<vmem>>, vector<16x16x128xf32>
    tpu.vector_store %arg12[%c1_12, %c8, %c0_13], %1 {strides = array<i32>} : memref<18x25x128xf32, #tpu.memory_space<vmem>>, vector<16x16x128xf32>,
    %c0_14 = arith.constant 0 : index
    %c0_15 = arith.constant 0 : index
    %9 = vector.load %arg3[%c0_14, %c0_15] : memref<9x128xf32, #tpu.memory_space<vmem>>, vector<9x128xf32>
    %c0_16 = arith.constant 0 : index
    %c0_17 = arith.constant 0 : index
    %10 = vector.load %arg4[%c0_16, %c0_17] : memref<1x128xf32, #tpu.memory_space<vmem>>, vector<1x128xf32>
    %11 = vector.shape_cast %10 : vector<1x128xf32> to vector<1x1x128xf32>
    %c0_18 = arith.constant 0 : index
    %c7_19 = arith.constant 7 : index
    %c0_20 = arith.constant 0 : index
    %12 = tpu.strided_load %arg12[%c0_18, %c7_19, %c0_20] {strides = array<i32: 2, 2, 1>} : memref<18x25x128xf32, #tpu.memory_space<vmem>>, vector<8x8x128xf32>
    %13 = vector.extract_strided_slice %9 {offsets = [0, 0], sizes = [1, 128], strides = [1, 1]} : vector<9x128xf32> to vector<1x128xf32>
    %14 = vector.shape_cast %13 : vector<1x128xf32> to vector<128xf32>
    %15 = vector.shape_cast %14 : vector<128xf32> to vector<1x1x128xf32>
    %16 = vector.broadcast %15 : vector<1x1x128xf32> to vector<8x8x128xf32>
    %17 = arith.mulf %12, %16 : vector<8x8x128xf32>
    %c0_21 = arith.constant 0 : index
    %c8_22 = arith.constant 8 : index
    %c0_23 = arith.constant 0 : index
    %18 = tpu.strided_load %arg12[%c0_21, %c8_22, %c0_23] {strides = array<i32: 2, 2, 1>} : memref<18x25x128xf32, #tpu.memory_space<vmem>>, vector<8x8x128xf32>
    %19 = vector.extract_strided_slice %9 {offsets = [1, 0], sizes = [1, 128], strides = [1, 1]} : vector<9x128xf32> to vector<1x128xf32>
    %20 = vector.shape_cast %19 : vector<1x128xf32> to vector<128xf32>
    %21 = vector.shape_cast %20 : vector<128xf32> to vector<1x1x128xf32>
    %22 = vector.broadcast %21 : vector<1x1x128xf32> to vector<8x8x128xf32>
    %23 = arith.mulf %18, %22 : vector<8x8x128xf32>
    %24 = arith.addf %17, %23 : vector<8x8x128xf32>
    %c0_24 = arith.constant 0 : index
    %c9 = arith.constant 9 : index
    %c0_25 = arith.constant 0 : index
    %25 = tpu.strided_load %arg12[%c0_24, %c9, %c0_25] {strides = array<i32: 2, 2, 1>} : memref<18x25x128xf32, #tpu.memory_space<vmem>>, vector<8x8x128xf32>
    %26 = vector.extract_strided_slice %9 {offsets = [2, 0], sizes = [1, 128], strides = [1, 1]} : vector<9x128xf32> to vector<1x128xf32>
    %27 = vector.shape_cast %26 : vector<1x128xf32> to vector<128xf32>
    %28 = vector.shape_cast %27 : vector<128xf32> to vector<1x1x128xf32>
    %29 = vector.broadcast %28 : vector<1x1x128xf32> to vector<8x8x128xf32>
    %30 = arith.mulf %25, %29 : vector<8x8x128xf32>
    %31 = arith.addf %24, %30 : vector<8x8x128xf32>
    %c1_26 = arith.constant 1 : index
    %c7_27 = arith.constant 7 : index
    %c0_28 = arith.constant 0 : index
    %32 = tpu.strided_load %arg12[%c1_26, %c7_27, %c0_28] {strides = array<i32: 2, 2, 1>} : memref<18x25x128xf32, #tpu.memory_space<vmem>>, vector<8x8x128xf32>
    %33 = vector.extract_strided_slice %9 {offsets = [3, 0], sizes = [1, 128], strides = [1, 1]} : vector<9x128xf32> to vector<1x128xf32>
    %34 = vector.shape_cast %33 : vector<1x128xf32> to vector<128xf32>
    %35 = vector.shape_cast %34 : vector<128xf32> to vector<1x1x128xf32>
    %36 = vector.broadcast %35 : vector<1x1x128xf32> to vector<8x8x128xf32>
    %37 = arith.mulf %32, %36 : vector<8x8x128xf32>
    %38 = arith.addf %31, %37 : vector<8x8x128xf32>
    %c1_29 = arith.constant 1 : index
    %c8_30 = arith.constant 8 : index
    %c0_31 = arith.constant 0 : index
    %39 = tpu.strided_load %arg12[%c1_29, %c8_30, %c0_31] {strides = array<i32: 2, 2, 1>} : memref<18x25x128xf32, #tpu.memory_space<vmem>>, vector<8x8x128xf32>
    %40 = vector.extract_strided_slice %9 {offsets = [4, 0], sizes = [1, 128], strides = [1, 1]} : vector<9x128xf32> to vector<1x128xf32>
    %41 = vector.shape_cast %40 : vector<1x128xf32> to vector<128xf32>
    %42 = vector.shape_cast %41 : vector<128xf32> to vector<1x1x128xf32>
    %43 = vector.broadcast %42 : vector<1x1x128xf32> to vector<8x8x128xf32>
    %44 = arith.mulf %39, %43 : vector<8x8x128xf32>
    %45 = arith.addf %38, %44 : vector<8x8x128xf32>
    %c1_32 = arith.constant 1 : index
    %c9_33 = arith.constant 9 : index
    %c0_34 = arith.constant 0 : index
    %46 = tpu.strided_load %arg12[%c1_32, %c9_33, %c0_34] {strides = array<i32: 2, 2, 1>} : memref<18x25x128xf32, #tpu.memory_space<vmem>>, vector<8x8x128xf32>
    %47 = vector.extract_strided_slice %9 {offsets = [5, 0], sizes = [1, 128], strides = [1, 1]} : vector<9x128xf32> to vector<1x128xf32>
    %48 = vector.shape_cast %47 : vector<1x128xf32> to vector<128xf32>
    %49 = vector.shape_cast %48 : vector<128xf32> to vector<1x1x128xf32>
    %50 = vector.broadcast %49 : vector<1x1x128xf32> to vector<8x8x128xf32>
    %51 = arith.mulf %46, %50 : vector<8x8x128xf32>
    %52 = arith.addf %45, %51 : vector<8x8x128xf32>
    %c2 = arith.constant 2 : index
    %c7_35 = arith.constant 7 : index
    %c0_36 = arith.constant 0 : index
    %53 = tpu.strided_load %arg12[%c2, %c7_35, %c0_36] {strides = array<i32: 2, 2, 1>} : memref<18x25x128xf32, #tpu.memory_space<vmem>>, vector<8x8x128xf32>
    %54 = vector.extract_strided_slice %9 {offsets = [6, 0], sizes = [1, 128], strides = [1, 1]} : vector<9x128xf32> to vector<1x128xf32>
    %55 = vector.shape_cast %54 : vector<1x128xf32> to vector<128xf32>
    %56 = vector.shape_cast %55 : vector<128xf32> to vector<1x1x128xf32>
    %57 = vector.broadcast %56 : vector<1x1x128xf32> to vector<8x8x128xf32>
    %58 = arith.mulf %53, %57 : vector<8x8x128xf32>
    %59 = arith.addf %52, %58 : vector<8x8x128xf32>
    %c2_37 = arith.constant 2 : index
    %c8_38 = arith.constant 8 : index
    %c0_39 = arith.constant 0 : index
    %60 = tpu.strided_load %arg12[%c2_37, %c8_38, %c0_39] {strides = array<i32: 2, 2, 1>} : memref<18x25x128xf32, #tpu.memory_space<vmem>>, vector<8x8x128xf32>
    %61 = vector.extract_strided_slice %9 {offsets = [7, 0], sizes = [1, 128], strides = [1, 1]} : vector<9x128xf32> to vector<1x128xf32>
    %62 = vector.shape_cast %61 : vector<1x128xf32> to vector<128xf32>
    %63 = vector.shape_cast %62 : vector<128xf32> to vector<1x1x128xf32>
    %64 = vector.broadcast %63 : vector<1x1x128xf32> to vector<8x8x128xf32>
    %65 = arith.mulf %60, %64 : vector<8x8x128xf32>
    %66 = arith.addf %59, %65 : vector<8x8x128xf32>
    %c2_40 = arith.constant 2 : index
    %c9_41 = arith.constant 9 : index
    %c0_42 = arith.constant 0 : index
    %67 = tpu.strided_load %arg12[%c2_40, %c9_41, %c0_42] {strides = array<i32: 2, 2, 1>} : memref<18x25x128xf32, #tpu.memory_space<vmem>>, vector<8x8x128xf32>
    %68 = vector.extract_strided_slice %9 {offsets = [8, 0], sizes = [1, 128], strides = [1, 1]} : vector<9x128xf32> to vector<1x128xf32>
    %69 = vector.shape_cast %68 : vector<1x128xf32> to vector<128xf32>
    %70 = vector.shape_cast %69 : vector<128xf32> to vector<1x1x128xf32>
    %71 = vector.broadcast %70 : vector<1x1x128xf32> to vector<8x8x128xf32>
    %72 = arith.mulf %67, %71 : vector<8x8x128xf32>
    %73 = arith.addf %66, %72 : vector<8x8x128xf32>
    %74 = vector.broadcast %11 : vector<1x1x128xf32> to vector<8x8x128xf32>
    %75 = arith.addf %73, %74 : vector<8x8x128xf32>
    %cst_43 = arith.constant 0.000000e+00 : f32
    %76 = vector.broadcast %cst_43 : f32 to vector<8x8x128xf32>
    %77 = arith.maximumf %75, %76 : vector<8x8x128xf32>
    %cst_44 = arith.constant 0.000000e+00 : f32
    %78 = vector.broadcast %cst_44 : f32 to vector<1x10x128xf32>
    %cst_45 = arith.constant 0.000000e+00 : f32
    %79 = vector.broadcast %cst_45 : f32 to vector<8x1x128xf32>
    %c0_46 = arith.constant 0 : index
    %c7_47 = arith.constant 7 : index
    %c0_48 = arith.constant 0 : index
    %80 = vector.load %arg13[%c0_46, %c7_47, %c0_48] : memref<10x17x128xf32, #tpu.memory_space<vmem>>, vector<1x10x128xf32>
    tpu.vector_store %arg13[%c0_46, %c7_47, %c0_48], %78 {strides = array<i32>} : memref<10x17x128xf32, #tpu.memory_space<vmem>>, vector<1x10x128xf32>,
    %c9_49 = arith.constant 9 : index
    %c7_50 = arith.constant 7 : index
    %c0_51 = arith.constant 0 : index
    %81 = vector.load %arg13[%c9_49, %c7_50, %c0_51] : memref<10x17x128xf32, #tpu.memory_space<vmem>>, vector<1x10x128xf32>
    tpu.vector_store %arg13[%c9_49, %c7_50, %c0_51], %78 {strides = array<i32>} : memref<10x17x128xf32, #tpu.memory_space<vmem>>, vector<1x10x128xf32>,
    %c1_52 = arith.constant 1 : index
    %c7_53 = arith.constant 7 : index
    %c0_54 = arith.constant 0 : index
    %82 = vector.load %arg13[%c1_52, %c7_53, %c0_54] : memref<10x17x128xf32, #tpu.memory_space<vmem>>, vector<8x1x128xf32>
    tpu.vector_store %arg13[%c1_52, %c7_53, %c0_54], %79 {strides = array<i32>} : memref<10x17x128xf32, #tpu.memory_space<vmem>>, vector<8x1x128xf32>,
    %c1_55 = arith.constant 1 : index
    %c16 = arith.constant 16 : index
    %c0_56 = arith.constant 0 : index
    %83 = vector.load %arg13[%c1_55, %c16, %c0_56] : memref<10x17x128xf32, #tpu.memory_space<vmem>>, vector<8x1x128xf32>
    tpu.vector_store %arg13[%c1_55, %c16, %c0_56], %79 {strides = array<i32>} : memref<10x17x128xf32, #tpu.memory_space<vmem>>, vector<8x1x128xf32>,
    %c1_57 = arith.constant 1 : index
    %c8_58 = arith.constant 8 : index
    %c0_59 = arith.constant 0 : index
    %84 = vector.load %arg13[%c1_57, %c8_58, %c0_59] : memref<10x17x128xf32, #tpu.memory_space<vmem>>, vector<8x8x128xf32>
    tpu.vector_store %arg13[%c1_57, %c8_58, %c0_59], %77 {strides = array<i32>} : memref<10x17x128xf32, #tpu.memory_space<vmem>>, vector<8x8x128xf32>,
    %c0_60 = arith.constant 0 : index
    %c0_61 = arith.constant 0 : index
    %85 = vector.load %arg5[%c0_60, %c0_61] : memref<9x128xf32, #tpu.memory_space<vmem>>, vector<9x128xf32>
    %c0_62 = arith.constant 0 : index
    %c0_63 = arith.constant 0 : index
    %86 = vector.load %arg6[%c0_62, %c0_63] : memref<1x128xf32, #tpu.memory_space<vmem>>, vector<1x128xf32>
    %87 = vector.shape_cast %86 : vector<1x128xf32> to vector<1x1x128xf32>
    %c0_64 = arith.constant 0 : index
    %c7_65 = arith.constant 7 : index
    %c0_66 = arith.constant 0 : index
    %88 = tpu.strided_load %arg13[%c0_64, %c7_65, %c0_66] {strides = array<i32: 2, 2, 1>} : memref<10x17x128xf32, #tpu.memory_space<vmem>>, vector<4x4x128xf32>
    %89 = vector.extract_strided_slice %85 {offsets = [0, 0], sizes = [1, 128], strides = [1, 1]} : vector<9x128xf32> to vector<1x128xf32>
    %90 = vector.shape_cast %89 : vector<1x128xf32> to vector<128xf32>
    %91 = vector.shape_cast %90 : vector<128xf32> to vector<1x1x128xf32>
    %92 = vector.broadcast %91 : vector<1x1x128xf32> to vector<4x4x128xf32>
    %93 = arith.mulf %88, %92 : vector<4x4x128xf32>
    %c0_67 = arith.constant 0 : index
    %c8_68 = arith.constant 8 : index
    %c0_69 = arith.constant 0 : index
    %94 = tpu.strided_load %arg13[%c0_67, %c8_68, %c0_69] {strides = array<i32: 2, 2, 1>} : memref<10x17x128xf32, #tpu.memory_space<vmem>>, vector<4x4x128xf32>
    %95 = vector.extract_strided_slice %85 {offsets = [1, 0], sizes = [1, 128], strides = [1, 1]} : vector<9x128xf32> to vector<1x128xf32>
    %96 = vector.shape_cast %95 : vector<1x128xf32> to vector<128xf32>
    %97 = vector.shape_cast %96 : vector<128xf32> to vector<1x1x128xf32>
    %98 = vector.broadcast %97 : vector<1x1x128xf32> to vector<4x4x128xf32>
    %99 = arith.mulf %94, %98 : vector<4x4x128xf32>
    %100 = arith.addf %93, %99 : vector<4x4x128xf32>
    %c0_70 = arith.constant 0 : index
    %c9_71 = arith.constant 9 : index
    %c0_72 = arith.constant 0 : index
    %101 = tpu.strided_load %arg13[%c0_70, %c9_71, %c0_72] {strides = array<i32: 2, 2, 1>} : memref<10x17x128xf32, #tpu.memory_space<vmem>>, vector<4x4x128xf32>
    %102 = vector.extract_strided_slice %85 {offsets = [2, 0], sizes = [1, 128], strides = [1, 1]} : vector<9x128xf32> to vector<1x128xf32>
    %103 = vector.shape_cast %102 : vector<1x128xf32> to vector<128xf32>
    %104 = vector.shape_cast %103 : vector<128xf32> to vector<1x1x128xf32>
    %105 = vector.broadcast %104 : vector<1x1x128xf32> to vector<4x4x128xf32>
    %106 = arith.mulf %101, %105 : vector<4x4x128xf32>
    %107 = arith.addf %100, %106 : vector<4x4x128xf32>
    %c1_73 = arith.constant 1 : index
    %c7_74 = arith.constant 7 : index
    %c0_75 = arith.constant 0 : index
    %108 = tpu.strided_load %arg13[%c1_73, %c7_74, %c0_75] {strides = array<i32: 2, 2, 1>} : memref<10x17x128xf32, #tpu.memory_space<vmem>>, vector<4x4x128xf32>
    %109 = vector.extract_strided_slice %85 {offsets = [3, 0], sizes = [1, 128], strides = [1, 1]} : vector<9x128xf32> to vector<1x128xf32>
    %110 = vector.shape_cast %109 : vector<1x128xf32> to vector<128xf32>
    %111 = vector.shape_cast %110 : vector<128xf32> to vector<1x1x128xf32>
    %112 = vector.broadcast %111 : vector<1x1x128xf32> to vector<4x4x128xf32>
    %113 = arith.mulf %108, %112 : vector<4x4x128xf32>
    %114 = arith.addf %107, %113 : vector<4x4x128xf32>
    %c1_76 = arith.constant 1 : index
    %c8_77 = arith.constant 8 : index
    %c0_78 = arith.constant 0 : index
    %115 = tpu.strided_load %arg13[%c1_76, %c8_77, %c0_78] {strides = array<i32: 2, 2, 1>} : memref<10x17x128xf32, #tpu.memory_space<vmem>>, vector<4x4x128xf32>
    %116 = vector.extract_strided_slice %85 {offsets = [4, 0], sizes = [1, 128], strides = [1, 1]} : vector<9x128xf32> to vector<1x128xf32>
    %117 = vector.shape_cast %116 : vector<1x128xf32> to vector<128xf32>
    %118 = vector.shape_cast %117 : vector<128xf32> to vector<1x1x128xf32>
    %119 = vector.broadcast %118 : vector<1x1x128xf32> to vector<4x4x128xf32>
    %120 = arith.mulf %115, %119 : vector<4x4x128xf32>
    %121 = arith.addf %114, %120 : vector<4x4x128xf32>
    %c1_79 = arith.constant 1 : index
    %c9_80 = arith.constant 9 : index
    %c0_81 = arith.constant 0 : index
    %122 = tpu.strided_load %arg13[%c1_79, %c9_80, %c0_81] {strides = array<i32: 2, 2, 1>} : memref<10x17x128xf32, #tpu.memory_space<vmem>>, vector<4x4x128xf32>
    %123 = vector.extract_strided_slice %85 {offsets = [5, 0], sizes = [1, 128], strides = [1, 1]} : vector<9x128xf32> to vector<1x128xf32>
    %124 = vector.shape_cast %123 : vector<1x128xf32> to vector<128xf32>
    %125 = vector.shape_cast %124 : vector<128xf32> to vector<1x1x128xf32>
    %126 = vector.broadcast %125 : vector<1x1x128xf32> to vector<4x4x128xf32>
    %127 = arith.mulf %122, %126 : vector<4x4x128xf32>
    %128 = arith.addf %121, %127 : vector<4x4x128xf32>
    %c2_82 = arith.constant 2 : index
    %c7_83 = arith.constant 7 : index
    %c0_84 = arith.constant 0 : index
    %129 = tpu.strided_load %arg13[%c2_82, %c7_83, %c0_84] {strides = array<i32: 2, 2, 1>} : memref<10x17x128xf32, #tpu.memory_space<vmem>>, vector<4x4x128xf32>
    %130 = vector.extract_strided_slice %85 {offsets = [6, 0], sizes = [1, 128], strides = [1, 1]} : vector<9x128xf32> to vector<1x128xf32>
    %131 = vector.shape_cast %130 : vector<1x128xf32> to vector<128xf32>
    %132 = vector.shape_cast %131 : vector<128xf32> to vector<1x1x128xf32>
    %133 = vector.broadcast %132 : vector<1x1x128xf32> to vector<4x4x128xf32>
    %134 = arith.mulf %129, %133 : vector<4x4x128xf32>
    %135 = arith.addf %128, %134 : vector<4x4x128xf32>
    %c2_85 = arith.constant 2 : index
    %c8_86 = arith.constant 8 : index
    %c0_87 = arith.constant 0 : index
    %136 = tpu.strided_load %arg13[%c2_85, %c8_86, %c0_87] {strides = array<i32: 2, 2, 1>} : memref<10x17x128xf32, #tpu.memory_space<vmem>>, vector<4x4x128xf32>
    %137 = vector.extract_strided_slice %85 {offsets = [7, 0], sizes = [1, 128], strides = [1, 1]} : vector<9x128xf32> to vector<1x128xf32>
    %138 = vector.shape_cast %137 : vector<1x128xf32> to vector<128xf32>
    %139 = vector.shape_cast %138 : vector<128xf32> to vector<1x1x128xf32>
    %140 = vector.broadcast %139 : vector<1x1x128xf32> to vector<4x4x128xf32>
    %141 = arith.mulf %136, %140 : vector<4x4x128xf32>
    %142 = arith.addf %135, %141 : vector<4x4x128xf32>
    %c2_88 = arith.constant 2 : index
    %c9_89 = arith.constant 9 : index
    %c0_90 = arith.constant 0 : index
    %143 = tpu.strided_load %arg13[%c2_88, %c9_89, %c0_90] {strides = array<i32: 2, 2, 1>} : memref<10x17x128xf32, #tpu.memory_space<vmem>>, vector<4x4x128xf32>
    %144 = vector.extract_strided_slice %85 {offsets = [8, 0], sizes = [1, 128], strides = [1, 1]} : vector<9x128xf32> to vector<1x128xf32>
    %145 = vector.shape_cast %144 : vector<1x128xf32> to vector<128xf32>
    %146 = vector.shape_cast %145 : vector<128xf32> to vector<1x1x128xf32>
    %147 = vector.broadcast %146 : vector<1x1x128xf32> to vector<4x4x128xf32>
    %148 = arith.mulf %143, %147 : vector<4x4x128xf32>
    %149 = arith.addf %142, %148 : vector<4x4x128xf32>
    %150 = vector.broadcast %87 : vector<1x1x128xf32> to vector<4x4x128xf32>
    %151 = arith.addf %149, %150 : vector<4x4x128xf32>
    %cst_91 = arith.constant 0.000000e+00 : f32
    %152 = vector.broadcast %cst_91 : f32 to vector<4x4x128xf32>
    %153 = arith.maximumf %151, %152 : vector<4x4x128xf32>
    %cst_92 = arith.constant 0.000000e+00 : f32
    %154 = vector.broadcast %cst_92 : f32 to vector<1x6x128xf32>
    %cst_93 = arith.constant 0.000000e+00 : f32
    %155 = vector.broadcast %cst_93 : f32 to vector<4x1x128xf32>
    %c0_94 = arith.constant 0 : index
    %c7_95 = arith.constant 7 : index
    %c0_96 = arith.constant 0 : index
    %156 = vector.load %arg14[%c0_94, %c7_95, %c0_96] : memref<6x13x128xf32, #tpu.memory_space<vmem>>, vector<1x6x128xf32>
    tpu.vector_store %arg14[%c0_94, %c7_95, %c0_96], %154 {strides = array<i32>} : memref<6x13x128xf32, #tpu.memory_space<vmem>>, vector<1x6x128xf32>,
    %c5 = arith.constant 5 : index
    %c7_97 = arith.constant 7 : index
    %c0_98 = arith.constant 0 : index
    %157 = vector.load %arg14[%c5, %c7_97, %c0_98] : memref<6x13x128xf32, #tpu.memory_space<vmem>>, vector<1x6x128xf32>
    tpu.vector_store %arg14[%c5, %c7_97, %c0_98], %154 {strides = array<i32>} : memref<6x13x128xf32, #tpu.memory_space<vmem>>, vector<1x6x128xf32>,
    %c1_99 = arith.constant 1 : index
    %c7_100 = arith.constant 7 : index
    %c0_101 = arith.constant 0 : index
    %158 = vector.load %arg14[%c1_99, %c7_100, %c0_101] : memref<6x13x128xf32, #tpu.memory_space<vmem>>, vector<4x1x128xf32>
    tpu.vector_store %arg14[%c1_99, %c7_100, %c0_101], %155 {strides = array<i32>} : memref<6x13x128xf32, #tpu.memory_space<vmem>>, vector<4x1x128xf32>,
    %c1_102 = arith.constant 1 : index
    %c12 = arith.constant 12 : index
    %c0_103 = arith.constant 0 : index
    %159 = vector.load %arg14[%c1_102, %c12, %c0_103] : memref<6x13x128xf32, #tpu.memory_space<vmem>>, vector<4x1x128xf32>
    tpu.vector_store %arg14[%c1_102, %c12, %c0_103], %155 {strides = array<i32>} : memref<6x13x128xf32, #tpu.memory_space<vmem>>, vector<4x1x128xf32>,
    %c1_104 = arith.constant 1 : index
    %c8_105 = arith.constant 8 : index
    %c0_106 = arith.constant 0 : index
    %160 = vector.load %arg14[%c1_104, %c8_105, %c0_106] : memref<6x13x128xf32, #tpu.memory_space<vmem>>, vector<4x4x128xf32>
    tpu.vector_store %arg14[%c1_104, %c8_105, %c0_106], %153 {strides = array<i32>} : memref<6x13x128xf32, #tpu.memory_space<vmem>>, vector<4x4x128xf32>,
    %c0_107 = arith.constant 0 : index
    %c0_108 = arith.constant 0 : index
    %161 = vector.load %arg7[%c0_107, %c0_108] : memref<9x128xf32, #tpu.memory_space<vmem>>, vector<9x128xf32>
    %c0_109 = arith.constant 0 : index
    %c0_110 = arith.constant 0 : index
    %162 = vector.load %arg8[%c0_109, %c0_110] : memref<1x128xf32, #tpu.memory_space<vmem>>, vector<1x128xf32>
    %163 = vector.shape_cast %162 : vector<1x128xf32> to vector<1x1x128xf32>
    %c0_111 = arith.constant 0 : index
    %c7_112 = arith.constant 7 : index
    %c0_113 = arith.constant 0 : index
    %164 = tpu.strided_load %arg14[%c0_111, %c7_112, %c0_113] {strides = array<i32: 2, 2, 1>} : memref<6x13x128xf32, #tpu.memory_space<vmem>>, vector<2x2x128xf32>
    %165 = vector.extract_strided_slice %161 {offsets = [0, 0], sizes = [1, 128], strides = [1, 1]} : vector<9x128xf32> to vector<1x128xf32>
    %166 = vector.shape_cast %165 : vector<1x128xf32> to vector<128xf32>
    %167 = vector.shape_cast %166 : vector<128xf32> to vector<1x1x128xf32>
    %168 = vector.broadcast %167 : vector<1x1x128xf32> to vector<2x2x128xf32>
    %169 = arith.mulf %164, %168 : vector<2x2x128xf32>
    %c0_114 = arith.constant 0 : index
    %c8_115 = arith.constant 8 : index
    %c0_116 = arith.constant 0 : index
    %170 = tpu.strided_load %arg14[%c0_114, %c8_115, %c0_116] {strides = array<i32: 2, 2, 1>} : memref<6x13x128xf32, #tpu.memory_space<vmem>>, vector<2x2x128xf32>
    %171 = vector.extract_strided_slice %161 {offsets = [1, 0], sizes = [1, 128], strides = [1, 1]} : vector<9x128xf32> to vector<1x128xf32>
    %172 = vector.shape_cast %171 : vector<1x128xf32> to vector<128xf32>
    %173 = vector.shape_cast %172 : vector<128xf32> to vector<1x1x128xf32>
    %174 = vector.broadcast %173 : vector<1x1x128xf32> to vector<2x2x128xf32>
    %175 = arith.mulf %170, %174 : vector<2x2x128xf32>
    %176 = arith.addf %169, %175 : vector<2x2x128xf32>
    %c0_117 = arith.constant 0 : index
    %c9_118 = arith.constant 9 : index
    %c0_119 = arith.constant 0 : index
    %177 = tpu.strided_load %arg14[%c0_117, %c9_118, %c0_119] {strides = array<i32: 2, 2, 1>} : memref<6x13x128xf32, #tpu.memory_space<vmem>>, vector<2x2x128xf32>
    %178 = vector.extract_strided_slice %161 {offsets = [2, 0], sizes = [1, 128], strides = [1, 1]} : vector<9x128xf32> to vector<1x128xf32>
    %179 = vector.shape_cast %178 : vector<1x128xf32> to vector<128xf32>
    %180 = vector.shape_cast %179 : vector<128xf32> to vector<1x1x128xf32>
    %181 = vector.broadcast %180 : vector<1x1x128xf32> to vector<2x2x128xf32>
    %182 = arith.mulf %177, %181 : vector<2x2x128xf32>
    %183 = arith.addf %176, %182 : vector<2x2x128xf32>
    %c1_120 = arith.constant 1 : index
    %c7_121 = arith.constant 7 : index
    %c0_122 = arith.constant 0 : index
    %184 = tpu.strided_load %arg14[%c1_120, %c7_121, %c0_122] {strides = array<i32: 2, 2, 1>} : memref<6x13x128xf32, #tpu.memory_space<vmem>>, vector<2x2x128xf32>
    %185 = vector.extract_strided_slice %161 {offsets = [3, 0], sizes = [1, 128], strides = [1, 1]} : vector<9x128xf32> to vector<1x128xf32>
    %186 = vector.shape_cast %185 : vector<1x128xf32> to vector<128xf32>
    %187 = vector.shape_cast %186 : vector<128xf32> to vector<1x1x128xf32>
    %188 = vector.broadcast %187 : vector<1x1x128xf32> to vector<2x2x128xf32>
    %189 = arith.mulf %184, %188 : vector<2x2x128xf32>
    %190 = arith.addf %183, %189 : vector<2x2x128xf32>
    %c1_123 = arith.constant 1 : index
    %c8_124 = arith.constant 8 : index
    %c0_125 = arith.constant 0 : index
    %191 = tpu.strided_load %arg14[%c1_123, %c8_124, %c0_125] {strides = array<i32: 2, 2, 1>} : memref<6x13x128xf32, #tpu.memory_space<vmem>>, vector<2x2x128xf32>
    %192 = vector.extract_strided_slice %161 {offsets = [4, 0], sizes = [1, 128], strides = [1, 1]} : vector<9x128xf32> to vector<1x128xf32>
    %193 = vector.shape_cast %192 : vector<1x128xf32> to vector<128xf32>
    %194 = vector.shape_cast %193 : vector<128xf32> to vector<1x1x128xf32>
    %195 = vector.broadcast %194 : vector<1x1x128xf32> to vector<2x2x128xf32>
    %196 = arith.mulf %191, %195 : vector<2x2x128xf32>
    %197 = arith.addf %190, %196 : vector<2x2x128xf32>
    %c1_126 = arith.constant 1 : index
    %c9_127 = arith.constant 9 : index
    %c0_128 = arith.constant 0 : index
    %198 = tpu.strided_load %arg14[%c1_126, %c9_127, %c0_128] {strides = array<i32: 2, 2, 1>} : memref<6x13x128xf32, #tpu.memory_space<vmem>>, vector<2x2x128xf32>
    %199 = vector.extract_strided_slice %161 {offsets = [5, 0], sizes = [1, 128], strides = [1, 1]} : vector<9x128xf32> to vector<1x128xf32>
    %200 = vector.shape_cast %199 : vector<1x128xf32> to vector<128xf32>
    %201 = vector.shape_cast %200 : vector<128xf32> to vector<1x1x128xf32>
    %202 = vector.broadcast %201 : vector<1x1x128xf32> to vector<2x2x128xf32>
    %203 = arith.mulf %198, %202 : vector<2x2x128xf32>
    %204 = arith.addf %197, %203 : vector<2x2x128xf32>
    %c2_129 = arith.constant 2 : index
    %c7_130 = arith.constant 7 : index
    %c0_131 = arith.constant 0 : index
    %205 = tpu.strided_load %arg14[%c2_129, %c7_130, %c0_131] {strides = array<i32: 2, 2, 1>} : memref<6x13x128xf32, #tpu.memory_space<vmem>>, vector<2x2x128xf32>
    %206 = vector.extract_strided_slice %161 {offsets = [6, 0], sizes = [1, 128], strides = [1, 1]} : vector<9x128xf32> to vector<1x128xf32>
    %207 = vector.shape_cast %206 : vector<1x128xf32> to vector<128xf32>
    %208 = vector.shape_cast %207 : vector<128xf32> to vector<1x1x128xf32>
    %209 = vector.broadcast %208 : vector<1x1x128xf32> to vector<2x2x128xf32>
    %210 = arith.mulf %205, %209 : vector<2x2x128xf32>
    %211 = arith.addf %204, %210 : vector<2x2x128xf32>
    %c2_132 = arith.constant 2 : index
    %c8_133 = arith.constant 8 : index
    %c0_134 = arith.constant 0 : index
    %212 = tpu.strided_load %arg14[%c2_132, %c8_133, %c0_134] {strides = array<i32: 2, 2, 1>} : memref<6x13x128xf32, #tpu.memory_space<vmem>>, vector<2x2x128xf32>
    %213 = vector.extract_strided_slice %161 {offsets = [7, 0], sizes = [1, 128], strides = [1, 1]} : vector<9x128xf32> to vector<1x128xf32>
    %214 = vector.shape_cast %213 : vector<1x128xf32> to vector<128xf32>
    %215 = vector.shape_cast %214 : vector<128xf32> to vector<1x1x128xf32>
    %216 = vector.broadcast %215 : vector<1x1x128xf32> to vector<2x2x128xf32>
    %217 = arith.mulf %212, %216 : vector<2x2x128xf32>
    %218 = arith.addf %211, %217 : vector<2x2x128xf32>
    %c2_135 = arith.constant 2 : index
    %c9_136 = arith.constant 9 : index
    %c0_137 = arith.constant 0 : index
    %219 = tpu.strided_load %arg14[%c2_135, %c9_136, %c0_137] {strides = array<i32: 2, 2, 1>} : memref<6x13x128xf32, #tpu.memory_space<vmem>>, vector<2x2x128xf32>
    %220 = vector.extract_strided_slice %161 {offsets = [8, 0], sizes = [1, 128], strides = [1, 1]} : vector<9x128xf32> to vector<1x128xf32>
    %221 = vector.shape_cast %220 : vector<1x128xf32> to vector<128xf32>
    %222 = vector.shape_cast %221 : vector<128xf32> to vector<1x1x128xf32>
    %223 = vector.broadcast %222 : vector<1x1x128xf32> to vector<2x2x128xf32>
    %224 = arith.mulf %219, %223 : vector<2x2x128xf32>
    %225 = arith.addf %218, %224 : vector<2x2x128xf32>
    %226 = vector.broadcast %163 : vector<1x1x128xf32> to vector<2x2x128xf32>
    %227 = arith.addf %225, %226 : vector<2x2x128xf32>
    %cst_138 = arith.constant 0.000000e+00 : f32
    %228 = vector.broadcast %cst_138 : f32 to vector<2x2x128xf32>
    %229 = arith.maximumf %227, %228 : vector<2x2x128xf32>
    %c0_139 = arith.constant 0 : index
    %c0_140 = arith.constant 0 : index
    %c0_141 = arith.constant 0 : index
    %230 = vector.load %arg9[%c0_139, %c0_140, %c0_141] : memref<16x2x1xf32, #tpu.memory_space<vmem>>, vector<16x2x1xf32>
    %c0_142 = arith.constant 0 : index
    %c0_143 = arith.constant 0 : index
    %c0_144 = arith.constant 0 : index
    %231 = vector.load %arg10[%c0_142, %c0_143, %c0_144] : memref<2x16x1xf32, #tpu.memory_space<vmem>>, vector<2x16x1xf32>
    %232 = vector.extract_strided_slice %230 {offsets = [0, 0, 0], sizes = [16, 1, 1], strides = [1, 1, 1]} : vector<16x2x1xf32> to vector<16x1x1xf32>
    %233 = vector.extract_strided_slice %229 {offsets = [0, 0, 0], sizes = [1, 2, 128], strides = [1, 1, 1]} : vector<2x2x128xf32> to vector<1x2x128xf32>
    %234 = vector.broadcast %232 : vector<16x1x1xf32> to vector<16x2x128xf32>
    %235 = vector.broadcast %233 : vector<1x2x128xf32> to vector<16x2x128xf32>
    %236 = arith.mulf %234, %235 : vector<16x2x128xf32>
    %237 = vector.extract_strided_slice %230 {offsets = [0, 1, 0], sizes = [16, 1, 1], strides = [1, 1, 1]} : vector<16x2x1xf32> to vector<16x1x1xf32>
    %238 = vector.extract_strided_slice %229 {offsets = [1, 0, 0], sizes = [1, 2, 128], strides = [1, 1, 1]} : vector<2x2x128xf32> to vector<1x2x128xf32>
    %239 = vector.broadcast %237 : vector<16x1x1xf32> to vector<16x2x128xf32>
    %240 = vector.broadcast %238 : vector<1x2x128xf32> to vector<16x2x128xf32>
    %241 = arith.mulf %239, %240 : vector<16x2x128xf32>
    %242 = arith.addf %236, %241 : vector<16x2x128xf32>
    %243 = vector.extract_strided_slice %231 {offsets = [0, 0, 0], sizes = [1, 16, 1], strides = [1, 1, 1]} : vector<2x16x1xf32> to vector<1x16x1xf32>
    %244 = vector.extract_strided_slice %242 {offsets = [0, 0, 0], sizes = [16, 1, 128], strides = [1, 1, 1]} : vector<16x2x128xf32> to vector<16x1x128xf32>
    %245 = vector.broadcast %243 : vector<1x16x1xf32> to vector<16x16x128xf32>
    %246 = vector.broadcast %244 : vector<16x1x128xf32> to vector<16x16x128xf32>
    %247 = arith.mulf %245, %246 : vector<16x16x128xf32>
    %248 = vector.extract_strided_slice %231 {offsets = [1, 0, 0], sizes = [1, 16, 1], strides = [1, 1, 1]} : vector<2x16x1xf32> to vector<1x16x1xf32>
    %249 = vector.extract_strided_slice %242 {offsets = [0, 1, 0], sizes = [16, 1, 128], strides = [1, 1, 1]} : vector<16x2x128xf32> to vector<16x1x128xf32>
    %250 = vector.broadcast %248 : vector<1x16x1xf32> to vector<16x16x128xf32>
    %251 = vector.broadcast %249 : vector<16x1x128xf32> to vector<16x16x128xf32>
    %252 = arith.mulf %250, %251 : vector<16x16x128xf32>
    %253 = arith.addf %247, %252 : vector<16x16x128xf32>
    %254 = arith.negf %253 : vector<16x16x128xf32>
    %255 = math.exp %254 : vector<16x16x128xf32>
    %cst_145 = arith.constant 1.000000e+00 : f32
    %256 = vector.broadcast %cst_145 : f32 to vector<16x16x128xf32>
    %257 = arith.addf %256, %255 : vector<16x16x128xf32>
    %258 = arith.divf %256, %257 : vector<16x16x128xf32>
    %c0_146 = arith.constant 0 : index
    %c0_147 = arith.constant 0 : index
    %c0_148 = arith.constant 0 : index
    %c0_149 = arith.constant 0 : index
    %259 = vector.load %arg2[%c0_146, %c0_147, %c0_148, %c0_149] : memref<1x16x16x128xf32, #tpu.memory_space<vmem>>, vector<1x16x16x128xf32>
    %260 = vector.shape_cast %259 : vector<1x16x16x128xf32> to vector<16x16x128xf32>
    %cst_150 = arith.constant 1.000000e+00 : f32
    %261 = vector.broadcast %cst_150 : f32 to vector<16x16x128xf32>
    %262 = arith.addf %261, %258 : vector<16x16x128xf32>
    %263 = arith.mulf %260, %262 : vector<16x16x128xf32>
    %c0_151 = arith.constant 0 : index
    %c0_152 = arith.constant 0 : index
    %c0_153 = arith.constant 0 : index
    %c0_154 = arith.constant 0 : index
    %264 = vector.load %arg11[%c0_151, %c0_152, %c0_153, %c0_154] : memref<1x16x16x128xf32, #tpu.memory_space<vmem>>, vector<1x16x16x128xf32>
    %265 = vector.shape_cast %264 : vector<1x16x16x128xf32> to vector<16x16x128xf32>
    %266 = vector.shape_cast %263 : vector<16x16x128xf32> to vector<1x16x16x128xf32>
    tpu.vector_store %arg11[%c0_151, %c0_152, %c0_153, %c0_154], %266 {strides = array<i32>} : memref<1x16x16x128xf32, #tpu.memory_space<vmem>>, vector<1x16x16x128xf32>,
    return
  }
  func.func @transform_0(%arg0: i32, %arg1: i32) -> (i32, i32, i32, i32) {
    %c0_i32 = arith.constant 0 : i32
    %c0_i32_0 = arith.constant 0 : i32
    %c0_i32_1 = arith.constant 0 : i32
    return %arg0, %c0_i32, %c0_i32_0, %arg1 : i32, i32, i32, i32
  }
  func.func @transform_1(%arg0: i32, %arg1: i32) -> (i32, i32) {
    %c0_i32 = arith.constant 0 : i32
    %c0_i32_0 = arith.constant 0 : i32
    return %c0_i32, %arg1 : i32, i32
  }
  func.func @transform_2(%arg0: i32, %arg1: i32) -> (i32, i32) {
    %c0_i32 = arith.constant 0 : i32
    %c0_i32_0 = arith.constant 0 : i32
    return %c0_i32, %arg1 : i32, i32
  }
  func.func @transform_3(%arg0: i32, %arg1: i32) -> (i32, i32) {
    %c0_i32 = arith.constant 0 : i32
    %c0_i32_0 = arith.constant 0 : i32
    return %c0_i32, %arg1 : i32, i32
  }
  func.func @transform_4(%arg0: i32, %arg1: i32) -> (i32, i32) {
    %c0_i32 = arith.constant 0 : i32
    %c0_i32_0 = arith.constant 0 : i32
    return %c0_i32, %arg1 : i32, i32
  }
  func.func @transform_5(%arg0: i32, %arg1: i32) -> (i32, i32) {
    %c0_i32 = arith.constant 0 : i32
    %c0_i32_0 = arith.constant 0 : i32
    return %c0_i32, %arg1 : i32, i32
  }
  func.func @transform_6(%arg0: i32, %arg1: i32) -> (i32, i32) {
    %c0_i32 = arith.constant 0 : i32
    %c0_i32_0 = arith.constant 0 : i32
    return %c0_i32, %arg1 : i32, i32
  }
  func.func @transform_7(%arg0: i32, %arg1: i32) -> (i32, i32, i32) {
    %c0_i32 = arith.constant 0 : i32
    %c0_i32_0 = arith.constant 0 : i32
    %c0_i32_1 = arith.constant 0 : i32
    %c0_i32_2 = arith.constant 0 : i32
    return %c0_i32, %c0_i32_0, %c0_i32_1 : i32, i32, i32
  }
  func.func @transform_8(%arg0: i32, %arg1: i32) -> (i32, i32, i32) {
    %c0_i32 = arith.constant 0 : i32
    %c0_i32_0 = arith.constant 0 : i32
    %c0_i32_1 = arith.constant 0 : i32
    %c0_i32_2 = arith.constant 0 : i32
    return %c0_i32, %c0_i32_0, %c0_i32_1 : i32, i32, i32
  }
  func.func @transform_9(%arg0: i32, %arg1: i32) -> (i32, i32, i32, i32) {
    %c0_i32 = arith.constant 0 : i32
    %c0_i32_0 = arith.constant 0 : i32
    %c0_i32_1 = arith.constant 0 : i32
    return %arg0, %c0_i32, %c0_i32_0, %arg1 : i32, i32, i32, i32
  }
}

</mosaic_0001>

<bundles_post_ra>
// kernel: tpu_custom_call.1
= control target key start
LH: loop header
LB: loop body
LE: loop exit
PB: predicated region body
PF: predicated region fallthrough
CT: control target
= control target key end

     0   :  { %s4893_s0 = inlined_call_operand.hbm [shape: f32[2,16,16,128], index: 0, kind: input, shape index: {}]   ;;  %s4894_s1 = inlined_call_operand.vmem [shape: f32[9,128], index: 1, kind: input, shape index: {}]   ;;  %s4895_s2 = inlined_call_operand.vmem [shape: f32[1,128], index: 2, kind: input, shape index: {}]   ;;  %s4896_s3 = inlined_call_operand.vmem [shape: f32[9,128], index: 3, kind: input, shape index: {}]   ;;  %s4897_s4 = inlined_call_operand.vmem [shape: f32[1,128], index: 4, kind: input, shape index: {}]   ;;  %s4898_s5 = inlined_call_operand.vmem [shape: f32[9,128], index: 5, kind: input, shape index: {}]   ;;  %s4899_s6 = inlined_call_operand.vmem [shape: f32[1,128], index: 6, kind: input, shape index: {}]   ;;  %s4900_s7 = inlined_call_operand.vmem [shape: f32[16,2,1], index: 7, kind: input, shape index: {}]   ;;  %s4901_s8 = inlined_call_operand.vmem [shape: f32[2,16,1], index: 8, kind: input, shape index: {}]   ;;  %s4902_s9 = inlined_call_operand.hbm [shape: f32[2,16,16,128], index: 9, kind: output, shape index: {}]  }
   0x1   :  { %4946 = sst [smem:[#allocation20_spill]] %s4893_s0 }
   0x2   :  { %4947 = sst [smem:[#allocation21_spill]] %s4894_s1 }
   0x3   :  { %4948 = sst [smem:[#allocation22_spill]] %s4895_s2 }
   0x4   :  { %4949 = sst [smem:[#allocation23_spill]] %s4896_s3 }
   0x5   :  { %4950 = sst [smem:[#allocation24_spill]] %s4897_s4 }
   0x6   :  { %4951 = sst [smem:[#allocation25_spill]] %s4898_s5 }
   0x7   :  { %4952 = sst [smem:[#allocation26_spill]] %s4899_s6 }
   0x8   :  { %4953 = sst [smem:[#allocation27_spill]] %s4900_s7 }
   0x9   :  { %4954 = sst [smem:[#allocation28_spill]] %s4901_s8 }
   0xa   :  { %14 = vsyncpa [#allocation6], 0 }
   0xb   :  { %16 = vsyncpa [#allocation6 + $0x1], 0 }
   0xc   :  { %17 = vsyncpa [#allocation7], 0 }
   0xd   :  { %19 = vsyncpa [#allocation7 + $0x1], 0  ;;  %s3027_s30 = smov 0   ;;  %s3029_s10 = smov 0  }
   0xe   :  { %s3031_s11 = smov 0   ;;  %s3033_s12 = smov 0  }
   0xf   :  { %s3035_s13 = smov 0   ;;  %s3037_s14 = smov 0  }
  0x10 LB: > { %4955 = sst [smem:[#allocation11_spill]] %s2949_s30  ;;  %s2526_s15 = sadd.s32 4294967295, %s2969_s14   ;;  %s2969_s14 = sphi %s3037_s14, %s25_s14   ;;  %s2965_s13 = sphi %s3035_s13, %s5140_s13   ;;  %s2961_s12 = sphi %s3033_s12, %s5139_s12   ;;  %s2957_s11 = sphi %s3031_s11, %s5138_s11   ;;  %s2953_s10 = sphi %s3029_s10, %s5137_s10   ;;  %s2949_s30 = sphi %s3027_s30, %s5136_s30  }
  0x11   : > { %4956 = sst [smem:[#allocation12_spill]] %s2953_s10  ;;  %s2527_s16 = sadd.s32 4294967294, %s2969_s14  }
  0x12   : > { %4957 = sst [smem:[#allocation13_spill]] %s2957_s11  ;;  %s37_s17 = sadd.s32 1, %s2965_s13 }
  0x13   : > { %4958 = sst [smem:[#allocation14_spill]] %s2965_s13  ;;  %s46_s18 = sadd.s32 1, %s2957_s11 }
  0x14   : > { %4959 = sst [smem:[#allocation15_spill]] %s2969_s14  ;;  %p39_p0 = scmp.ge.s32.totalorder %s37_s17, 2 }
  0x15   : > { %p53_p1 = scmp.ne.s32.totalorder %s2957_s11, %s2953_s10  ;;  %p54_p2 = scmp.eq.s32.totalorder %s2969_s14, 0 }
  0x16   : > { %p59_p3 = scmp.ne.s32.totalorder %s2953_s10, %s2949_s30  ;;  %s5142_s17 = smov (%p39_p0, %s37_s17), 0 }
  0x17   : > { %4960 = sst [smem:[#allocation16_spill]] %s5142_s17  ;;  %p3068_p4 = por %p54_p2, %p53_p1 }
  0x18   : > { %p60_p5 = scmp.eq.s32.totalorder %s2526_s15, 0  ;;  %s41_s20 = ssub.s32 %s2965_s13, %s5142_s17 }
  0x19   : > { %p283_p6 = scmp.eq.s32.totalorder %s2526_s15, 1  ;;  %p44_p7 = scmp.eq.s32.totalorder %s41_s20, 0 }
  0x1a   : > { %p3074_p8 = por %p60_p5, %p59_p3  ;;  %p289_p10 = scmp.eq.s32.totalorder %s2527_s16, 1 }
  0x1b   : > { %p3078_p9 = por %p283_p6, %p53_p1  ;;  %p2535_p12 = scmp.ge.s32.totalorder %s2969_s14, 2 }
  0x1c   : > { %s3083_s23 = scalar_select %p44_p7, %s2957_s11, %s46_s18  }
  0x1d   : > { %p3085_p11 = por %p289_p10, %p59_p3  ;;  %p2657_p13 = scmp.lt.s32.totalorder %s2969_s14, 2 }
  0x1e   : > { %4964 = sst [smem:[#allocation17_spill]] %s3083_s23  ;;  %s354_s25 = sand.u32 1, %s2957_s11  }
  0x1f   : > { %s4965_s24 = scalar_select %p3085_p11, 1, 0 }
  0x20   : > { %s2536_s26 = sshll.u32 %s354_s25, 8  ;;  %s2579_s27 = sshll.u32 %s2965_s13, 8 }
  0x21   : > { %4966 = sst [smem:[#allocation18_spill]] %s4965_s24  ;;  %s358_s20 = scalar_lea.vmem [#allocation5], %s2536_s26 }
  0x22   : > { %s4967_s0 = sld [smem:[#allocation20_spill]]  ;;  %s367_s17 = sshll.u32 %s358_s20, 4  ;;  %s368_s17 = int_to_ptr.vmem [resolvable:$true] %s367_s17 }
  0x23   : > { %p2650_p0 = pnand %p2657_p13, %p3068_p4  ;;  %p2539_p1 = scmp.ge.s32.totalorder %s2969_s14, 1 }
  0x24   : > { %s355_s16 = scalar_lea.sflag [#allocation6], %s354_s25  ;;  %s2971_s18 = smov 128  }
  0x25   : > { %s2972_s23 = smov 8   ;;  %p375_p2 = scmp.lt.s32.totalorder %s2969_s14, 3 }
  0x27   : > { %p376_p3 = pnand %p2539_p1, %p375_p2 }
  0x28   : > { %s364_s15 = scalar_lea.hbm %s4967_s0, %s2579_s27 }
  0x29   : > { %s365_s30 = sshll.u32 %s364_s15, 4  ;;  %379 = sbr.rel (%p376_p3) target bundleno = 445 (0x1bd), region = 56  ;;  %s366_s30 = int_to_ptr.hbm [resolvable:$true] %s365_s30 }
  0x2a   : > { %2652 = dma.hbm_to_vmem [thread:$0]  (!%p2650_p0), %s366_s30, 4096, %s368_s17, %s355_s16, %s2971_s18, %s2971_s18, %s2972_s23  }
  0x2e   : > { %s3101_s13 = sand.u32 1, %s2953_s10  }
  0x2f   : > { %s4906_s26 = sshll.u32 %s3101_s13, 8  ;;  %s382_s27 = scalar_lea.sflag [#allocation6], %s3101_s13 }
  0x30   : > { %s3107_s19 = scalar_lea.vmem [#allocation5], %s4906_s26 }
  0x31   : > { %2940 = dma.done.wait (%p3074_p8), %s382_s27, 4096  }
  0x32   : > { %2942 = vsyncadd (%p3074_p8), %s382_s27, 4294963200  ;;  %v2973_v0 = vmov 0   ;;  %s4968_s8 = sld [smem:[#allocation28_spill]]  ;;  %v2974_v5 = vmov 0.0   ;;  %v463_v41 = vld [vmem:[%s3107_s19] sm:$0xff]  ;;  %v464_v44 = vld [vmem:[%s3107_s19 + $0x8] sm:$0xff] }
  0x33   : > { %2714 = vset.pattern.permute.xlu1 %v2973_v0  ;;  %2713 = vset.pattern.permute.xlu0 %v2973_v0  ;;  %495 = vst [vmem:[#allocation2 + $0x7] sm:$0xff] %v2974_v5  ;;  %s4969_s7 = sld [smem:[#allocation27_spill]]  ;;  %v465_v45 = vld [vmem:[%s3107_s19 + $0x10] sm:$0xff]  ;;  %v466_v48 = vld [vmem:[%s3107_s19 + $0x18] sm:$0xff]  ;;  %v467_v50 = vld [vmem:[%s3107_s19 + $0x20] sm:$0xff] }
  0x34   : > { %496 = vst [vmem:[#allocation2 + $0xf] sm:$0xff] %v2974_v5  ;;  %s4970_s1 = sld [smem:[#allocation21_spill]]  ;;  %v468_v52 = vld [vmem:[%s3107_s19 + $0x28] sm:$0xff]  ;;  %v469_v53 = vld [vmem:[%s3107_s19 + $0x30] sm:$0xff]  ;;  %v470_v56 = vld [vmem:[%s3107_s19 + $0x38] sm:$0xff] }
  0x35   : > { %497 = vst [vmem:[#allocation2 + $0x17] sm:$0x3] %v2974_v5  ;;  %v471_v57 = vld [vmem:[%s3107_s19 + $0x40] sm:$0xff]  ;;  %v472_v58 = vld [vmem:[%s3107_s19 + $0x48] sm:$0xff]  ;;  %v473_v59 = vld [vmem:[%s3107_s19 + $0x50] sm:$0xff]  ;;  %s4971_s2 = sld [smem:[#allocation22_spill]] }
  0x36   : > { %503 = vst [vmem:[#allocation2 + $0x27] sm:$0x1] %v2974_v5  ;;  %v474_v63 = vld [vmem:[%s3107_s19 + $0x58] sm:$0xff]  ;;  %s4972_s3 = sld [smem:[#allocation23_spill]] }
  0x37   : > { %504 = vst [vmem:[#allocation2 + $0x47] sm:$0x1] %v2974_v5  ;;  %s4973_s4 = sld [smem:[#allocation24_spill]] }
  0x38   : > { %v1197_v1 = vld [vmem:[%s4968_s8 + $0x10] sm:$0xff]  ;;  %v1195_v2 = vld [vmem:[%s4968_s8] sm:$0xff]  ;;  %v1198_v3 = vld [vmem:[%s4968_s8 + $0x18] sm:$0xff]  ;;  %505 = vst [vmem:[#allocation2 + $0x67] sm:$0x1] %v2974_v5  ;;  %s4974_s5 = sld [smem:[#allocation25_spill]] }
  0x39   : > { %1435 = vperm.xlu1 %2714, %v1197_v1   ;;  %1377 = vperm.xlu0 %2713, %v1195_v2   ;;  %v1196_v4 = vld [vmem:[%s4968_s8 + $0x8] sm:$0xff]  ;;  %506 = vst [vmem:[#allocation2 + $0x87] sm:$0x1] %v2974_v5  ;;  %v1179_v6 = vld [vmem:[%s4969_s7] sm:$0x3]  ;;  %v475_v2 = vld [vmem:[%s3107_s19 + $0x60] sm:$0xff] }
  0x3a   : > { %507 = vst [vmem:[#allocation2 + $0xa7] sm:$0x1] %v2974_v5  ;;  %v1180_v7 = vld [vmem:[%s4969_s7 + $0x2] sm:$0x3]  ;;  %v1181_v8 = vld [vmem:[%s4969_s7 + $0x4] sm:$0x3] }
  0x3b   : > { %508 = vst [vmem:[#allocation2 + $0xc7] sm:$0x1] %v2974_v5  ;;  %v1182_v9 = vld [vmem:[%s4969_s7 + $0x6] sm:$0x3]  ;;  %v1183_v10 = vld [vmem:[%s4969_s7 + $0x8] sm:$0x3] }
  0x3c   : > { %509 = vst [vmem:[#allocation2 + $0xe7] sm:$0x1] %v2974_v5  ;;  %v1184_v11 = vld [vmem:[%s4969_s7 + $0xa] sm:$0x3]  ;;  %v1185_v12 = vld [vmem:[%s4969_s7 + $0xc] sm:$0x3] }
  0x3d   : > { %510 = vst [vmem:[#allocation2 + $0x107] sm:$0x1] %v2974_v5  ;;  %v1186_v13 = vld [vmem:[%s4969_s7 + $0xe] sm:$0x3]  ;;  %v1187_v14 = vld [vmem:[%s4969_s7 + $0x10] sm:$0x3] }
  0x3e   : > { %511 = vst [vmem:[#allocation2 + $0x127] sm:$0x1] %v2974_v5  ;;  %v1188_v15 = vld [vmem:[%s4969_s7 + $0x12] sm:$0x3]  ;;  %v1189_v16 = vld [vmem:[%s4969_s7 + $0x14] sm:$0x3] }
  0x3f   : > { %512 = vst [vmem:[#allocation2 + $0x147] sm:$0x1] %v2974_v5  ;;  %v1190_v17 = vld [vmem:[%s4969_s7 + $0x16] sm:$0x3]  ;;  %v1191_v18 = vld [vmem:[%s4969_s7 + $0x18] sm:$0x3] }
  0x40   : > { %513 = vst [vmem:[#allocation2 + $0x167] sm:$0x1] %v2974_v5  ;;  %v1192_v19 = vld [vmem:[%s4969_s7 + $0x1a] sm:$0x3]  ;;  %v1279_v20 = vrot.slane %v1179_v6, 1  ;;  %v1280_v22 = vrot.slane %v1180_v7, 1 }
  0x41   : > { %1440 = vperm.xlu1 %2714, %v1198_v3   ;;  %1382 = vperm.xlu0 %2713, %v1196_v4   ;;  %514 = vst [vmem:[#allocation2 + $0x187] sm:$0x1] %v2974_v5  ;;  %v1193_v21 = vld [vmem:[%s4969_s7 + $0x1c] sm:$0x3]  ;;  %v1194_v23 = vld [vmem:[%s4969_s7 + $0x1e] sm:$0x3] }
  0x42   : > { %515 = vst [vmem:[#allocation2 + $0x1a7] sm:$0x1] %v2974_v5  ;;  %v1281_v24 = vrot.slane %v1181_v8, 1  ;;  %v1282_v25 = vrot.slane %v1182_v9, 1  ;;  %v1283_v26 = vrot.slane %v1183_v10, 1  ;;  %v1284_v27 = vrot.slane %v1184_v11, 1 }
  0x43   : > { %516 = vst [vmem:[#allocation2 + $0x1c7] sm:$0x1] %v2974_v5  ;;  %v1285_v28 = vrot.slane %v1185_v12, 1  ;;  %v1286_v29 = vrot.slane %v1186_v13, 1  ;;  %v1287_v30 = vrot.slane %v1187_v14, 1  ;;  %v1288_v31 = vrot.slane %v1188_v15, 1 }
  0x44   : > { %517 = vst [vmem:[#allocation2 + $0x1e7] sm:$0x1] %v2974_v5  ;;  %v1289_v32 = vrot.slane %v1189_v16, 1  ;;  %v1290_v33 = vrot.slane %v1190_v17, 1  ;;  %v1291_v34 = vrot.slane %v1191_v18, 1  ;;  %v1292_v35 = vrot.slane %v1192_v19, 1 }
  0x45   : > { %518 = vst [vmem:[#allocation2 + $0x207] sm:$0x1] %v2974_v5  ;;  %v1293_v36 = vrot.slane %v1193_v21, 1  ;;  %v3176_v37 = vld [vmem:[%s4970_s1] sm:$0xff]  ;;  %v1294_v38 = vrot.slane %v1194_v23, 1  ;;  %s4975_s6 = sld [smem:[#allocation26_spill]] }
  0x46   : > { %879 = vst [vmem:[#allocation3 + $0x7] sm:$0xff] %v2974_v5  ;;  %v571_v39 = vld [vmem:[#allocation2 + $0x7] ss:$2 sm:$0xff]  ;;  %v596_v40 = vld [vmem:[#allocation2 + $0x8] ss:$2 sm:$0xff]  ;;  %v3180_v42 = vperm.slane %v3176_v37, 0 }
  0x47   : > { %880 = vst [vmem:[#allocation3 + $0xf] sm:$0x3] %v2974_v5  ;;  %v3183_v43 = vperm.slane %v3176_v37, 1  ;;  %v629_v49 = vld [vmem:[#allocation2 + $0x9] ss:$2 sm:$0xff]  ;;  %v3192_v51 = vperm.slane %v3176_v37, 2 }
  0x48   : > { %885 = vst [vmem:[#allocation3 + $0x1f] sm:$0x1] %v2974_v5  ;;  %v587_v46 = vmul.f32 %v3180_v42, %v571_v39  ;;  %v3202_v61 = vperm.slane %v3176_v37, 3  ;;  %v3205_v62 = vperm.slane %v3176_v37, 4 }
  0x49   : > { %886 = vst [vmem:[#allocation3 + $0x37] sm:$0x1] %v2974_v5  ;;  %v612_v47 = vmul.f32 %v3183_v43, %v596_v40  ;;  %v645_v55 = vmul.f32 %v3192_v51, %v629_v49 }
  0x4a   : > { %887 = vst [vmem:[#allocation3 + $0x4f] sm:$0x1] %v2974_v5 }
  0x4b   : > { %888 = vst [vmem:[#allocation3 + $0x67] sm:$0x1] %v2974_v5  ;;  %v620_v54 = vadd.f32 %v612_v47, %v587_v46 }
  0x4c   : > { %889 = vst [vmem:[#allocation3 + $0x7f] sm:$0x1] %v2974_v5 }
  0x4d   : > { %890 = vst [vmem:[#allocation3 + $0x97] sm:$0x1] %v2974_v5  ;;  %v653_v60 = vadd.f32 %v645_v55, %v620_v54 }
  0x4e   : > { %891 = vst [vmem:[#allocation3 + $0xaf] sm:$0x1] %v2974_v5 }
  0x4f   : > { %892 = vst [vmem:[#allocation3 + $0xc7] sm:$0x1] %v2974_v5 }
  0x50   : > { %1073 = vst [vmem:[#allocation4 + $0x7] sm:$0x3f] %v2974_v5 }
  0x51   : > { %1077 = vst [vmem:[#allocation4 + $0x17] sm:$0x1] %v2974_v5 }
  0x52   : > { %1078 = vst [vmem:[#allocation4 + $0x27] sm:$0x1] %v2974_v5 }
  0x53   : > { %1079 = vst [vmem:[#allocation4 + $0x37] sm:$0x1] %v2974_v5 }
  0x54   : > { %1080 = vst [vmem:[#allocation4 + $0x47] sm:$0x1] %v2974_v5 }
  0x55   : > { %2581 = vpush %v1179_v6  ;;  %v3212_v6 = vperm.slane %v3176_v37, 5 }
  0x56   : > { %2583 = vpush %v1180_v7  ;;  %v476_v7 = vld [vmem:[%s3107_s19 + $0x68] sm:$0xff] }
  0x57   : > { %2585 = vpush %v1181_v8 }
  0x58   : > { %2587 = vpush %v1182_v9 }
  0x59   : > { %2589 = vpush %v1183_v10  ;;  %v477_v10 = vld [vmem:[%s3107_s19 + $0x70] sm:$0xff] }
  0x5a   : > { %2591 = vpush %v1184_v11 }
  0x5b   : > { %2593 = vpush %v1185_v12 }
  0x5c   : > { %2595 = vpush %v1186_v13 }
  0x5d   : > { %2597 = vpush %v1187_v14 }
  0x5e   : > { %2599 = vpush %v1188_v15 }
  0x5f   : > { %2601 = vpush %v1189_v16 }
  0x60   : > { %2603 = vpush %v1190_v17  ;;  %v478_v17 = vld [vmem:[%s3107_s19 + $0x78] sm:$0xff] }
  0x61   : > { %2605 = vpush %v1191_v18 }
  0x62   : > { %2607 = vpush %v1192_v19 }
  0x63   : > { %2609 = vpush %v1193_v21 }
  0x64   : > { %2611 = vpush %v1194_v23 }
  0x65   : > { %2613 = vpush %v1279_v20  ;;  %v3222_v20 = vperm.slane %v3176_v37, 6 }
  0x66   : > { %2615 = vpush %v1280_v22 }
  0x67   : > { %2617 = vpush %v1281_v24 }
  0x68   : > { %2619 = vpush %v1282_v25 }
  0x69   : > { %2621 = vpush %v1283_v26 }
  0x6a   : > { %2623 = vpush %v1284_v27 }
  0x6b   : > { %2625 = vpush %v1285_v28 }
  0x6c   : > { %2627 = vpush %v1286_v29  ;;  %v3227_v29 = vperm.slane %v3176_v37, 7  ;;  %v3237_v37 = vld [vmem:[%s4970_s1 + $0x8] ss:$0 sm:$0xff] }
  0x6d   : > { %2629 = vpush %v1287_v30 }
  0x6e   : > { %2631 = vpush %v1288_v31 }
  0x6f   : > { %2633 = vpush %v1289_v32 }
  0x70   : > { %2635 = vpush %v1290_v33 }
  0x71   : > { %2637 = vpush %v1291_v34 }
  0x72   : > { %2639 = vpush %v1292_v35 }
  0x73   : > { %2641 = vpush %v1293_v36 }
  0x74   : > { %2643 = vpush %v1294_v38 }
  0x75   : > { %535 = vst [vmem:[#allocation2 + $0x28] sm:$0xff] %v463_v41 }
  0x76   : > { %536 = vst [vmem:[#allocation2 + $0x30] sm:$0xff] %v464_v44 }
  0x77   : > { %537 = vst [vmem:[#allocation2 + $0x48] sm:$0xff] %v465_v45 }
  0x78   : > { %538 = vst [vmem:[#allocation2 + $0x50] sm:$0xff] %v466_v48 }
  0x79   : > { %539 = vst [vmem:[#allocation2 + $0x68] sm:$0xff] %v467_v50 }
  0x7a   : > { %540 = vst [vmem:[#allocation2 + $0x70] sm:$0xff] %v468_v52 }
  0x7b   : > { %541 = vst [vmem:[#allocation2 + $0x88] sm:$0xff] %v469_v53 }
  0x7c   : > { %542 = vst [vmem:[#allocation2 + $0x90] sm:$0xff] %v470_v56 }
  0x7d   : > { %543 = vst [vmem:[#allocation2 + $0xa8] sm:$0xff] %v471_v57  ;;  %v662_v0 = vld [vmem:[#allocation2 + $0x27] ss:$2 sm:$0xff]  ;;  %v695_v1 = vld [vmem:[#allocation2 + $0x28] ss:$2 sm:$0xff] }
  0x7e   : > { %544 = vst [vmem:[#allocation2 + $0xb0] sm:$0xff] %v472_v58  ;;  %v678_v3 = vmul.f32 %v3202_v61, %v662_v0  ;;  %v711_v4 = vmul.f32 %v3205_v62, %v695_v1  ;;  %v728_v5 = vld [vmem:[#allocation2 + $0x29] ss:$2 sm:$0xff] }
  0x7f   : > { %545 = vst [vmem:[#allocation2 + $0xc8] sm:$0xff] %v473_v59  ;;  %v573_v8 = vld [vmem:[#allocation2 + $0x47] ss:$2 sm:$0xff]  ;;  %v598_v9 = vld [vmem:[#allocation2 + $0x48] ss:$2 sm:$0xff]  ;;  %v744_v15 = vmul.f32 %v3212_v6, %v728_v5 }
  0x80   : > { %546 = vst [vmem:[#allocation2 + $0xd0] sm:$0xff] %v474_v63  ;;  %v588_v11 = vmul.f32 %v3180_v42, %v573_v8  ;;  %v613_v12 = vmul.f32 %v3183_v43, %v598_v9  ;;  %v631_v13 = vld [vmem:[#allocation2 + $0x49] ss:$2 sm:$0xff]  ;;  %v686_v14 = vadd.f32 %v678_v3, %v653_v60  ;;  %v795_v25 = vld [vmem:[#allocation2 + $0x48] ss:$2 sm:$0xff]  ;;  %v481_v9 = vld [vmem:[%s3107_s19 + $0x90] sm:$0xff] }
  0x81   : > { %v762_v16 = vld [vmem:[#allocation2 + $0x47] ss:$2 sm:$0xff]  ;;  %547 = vst [vmem:[#allocation2 + $0xe8] sm:$0xff] %v475_v2  ;;  %v646_v18 = vmul.f32 %v3192_v51, %v631_v13  ;;  %v697_v23 = vld [vmem:[#allocation2 + $0x68] ss:$2 sm:$0xff]  ;;  %v811_v41 = vmul.f32 %v3227_v29, %v795_v25 }
  0x82   : > { %v664_v19 = vld [vmem:[#allocation2 + $0x67] ss:$2 sm:$0xff]  ;;  %548 = vst [vmem:[#allocation2 + $0xf0] sm:$0xff] %v476_v7  ;;  %v621_v21 = vadd.f32 %v613_v12, %v588_v11  ;;  %v719_v24 = vadd.f32 %v711_v4, %v686_v14  ;;  %v778_v28 = vmul.f32 %v3222_v20, %v762_v16  ;;  %v712_v40 = vmul.f32 %v3205_v62, %v697_v23 }
  0x83   : > { %v679_v22 = vmul.f32 %v3202_v61, %v664_v19  ;;  %549 = vst [vmem:[#allocation2 + $0x108] sm:$0xff] %v477_v10  ;;  %v575_v26 = vld [vmem:[#allocation2 + $0x87] ss:$2 sm:$0xff]  ;;  %v600_v27 = vld [vmem:[#allocation2 + $0x88] ss:$2 sm:$0xff] }
  0x84   : > { %550 = vst [vmem:[#allocation2 + $0x110] sm:$0xff] %v478_v17  ;;  %v589_v30 = vmul.f32 %v3180_v42, %v575_v26  ;;  %v614_v31 = vmul.f32 %v3183_v43, %v600_v27  ;;  %v633_v32 = vld [vmem:[#allocation2 + $0x89] ss:$2 sm:$0xff]  ;;  %v654_v33 = vadd.f32 %v646_v18, %v621_v21  ;;  %v752_v35 = vadd.f32 %v744_v15, %v719_v24  ;;  %v797_v63 = vld [vmem:[#allocation2 + $0x88] ss:$2 sm:$0xff]  ;;  %v480_v15 = vld [vmem:[%s3107_s19 + $0x88] sm:$0xff] }
  0x85   : > { %v730_v34 = vld [vmem:[#allocation2 + $0x69] ss:$2 sm:$0xff]  ;;  %v647_v36 = vmul.f32 %v3192_v51, %v633_v32  ;;  %v699_v39 = vld [vmem:[#allocation2 + $0xa8] ss:$2 sm:$0xff]  ;;  %v812_v21 = vmul.f32 %v3227_v29, %v797_v63  ;;  %552 = vst [vmem:[#allocation2 + $0x130] sm:$0xff] %v480_v15 }
  0x86   : > { %v666_v38 = vld [vmem:[#allocation2 + $0xa7] ss:$2 sm:$0xff]  ;;  %v622_v44 = vadd.f32 %v614_v31, %v589_v30  ;;  %v687_v46 = vadd.f32 %v679_v22, %v654_v33  ;;  %v713_v54 = vmul.f32 %v3205_v62, %v699_v39  ;;  %v745_v55 = vmul.f32 %v3212_v6, %v730_v34  ;;  %553 = vst [vmem:[#allocation2 + $0x148] sm:$0xff] %v481_v9  ;;  %s3383_s28 = spop %2581 }
  0x87   : > { %v680_v45 = vmul.f32 %v3202_v61, %v666_v38  ;;  %v732_v47 = vld [vmem:[#allocation2 + $0xa9] ss:$2 sm:$0xff]  ;;  %v602_v52 = vld [vmem:[#allocation2 + $0xc8] ss:$2 sm:$0xff]  ;;  %v786_v56 = vadd.f32 %v778_v28, %v752_v35  ;;  %v3260_v28 = vld [vmem:[%s4971_s2] ss:$0 sm:$0xff]  ;;  %s3387_s29 = spop %2583 }
  0x88   : > { %v764_v48 = vld [vmem:[#allocation2 + $0x87] ss:$2 sm:$0xff]  ;;  %v615_v58 = vmul.f32 %v3183_v43, %v602_v52  ;;  %v655_v60 = vadd.f32 %v647_v36, %v622_v44  ;;  %v720_v3 = vadd.f32 %v712_v40, %v687_v46  ;;  %v746_v13 = vmul.f32 %v3212_v6, %v732_v47  ;;  %v799_v19 = vld [vmem:[#allocation2 + $0xc8] ss:$2 sm:$0xff]  ;;  %v484_v44 = vld [vmem:[%s3107_s19 + $0xa8] sm:$0xff]  ;;  %s3394_s20 = spop %2585 }
  0x89   : > { %v828_v49 = vld [vmem:[#allocation2 + $0x49] ss:$2 sm:$0xff]  ;;  %v701_v2 = vld [vmem:[#allocation2 + $0xe8] ss:$2 sm:$0xff]  ;;  %v779_v5 = vmul.f32 %v3222_v20, %v764_v48  ;;  %v819_v7 = vadd.f32 %v811_v41, %v786_v56  ;;  %v3265_v30 = vld [vmem:[%s4972_s3] sm:$0xff]  ;;  %v813_v40 = vmul.f32 %v3227_v29, %v799_v19  ;;  %556 = vst [vmem:[#allocation2 + $0x170] sm:$0xff] %v484_v44  ;;  %s3399_s16 = spop %2587 }
  0x8a   : > { %v577_v50 = vld [vmem:[#allocation2 + $0xc7] ss:$2 sm:$0xff]  ;;  %v844_v8 = vmul.f32 %v3237_v37, %v828_v49  ;;  %v688_v12 = vadd.f32 %v680_v45, %v655_v60  ;;  %v753_v18 = vadd.f32 %v745_v55, %v720_v3  ;;  %v714_v24 = vmul.f32 %v3205_v62, %v701_v2  ;;  %v926_v41 = vld [vmem:[#allocation3 + $0x8] ss:$2 sm:$0xf]  ;;  %s3401_s18 = spop %2589 }
  0x8b   : > { %v635_v53 = vld [vmem:[#allocation2 + $0xc9] ss:$2 sm:$0xff]  ;;  %v590_v57 = vmul.f32 %v3180_v42, %v577_v50  ;;  %v801_v45 = vld [vmem:[#allocation2 + $0x108] ss:$2 sm:$0xff]  ;;  %v3273_v48 = vperm.slane %v3265_v30, 0  ;;  %v3276_v49 = vperm.slane %v3265_v30, 1  ;;  %s3409_s27 = spop %2591 }
  0x8c   : > { %v648_v59 = vmul.f32 %v3192_v51, %v635_v53  ;;  %v479_v0 = vld [vmem:[%s3107_s19 + $0x80] sm:$0xff]  ;;  %v482_v16 = vld [vmem:[%s3107_s19 + $0x98] sm:$0xff]  ;;  %v721_v25 = vadd.f32 %v713_v54, %v688_v12  ;;  %v787_v32 = vadd.f32 %v779_v5, %v753_v18  ;;  %v852_v34 = vadd.f32 %v844_v8, %v819_v7  ;;  %v485_v50 = vld [vmem:[%s3107_s19 + $0xb0] sm:$0xff]  ;;  %s3411_s30 = spop %2593 }
  0x8d   : > { %v668_v1 = vld [vmem:[#allocation2 + $0xe7] ss:$2 sm:$0xff]  ;;  %v623_v10 = vadd.f32 %v615_v58, %v590_v57  ;;  %551 = vst [vmem:[#allocation2 + $0x128] sm:$0xff] %v479_v0  ;;  %v934_v60 = vmul.f32 %v3276_v49, %v926_v41  ;;  %v3288_v7 = vperm.slane %v3265_v30, 2  ;;  %v488_v8 = vld [vmem:[%s3107_s19 + $0xc8] sm:$0xff]  ;;  %s3419_s17 = spop %2595 }
  0x8e   : > { %v766_v4 = vld [vmem:[#allocation2 + $0xc7] ss:$2 sm:$0xff]  ;;  %v681_v11 = vmul.f32 %v3202_v61, %v668_v1  ;;  %v754_v39 = vadd.f32 %v746_v13, %v721_v25  ;;  %v820_v46 = vadd.f32 %v812_v21, %v787_v32  ;;  %v863_v47 = vadd.f32 %v3260_v28, %v852_v34  ;;  %554 = vst [vmem:[#allocation2 + $0x150] sm:$0xff] %v482_v16  ;;  %v604_v19 = vld [vmem:[#allocation2 + $0x108] ss:$2 sm:$0xff]  ;;  %s3423_s23 = spop %2597 }
  0x8f   : > { %v830_v14 = vld [vmem:[#allocation2 + $0x89] ss:$2 sm:$0xff]  ;;  %v656_v23 = vadd.f32 %v648_v59, %v623_v10  ;;  %v780_v26 = vmul.f32 %v3222_v20, %v766_v4  ;;  %v814_v1 = vmul.f32 %v3227_v29, %v801_v45  ;;  %557 = vst [vmem:[#allocation2 + $0x188] sm:$0xff] %v485_v50  ;;  %s3429_s25 = spop %2599 }
  0x90   : > { %v734_v17 = vld [vmem:[#allocation2 + $0xe9] ss:$2 sm:$0xff]  ;;  %v845_v33 = vmul.f32 %v3237_v37, %v830_v14  ;;  %v871_v58 = vmax.f32 %v863_v47, 0.0  ;;  %560 = vst [vmem:[#allocation2 + $0x1b0] sm:$0xff] %v488_v8  ;;  %s3434_s15 = spop %2601 }
  0x91   : > { %v483_v22 = vld [vmem:[%s3107_s19 + $0xa0] sm:$0xff]  ;;  %v913_v35 = vld [vmem:[#allocation3 + $0x7] ss:$2 sm:$0xf]  ;;  %v689_v36 = vadd.f32 %v681_v11, %v656_v23  ;;  %v747_v38 = vmul.f32 %v3212_v6, %v734_v17  ;;  %v788_v54 = vadd.f32 %v780_v26, %v754_v39  ;;  %v3296_v23 = vperm.slane %v3265_v30, 3  ;;  %s3441_s21 = spop %2603 }
  0x92   : > { %v832_v27 = vld [vmem:[#allocation2 + $0xc9] ss:$2 sm:$0xff]  ;;  %555 = vst [vmem:[#allocation2 + $0x168] sm:$0xff] %v483_v22  ;;  %v853_v57 = vadd.f32 %v845_v33, %v820_v46  ;;  %v921_v59 = vmul.f32 %v3273_v48, %v913_v35  ;;  %v489_v17 = vld [vmem:[%s3107_s19 + $0xd0] sm:$0xff]  ;;  %v3302_v26 = vperm.slane %v3265_v30, 5  ;;  %v616_v33 = vmul.f32 %v3183_v43, %v604_v19  ;;  %s3444_s26 = spop %2605 }
  0x93   : > { %v768_v31 = vld [vmem:[#allocation2 + $0x107] ss:$2 sm:$0xff]  ;;  %v722_v52 = vadd.f32 %v714_v24, %v689_v36  ;;  %v846_v55 = vmul.f32 %v3237_v37, %v832_v27  ;;  %v821_v2 = vadd.f32 %v813_v40, %v788_v54  ;;  %901 = vst [vmem:[#allocation3 + $0x20] sm:$0xff] %v871_v58  ;;  %v3299_v24 = vperm.slane %v3265_v30, 4  ;;  %s3448_s0 = spop %2607 }
  0x94   : > { %v781_v53 = vmul.f32 %v3222_v20, %v768_v31  ;;  %v834_v56 = vld [vmem:[#allocation2 + $0x109] ss:$2 sm:$0xff]  ;;  %v864_v5 = vadd.f32 %v3260_v28, %v853_v57  ;;  %v938_v13 = vadd.f32 %v934_v60, %v921_v59  ;;  %561 = vst [vmem:[#allocation2 + $0x1c8] sm:$0xff] %v489_v17  ;;  %v3313_v39 = vperm.slane %v3265_v30, 7  ;;  %v492_v59 = vld [vmem:[%s3107_s19 + $0xe8] sm:$0xff]  ;;  %s3452_s1 = spop %2609 }
  0x95   : > { %v486_v63 = vld [vmem:[%s3107_s19 + $0xb8] sm:$0xff]  ;;  %v755_v0 = vadd.f32 %v747_v38, %v722_v52  ;;  %v487_v4 = vld [vmem:[%s3107_s19 + $0xc0] sm:$0xff]  ;;  %v847_v10 = vmul.f32 %v3237_v37, %v834_v56  ;;  %v854_v11 = vadd.f32 %v846_v55, %v821_v2  ;;  %v3310_v38 = vperm.slane %v3265_v30, 6  ;;  %564 = vst [vmem:[#allocation2 + $0x1f0] sm:$0xff] %v492_v59  ;;  %s3459_s2 = spop %2611 }
  0x96   : > { %v943_v3 = vld [vmem:[#allocation3 + $0x9] ss:$2 sm:$0xf]  ;;  %558 = vst [vmem:[#allocation2 + $0x190] sm:$0xff] %v486_v63  ;;  %v872_v12 = vmax.f32 %v864_v5, 0.0  ;;  %v491_v31 = vld [vmem:[%s3107_s19 + $0xe0] sm:$0xff] }
  0x97   : > { %v789_v9 = vadd.f32 %v781_v53, %v755_v0  ;;  %v951_v14 = vmul.f32 %v3288_v7, %v943_v3  ;;  %559 = vst [vmem:[#allocation2 + $0x1a8] sm:$0xff] %v487_v4  ;;  %v865_v16 = vadd.f32 %v3260_v28, %v854_v11  ;;  %v579_v18 = vld [vmem:[#allocation2 + $0x107] ss:$2 sm:$0xff]  ;;  %v606_v52 = vld [vmem:[#allocation2 + $0x148] ss:$2 sm:$0xff] }
  0x98   : > { %902 = vst [vmem:[#allocation3 + $0x38] sm:$0xff] %v872_v12  ;;  %v490_v27 = vld [vmem:[%s3107_s19 + $0xd8] sm:$0xff]  ;;  %v591_v32 = vmul.f32 %v3180_v42, %v579_v18  ;;  %v493_v4 = vld [vmem:[%s3107_s19 + $0xf0] sm:$0xff]  ;;  %v617_v8 = vmul.f32 %v3183_v43, %v606_v52 }
  0x99   : > { %v822_v15 = vadd.f32 %v814_v1, %v789_v9  ;;  %v873_v22 = vmax.f32 %v865_v16, 0.0  ;;  %v955_v25 = vadd.f32 %v951_v14, %v938_v13  ;;  %v637_v34 = vld [vmem:[#allocation2 + $0x109] ss:$2 sm:$0xff]  ;;  %562 = vst [vmem:[#allocation2 + $0x1d0] sm:$0xff] %v490_v27  ;;  %v3324_v3 = vld [vmem:[%s4972_s3 + $0x8] ss:$0 sm:$0xff]  ;;  %s3461_s3 = spop %2613 }
  0x9a   : > { %v960_v36 = vld [vmem:[#allocation3 + $0x1f] ss:$2 sm:$0xf]  ;;  %v977_v41 = vld [vmem:[#allocation3 + $0x20] ss:$2 sm:$0xf]  ;;  %v624_v56 = vadd.f32 %v616_v33, %v591_v32  ;;  %v649_v57 = vmul.f32 %v3192_v51, %v637_v34  ;;  %s3469_s8 = spop %2615 }
  0x9b   : > { %v855_v21 = vadd.f32 %v847_v10, %v822_v15  ;;  %903 = vst [vmem:[#allocation3 + $0x50] sm:$0xff] %v873_v22  ;;  %v968_v40 = vmul.f32 %v3296_v23, %v960_v36  ;;  %v994_v44 = vld [vmem:[#allocation3 + $0x21] ss:$2 sm:$0xf]  ;;  %v985_v47 = vmul.f32 %v3299_v24, %v977_v41  ;;  %v639_v60 = vld [vmem:[#allocation2 + $0x149] ss:$2 sm:$0xff]  ;;  %s3471_s11 = spop %2617 }
  0x9c   : > { %v670_v45 = vld [vmem:[#allocation2 + $0x127] ss:$2 sm:$0xff]  ;;  %v1002_v54 = vmul.f32 %v3302_v26, %v994_v44  ;;  %563 = vst [vmem:[#allocation2 + $0x1e8] sm:$0xff] %v491_v31  ;;  %v703_v14 = vld [vmem:[#allocation2 + $0x128] ss:$2 sm:$0xff]  ;;  %s3473_s10 = spop %2619 }
  0x9d   : > { %v866_v35 = vadd.f32 %v3260_v28, %v855_v21  ;;  %v581_v50 = vld [vmem:[#allocation2 + $0x147] ss:$2 sm:$0xff]  ;;  %v972_v53 = vadd.f32 %v968_v40, %v955_v25  ;;  %v608_v30 = vld [vmem:[#allocation2 + $0x188] ss:$2 sm:$0xff]  ;;  %v682_v13 = vmul.f32 %v3202_v61, %v670_v45  ;;  %v657_v21 = vadd.f32 %v649_v57, %v624_v56  ;;  %565 = vst [vmem:[#allocation2 + $0x208] sm:$0xff] %v493_v4 }
  0x9e   : > { %v583_v55 = vld [vmem:[#allocation2 + $0x187] ss:$2 sm:$0xff]  ;;  %v592_v5 = vmul.f32 %v3180_v42, %v581_v50  ;;  %v618_v33 = vmul.f32 %v3183_v43, %v608_v30  ;;  %v650_v45 = vmul.f32 %v3192_v51, %v639_v60  ;;  %v715_v57 = vmul.f32 %v3205_v62, %v703_v14  ;;  %v3349_v4 = vld [vmem:[%s4973_s4] ss:$0 sm:$0xff]  ;;  %s3479_s4 = spop %2621 }
  0x9f   : > { %v874_v46 = vmax.f32 %v866_v35, 0.0  ;;  %v915_v58 = vld [vmem:[#allocation3 + $0x37] ss:$2 sm:$0xf]  ;;  %v989_v2 = vadd.f32 %v985_v47, %v972_v53  ;;  %v494_v31 = vld [vmem:[%s3107_s19 + $0xf8] sm:$0xff]  ;;  %v593_v32 = vmul.f32 %v3180_v42, %v583_v55  ;;  %v690_v56 = vadd.f32 %v682_v13, %v657_v21  ;;  %s3484_s14 = spop %2623 }
  0xa0   : > { %v922_v63 = vmul.f32 %v3273_v48, %v915_v58  ;;  %v928_v0 = vld [vmem:[#allocation3 + $0x38] ss:$2 sm:$0xf]  ;;  %v945_v1 = vld [vmem:[#allocation3 + $0x39] ss:$2 sm:$0xf]  ;;  %v625_v44 = vadd.f32 %v617_v8, %v592_v5  ;;  %s3486_s24 = spop %2625 }
  0xa1   : > { %904 = vst [vmem:[#allocation3 + $0x68] sm:$0xff] %v874_v46  ;;  %v935_v9 = vmul.f32 %v3276_v49, %v928_v0  ;;  %v952_v10 = vmul.f32 %v3288_v7, %v945_v1  ;;  %v1012_v11 = vld [vmem:[#allocation3 + $0x37] ss:$2 sm:$0xf]  ;;  %v1006_v17 = vadd.f32 %v1002_v54, %v989_v2  ;;  %v585_v41 = vld [vmem:[#allocation2 + $0x1c7] ss:$2 sm:$0xff]  ;;  %v626_v60 = vadd.f32 %v618_v33, %v593_v32 }
  0xa2   : > { %v1029_v12 = vld [vmem:[#allocation3 + $0x38] ss:$2 sm:$0xf]  ;;  %v962_v15 = vld [vmem:[#allocation3 + $0x4f] ss:$2 sm:$0xf]  ;;  %v1020_v18 = vmul.f32 %v3310_v38, %v1012_v11  ;;  %v594_v50 = vmul.f32 %v3180_v42, %v585_v41 }
  0xa3   : > { %v979_v16 = vld [vmem:[#allocation3 + $0x50] ss:$2 sm:$0xf]  ;;  %v1037_v19 = vmul.f32 %v3313_v39, %v1029_v12  ;;  %v939_v22 = vadd.f32 %v935_v9, %v922_v63  ;;  %v969_v25 = vmul.f32 %v3296_v23, %v962_v15  ;;  %v1046_v27 = vld [vmem:[#allocation3 + $0x39] ss:$2 sm:$0xf] }
  0xa4   : > { %v641_v34 = vld [vmem:[#allocation2 + $0x189] ss:$2 sm:$0xff]  ;;  %v1024_v36 = vadd.f32 %v1020_v18, %v1006_v17  ;;  %v1054_v40 = vmul.f32 %v3324_v3, %v1046_v27  ;;  %v986_v47 = vmul.f32 %v3299_v24, %v979_v16  ;;  %v610_v52 = vld [vmem:[#allocation2 + $0x1c8] ss:$2 sm:$0xff]  ;;  %566 = vst [vmem:[#allocation2 + $0x210] sm:$0xff] %v494_v31 }
  0xa5   : > { %v996_v35 = vld [vmem:[#allocation3 + $0x51] ss:$2 sm:$0xf]  ;;  %v956_v46 = vadd.f32 %v952_v10, %v939_v22  ;;  %v619_v30 = vmul.f32 %v3183_v43, %v610_v52  ;;  %v651_v0 = vmul.f32 %v3192_v51, %v641_v34  ;;  %v658_v43 = vadd.f32 %v650_v45, %v625_v44  ;;  %v705_v13 = vld [vmem:[#allocation2 + $0x168] ss:$2 sm:$0xff] }
  0xa6   : > { %v672_v53 = vld [vmem:[#allocation2 + $0x167] ss:$2 sm:$0xff]  ;;  %v1041_v55 = vadd.f32 %v1037_v19, %v1024_v36  ;;  %v1003_v59 = vmul.f32 %v3302_v26, %v996_v35  ;;  %v707_v21 = vld [vmem:[#allocation2 + $0x1a8] ss:$2 sm:$0xff]  ;;  %v723_v22 = vadd.f32 %v715_v57, %v690_v56 }
  0xa7   : > { %v973_v58 = vadd.f32 %v969_v25, %v956_v46  ;;  %v643_v63 = vld [vmem:[#allocation2 + $0x1c9] ss:$2 sm:$0xff]  ;;  %v683_v5 = vmul.f32 %v3202_v61, %v672_v53  ;;  %v627_v10 = vadd.f32 %v619_v30, %v594_v50  ;;  %v659_v19 = vadd.f32 %v651_v0, %v626_v60 }
  0xa8   : > { %v1014_v54 = vld [vmem:[#allocation3 + $0x67] ss:$2 sm:$0xf]  ;;  %v1031_v2 = vld [vmem:[#allocation3 + $0x68] ss:$2 sm:$0xf]  ;;  %v1058_v42 = vadd.f32 %v1054_v40, %v1041_v55  ;;  %v652_v11 = vmul.f32 %v3192_v51, %v643_v63  ;;  %v716_v51 = vmul.f32 %v3205_v62, %v705_v13  ;;  %v717_v44 = vmul.f32 %v3205_v62, %v707_v21 }
  0xa9   : > { %v736_v1 = vld [vmem:[#allocation2 + $0x129] ss:$2 sm:$0xff]  ;;  %v990_v8 = vadd.f32 %v986_v47, %v973_v58  ;;  %v1021_v9 = vmul.f32 %v3310_v38, %v1014_v54  ;;  %v1038_v18 = vmul.f32 %v3313_v39, %v1031_v2  ;;  %v691_v33 = vadd.f32 %v683_v5, %v658_v43  ;;  %v709_v40 = vld [vmem:[#allocation2 + $0x1e8] ss:$2 sm:$0xff] }
  0xaa   : > { %v674_v12 = vld [vmem:[#allocation2 + $0x1a7] ss:$2 sm:$0xff]  ;;  %v1065_v15 = vadd.f32 %v3349_v4, %v1058_v42  ;;  %v748_v16 = vmul.f32 %v3212_v6, %v736_v1  ;;  %v660_v36 = vadd.f32 %v652_v11, %v627_v10  ;;  %v718_v56 = vmul.f32 %v3205_v62, %v709_v40  ;;  %v803_v2 = vld [vmem:[#allocation2 + $0x148] ss:$2 sm:$0xff] }
  0xab   : > { %v1048_v14 = vld [vmem:[#allocation3 + $0x69] ss:$2 sm:$0xf]  ;;  %v1007_v17 = vadd.f32 %v1003_v59, %v990_v8  ;;  %v684_v32 = vmul.f32 %v3202_v61, %v674_v12  ;;  %v724_v57 = vadd.f32 %v716_v51, %v691_v33  ;;  %v805_v42 = vld [vmem:[#allocation2 + $0x188] ss:$2 sm:$0xff] }
  0xac   : > { %v738_v25 = vld [vmem:[#allocation2 + $0x169] ss:$2 sm:$0xff]  ;;  %v1069_v27 = vmax.f32 %v1065_v15, 0.0  ;;  %v1055_v35 = vmul.f32 %v3324_v3, %v1048_v14  ;;  %v756_v53 = vadd.f32 %v748_v16, %v723_v22  ;;  %v809_v62 = vld [vmem:[#allocation2 + $0x208] ss:$2 sm:$0xff]  ;;  %v815_v15 = vmul.f32 %v3227_v29, %v803_v2 }
  0xad   : > { %v676_v31 = vld [vmem:[#allocation2 + $0x1e7] ss:$2 sm:$0xff]  ;;  %v1025_v34 = vadd.f32 %v1021_v9, %v1007_v17  ;;  %v749_v46 = vmul.f32 %v3212_v6, %v738_v25  ;;  %v692_v30 = vadd.f32 %v684_v32, %v659_v19  ;;  %v807_v9 = vld [vmem:[#allocation2 + $0x1c8] ss:$2 sm:$0xff]  ;;  %v816_v16 = vmul.f32 %v3227_v29, %v805_v42 }
  0xae   : > { %v740_v41 = vld [vmem:[#allocation2 + $0x1a9] ss:$2 sm:$0xff]  ;;  %1085 = vst [vmem:[#allocation4 + $0x18] sm:$0xf] %v1069_v27  ;;  %v685_v52 = vmul.f32 %v3202_v61, %v676_v31  ;;  %v817_v21 = vmul.f32 %v3227_v29, %v807_v9  ;;  %v818_v22 = vmul.f32 %v3227_v29, %v809_v62 }
  0xaf   : > { %v742_v45 = vld [vmem:[#allocation2 + $0x1e9] ss:$2 sm:$0xff]  ;;  %v1042_v50 = vadd.f32 %v1038_v18, %v1025_v34  ;;  %v750_v58 = vmul.f32 %v3212_v6, %v740_v41  ;;  %v725_v43 = vadd.f32 %v717_v44, %v692_v30  ;;  %v757_v61 = vadd.f32 %v749_v46, %v724_v57 }
  0xb0   : > { %v770_v47 = vld [vmem:[#allocation2 + $0x147] ss:$2 sm:$0xff]  ;;  %v693_v63 = vadd.f32 %v685_v52, %v660_v36  ;;  %v751_v0 = vmul.f32 %v3212_v6, %v742_v45 }
  0xb1   : > { %v772_v54 = vld [vmem:[#allocation2 + $0x187] ss:$2 sm:$0xff]  ;;  %v1059_v60 = vadd.f32 %v1055_v35, %v1042_v50  ;;  %v782_v1 = vmul.f32 %v3222_v20, %v770_v47  ;;  %v758_v14 = vadd.f32 %v750_v58, %v725_v43  ;;  %v1093_v43 = vld [vmem:[#allocation4 + $0x7] ss:$2 sm:$0x3] }
  0xb2   : > { %v774_v55 = vld [vmem:[#allocation2 + $0x1c7] ss:$2 sm:$0xff]  ;;  %v783_v5 = vmul.f32 %v3222_v20, %v772_v54  ;;  %v726_v11 = vadd.f32 %v718_v56, %v693_v63 }
  0xb3   : > { %v776_v59 = vld [vmem:[#allocation2 + $0x207] ss:$2 sm:$0xff]  ;;  %v784_v8 = vmul.f32 %v3222_v20, %v774_v55  ;;  %v1066_v10 = vadd.f32 %v3349_v4, %v1059_v60  ;;  %v790_v13 = vadd.f32 %v782_v1, %v756_v53  ;;  %v930_v55 = vld [vmem:[#allocation3 + $0x68] ss:$2 sm:$0xf] }
  0xb4   : > { %v785_v12 = vmul.f32 %v3222_v20, %v776_v59  ;;  %v791_v6 = vadd.f32 %v783_v5, %v757_v61  ;;  %v836_v17 = vld [vmem:[#allocation2 + $0x149] ss:$2 sm:$0xff]  ;;  %v759_v19 = vadd.f32 %v751_v0, %v726_v11  ;;  %v936_v59 = vmul.f32 %v3276_v49, %v930_v55  ;;  %v3392_v0 = vld [vmem:[%s4974_s5] sm:$0xff]  ;;  %v1100_v61 = vld [vmem:[#allocation4 + $0x8] ss:$2 sm:$0x3] }
  0xb5   : > { %v1070_v18 = vmax.f32 %v1066_v10, 0.0  ;;  %v838_v25 = vld [vmem:[#allocation2 + $0x189] ss:$2 sm:$0xff]  ;;  %v792_v31 = vadd.f32 %v784_v8, %v758_v14  ;;  %v823_v32 = vadd.f32 %v815_v15, %v790_v13  ;;  %v848_v34 = vmul.f32 %v3237_v37, %v836_v17 }
  0xb6   : > { %v840_v27 = vld [vmem:[#allocation2 + $0x1c9] ss:$2 sm:$0xff]  ;;  %v824_v33 = vadd.f32 %v816_v16, %v791_v6  ;;  %v793_v51 = vadd.f32 %v785_v12, %v759_v19  ;;  %v849_v36 = vmul.f32 %v3237_v37, %v838_v25  ;;  %v1096_v2 = vperm.slane %v3392_v0, 0  ;;  %v1109_v6 = vld [vmem:[#allocation4 + $0x9] ss:$2 sm:$0x3] }
  0xb7   : > { %v842_v20 = vld [vmem:[#allocation2 + $0x209] ss:$2 sm:$0xff]  ;;  %1086 = vst [vmem:[#allocation4 + $0x28] sm:$0xf] %v1070_v18  ;;  %v825_v35 = vadd.f32 %v817_v21, %v792_v31  ;;  %v850_v40 = vmul.f32 %v3237_v37, %v840_v27  ;;  %v856_v45 = vadd.f32 %v848_v34, %v823_v32  ;;  %v1103_v42 = vperm.slane %v3392_v0, 1 }
  0xb8   : > { %v826_v41 = vadd.f32 %v818_v22, %v793_v51  ;;  %v851_v44 = vmul.f32 %v3237_v37, %v842_v20  ;;  %v857_v29 = vadd.f32 %v849_v36, %v824_v33  ;;  %v917_v54 = vld [vmem:[#allocation3 + $0x67] ss:$2 sm:$0xf]  ;;  %v1112_v8 = vperm.slane %v3392_v0, 2 }
  0xb9   : > { %v858_v46 = vadd.f32 %v850_v40, %v825_v35  ;;  %v867_v50 = vadd.f32 %v3260_v28, %v856_v45  ;;  %v923_v37 = vmul.f32 %v3273_v48, %v917_v54  ;;  %v947_v63 = vld [vmem:[#allocation3 + $0x69] ss:$2 sm:$0xf]  ;;  %v1097_v11 = vmul.f32 %v1096_v2, %v1093_v43 }
  0xba   : > { %v859_v47 = vadd.f32 %v851_v44, %v826_v41  ;;  %v868_v52 = vadd.f32 %v3260_v28, %v857_v29  ;;  %v953_v1 = vmul.f32 %v3288_v7, %v947_v63  ;;  %v1104_v12 = vmul.f32 %v1103_v42, %v1100_v61  ;;  %v1118_v32 = vld [vmem:[#allocation4 + $0x17] ss:$2 sm:$0x3] }
  0xbb   : > { %v869_v53 = vadd.f32 %v3260_v28, %v858_v46  ;;  %v875_v56 = vmax.f32 %v867_v50, 0.0  ;;  %v1113_v25 = vmul.f32 %v1112_v8, %v1109_v6  ;;  %v1121_v27 = vperm.slane %v3392_v0, 3  ;;  %v1127_v46 = vld [vmem:[#allocation4 + $0x18] ss:$2 sm:$0x3] }
  0xbc   : > { %v870_v30 = vadd.f32 %v3260_v28, %v859_v47  ;;  %v876_v57 = vmax.f32 %v868_v52, 0.0  ;;  %v940_v28 = vadd.f32 %v936_v59, %v923_v37  ;;  %v1106_v22 = vadd.f32 %v1104_v12, %v1097_v11  ;;  %v1136_v59 = vld [vmem:[#allocation4 + $0x19] ss:$2 sm:$0x3] }
  0xbd   : > { %v877_v58 = vmax.f32 %v869_v53, 0.0  ;;  %905 = vst [vmem:[#allocation3 + $0x80] sm:$0xff] %v875_v56  ;;  %v1130_v34 = vperm.slane %v3392_v0, 4  ;;  %v1122_v44 = vmul.f32 %v1121_v27, %v1118_v32  ;;  %v1139_v37 = vperm.slane %v3392_v0, 5 }
  0xbe   : > { %v878_v60 = vmax.f32 %v870_v30, 0.0  ;;  %906 = vst [vmem:[#allocation3 + $0x98] sm:$0xff] %v876_v57  ;;  %v957_v9 = vadd.f32 %v953_v1, %v940_v28  ;;  %v1115_v41 = vadd.f32 %v1113_v25, %v1106_v22  ;;  %v1149_v1 = vperm.slane %v3392_v0, 6  ;;  %v1102_v11 = vld [vmem:[#allocation4 + $0x28] ss:$2 sm:$0x3] }
  0xbf   : > { %907 = vst [vmem:[#allocation3 + $0xb0] sm:$0xff] %v877_v58  ;;  %v1131_v58 = vmul.f32 %v1130_v34, %v1127_v46  ;;  %v1146_v12 = vld [vmem:[#allocation4 + $0x27] ss:$2 sm:$0x3] }
  0xc0   : > { %908 = vst [vmem:[#allocation3 + $0xc8] sm:$0xff] %v878_v60  ;;  %v1124_v57 = vadd.f32 %v1122_v44, %v1115_v41 }
  0xc4   : > { %v964_v5 = vld [vmem:[#allocation3 + $0x7f] ss:$2 sm:$0xf]  ;;  %v981_v10 = vld [vmem:[#allocation3 + $0x80] ss:$2 sm:$0xf] }
  0xc5   : > { %v970_v62 = vmul.f32 %v3296_v23, %v964_v5  ;;  %v919_v13 = vld [vmem:[#allocation3 + $0x97] ss:$2 sm:$0xf]  ;;  %v932_v14 = vld [vmem:[#allocation3 + $0x98] ss:$2 sm:$0xf]  ;;  %v987_v21 = vmul.f32 %v3299_v24, %v981_v10 }
  0xc6   : > { %v949_v15 = vld [vmem:[#allocation3 + $0x99] ss:$2 sm:$0xf]  ;;  %v998_v16 = vld [vmem:[#allocation3 + $0x81] ss:$2 sm:$0xf]  ;;  %v924_v17 = vmul.f32 %v3273_v48, %v919_v13  ;;  %v937_v18 = vmul.f32 %v3276_v49, %v932_v14 }
  0xc7   : > { %v974_v19 = vadd.f32 %v970_v62, %v957_v9  ;;  %v966_v31 = vld [vmem:[#allocation3 + $0xaf] ss:$2 sm:$0xf]  ;;  %v954_v33 = vmul.f32 %v3288_v7, %v949_v15  ;;  %v1004_v20 = vmul.f32 %v3302_v26, %v998_v16  ;;  %v1016_v48 = vld [vmem:[#allocation3 + $0x97] ss:$2 sm:$0xf]  ;;  %v1133_v9 = vadd.f32 %v1131_v58, %v1124_v57 }
  0xc8   : > { %v983_v49 = vld [vmem:[#allocation3 + $0xb0] ss:$2 sm:$0xf]  ;;  %v1033_v51 = vld [vmem:[#allocation3 + $0x98] ss:$2 sm:$0xf]  ;;  %v941_v35 = vadd.f32 %v937_v18, %v924_v17  ;;  %v971_v36 = vmul.f32 %v3296_v23, %v966_v31  ;;  %v1022_v45 = vmul.f32 %v3310_v38, %v1016_v48  ;;  %v1140_v62 = vmul.f32 %v1139_v37, %v1136_v59 }
  0xc9   : > { %v991_v40 = vadd.f32 %v987_v21, %v974_v19  ;;  %v1000_v7 = vld [vmem:[#allocation3 + $0xb1] ss:$2 sm:$0xf]  ;;  %v1050_v29 = vld [vmem:[#allocation3 + $0x99] ss:$2 sm:$0xf]  ;;  %v988_v50 = vmul.f32 %v3299_v24, %v983_v49  ;;  %v1039_v53 = vmul.f32 %v3313_v39, %v1033_v51  ;;  %v1105_v16 = vmul.f32 %v1103_v42, %v1102_v11 }
  0xca   : > { %v958_v47 = vadd.f32 %v954_v33, %v941_v35  ;;  %v1018_v23 = vld [vmem:[#allocation3 + $0xc7] ss:$2 sm:$0xf]  ;;  %v1005_v55 = vmul.f32 %v3302_v26, %v1000_v7  ;;  %v1056_v56 = vmul.f32 %v3324_v3, %v1050_v29  ;;  %v1035_v24 = vld [vmem:[#allocation3 + $0xc8] ss:$2 sm:$0xf]  ;;  %v1142_v17 = vadd.f32 %v1140_v62, %v1133_v9 }
  0xcb   : > { %v1008_v52 = vadd.f32 %v1004_v20, %v991_v40  ;;  %v1023_v63 = vmul.f32 %v3310_v38, %v1018_v23  ;;  %v1052_v26 = vld [vmem:[#allocation3 + $0xc9] ss:$2 sm:$0xf]  ;;  %v1040_v61 = vmul.f32 %v3313_v39, %v1035_v24  ;;  %v1095_v10 = vld [vmem:[#allocation4 + $0x27] ss:$2 sm:$0x3]  ;;  %v1150_v18 = vmul.f32 %v1149_v1, %v1146_v12 }
  0xcc   : > { %v975_v54 = vadd.f32 %v971_v36, %v958_v47  ;;  %v1057_v38 = vmul.f32 %v3324_v3, %v1052_v26  ;;  %v1098_v39 = vmul.f32 %v1096_v2, %v1095_v10  ;;  %v1158_v19 = vperm.slane %v3392_v0, 7  ;;  %v1111_v21 = vld [vmem:[#allocation4 + $0x29] ss:$2 sm:$0x3]  ;;  %v2719_v33 = vld [vmem:[%s4974_s5 + $0x8] ss:$0 sm:$0xff]  ;;  %s3488_s5 = spop %2627 }
  0xcd   : > { %v1026_v30 = vadd.f32 %v1022_v45, %v1008_v52  ;;  %v1155_v3 = vld [vmem:[#allocation4 + $0x28] ss:$2 sm:$0x3]  ;;  %v1114_v2 = vmul.f32 %v1112_v8, %v1111_v21  ;;  %v1152_v32 = vadd.f32 %v1150_v18, %v1142_v17  ;;  %v1164_v20 = vld [vmem:[#allocation4 + $0x29] ss:$2 sm:$0x3]  ;;  %s3490_s7 = spop %2629  ;;  %v1205_v57 = vstv %s3387_s29 }
  0xce   : > { %v992_v60 = vadd.f32 %v988_v50, %v975_v54  ;;  %v1107_v31 = vadd.f32 %v1105_v16, %v1098_v39  ;;  %v1159_v42 = vmul.f32 %v1158_v19, %v1155_v3  ;;  %v2720_v29 = vld [vmem:[%s4975_s6] ss:$0 sm:$0xff]  ;;  %v1209_v58 = vstv %s3394_s20  ;;  %s3496_s6 = spop %2631 }
  0xcf   : > { %v1043_v28 = vadd.f32 %v1039_v53, %v1026_v30  ;;  %v1217_v24 = vstv %s3401_s18  ;;  %v1221_v59 = vstv %s3409_s27  ;;  %v1233_v26 = vstv %s3423_s23 }
  0xd0   : > { %v1009_v43 = vadd.f32 %v1005_v55, %v992_v60  ;;  %v1116_v49 = vadd.f32 %v1114_v2, %v1107_v31  ;;  %v1161_v51 = vadd.f32 %v1159_v42, %v1152_v32  ;;  %v1201_v55 = vstv %s3383_s28  ;;  %s3505_s28 = spop %2633 }
  0xd1   : > { %v1060_v5 = vadd.f32 %v1056_v56, %v1043_v28  ;;  %v1225_v60 = vstv %s3411_s30  ;;  %v1229_v28 = vstv %s3419_s17  ;;  %v1253_v9 = vstv %s3448_s0  ;;  %s3512_s29 = spop %2635  ;;  %s2907_s30 = scalar_lea.hbm %s4902_s9, 512 }
  0xd2   : > { %v1027_v13 = vadd.f32 %v1023_v63, %v1009_v43  ;;  %v1241_v43 = vstv %s3434_s15  ;;  %v1257_v12 = vstv %s3452_s1  ;;  %v1296_v18 = vstv %s3461_s3  ;;  %s3517_s0 = spop %2637 }
  0xd3   : > { %v1067_v14 = vadd.f32 %v3349_v4, %v1060_v5  ;;  %v1249_v5 = vstv %s3444_s26  ;;  %v1302_v31 = vstv %s3471_s11  ;;  %v1305_v2 = vstv %s3473_s10  ;;  %s3523_s1 = spop %2639  ;;  %s2580_s10 = sshll.u32 %s2961_s12, 8 }
  0xd4   : > { %v1044_v6 = vadd.f32 %v1040_v61, %v1027_v13  ;;  %v1245_v61 = vstv %s3441_s21  ;;  %v1261_v13 = vstv %s3459_s2  ;;  %v1308_v32 = vstv %s3479_s4  ;;  %s3530_s2 = spop %2641 }
  0xd5   : > { %v1071_v15 = vmax.f32 %v1067_v14, 0.0  ;;  %s3539_s3 = spop %2643 }
  0xd6   : > { %v1061_v22 = vadd.f32 %v1057_v38, %v1044_v6 }
  0xd7   : > { %1087 = vst [vmem:[#allocation4 + $0x38] sm:$0xf] %v1071_v15 }
  0xd8   : > { %v1068_v25 = vadd.f32 %v3349_v4, %v1061_v22  ;;  %v1168_v4 = vmul.f32 %v2719_v33, %v1164_v20  ;;  %v1299_v22 = vstv %s3469_s8  ;;  %v1314_v20 = vstv %s3486_s24 }
  0xda   : > { %v1072_v48 = vmax.f32 %v1068_v25, 0.0  ;;  %v1170_v45 = vadd.f32 %v1168_v4, %v1161_v51 }
  0xdc   : > { %1088 = vst [vmem:[#allocation4 + $0x48] sm:$0xf] %v1072_v48  ;;  %v1175_v53 = vadd.f32 %v2720_v29, %v1170_v45  ;;  %v1317_v48 = vstv %s3488_s5 }
  0xde   : > { %v1120_v35 = vld [vmem:[#allocation4 + $0x37] ss:$2 sm:$0x3]  ;;  %v1129_v36 = vld [vmem:[#allocation4 + $0x38] ss:$2 sm:$0x3] }
  0xdf   : > { %v1123_v8 = vmul.f32 %v1121_v27, %v1120_v35  ;;  %v1132_v40 = vmul.f32 %v1130_v34, %v1129_v36  ;;  %v1138_v41 = vld [vmem:[#allocation4 + $0x39] ss:$2 sm:$0x3]  ;;  %v1177_v56 = vmax.f32 %v1175_v53, 0.0  ;;  %v1338_v53 = vstv %s3530_s2 }
  0xe0   : > { %v1141_v7 = vmul.f32 %v1139_v37, %v1138_v41  ;;  %v1213_v37 = vstv %s3399_s16 }
  0xe1   : > { %v1125_v44 = vadd.f32 %v1123_v8, %v1116_v49  ;;  %v1263_v10 = vmul.f32 %v1201_v55, %v1177_v56  ;;  %v1264_v11 = vmul.f32 %v1205_v57, %v1177_v56  ;;  %v1265_v38 = vmul.f32 %v1209_v58, %v1177_v56 }
  0xe2   : > { %v1266_v14 = vmul.f32 %v1213_v37, %v1177_v56  ;;  %v1267_v6 = vmul.f32 %v1217_v24, %v1177_v56  ;;  %v1268_v39 = vmul.f32 %v1221_v59, %v1177_v56  ;;  %v1269_v16 = vmul.f32 %v1225_v60, %v1177_v56 }
  0xe3   : > { %v1134_v46 = vadd.f32 %v1132_v40, %v1125_v44  ;;  %v1148_v47 = vld [vmem:[#allocation4 + $0x47] ss:$2 sm:$0x3]  ;;  %v1157_v27 = vld [vmem:[#allocation4 + $0x48] ss:$2 sm:$0x3]  ;;  %v1270_v17 = vmul.f32 %v1229_v28, %v1177_v56  ;;  %v1273_v3 = vmul.f32 %v1241_v43, %v1177_v56  ;;  %v1274_v25 = vmul.f32 %v1245_v61, %v1177_v56 }
  0xe4   : > { %v1151_v34 = vmul.f32 %v1149_v1, %v1148_v47  ;;  %v1160_v50 = vmul.f32 %v1158_v19, %v1157_v27  ;;  %v1166_v52 = vld [vmem:[#allocation4 + $0x49] ss:$2 sm:$0x3]  ;;  %v1237_v1 = vstv %s3429_s25  ;;  %v1271_v19 = vmul.f32 %v1233_v26, %v1177_v56 }
  0xe5   : > { %v1143_v0 = vadd.f32 %v1141_v7, %v1134_v46  ;;  %v1169_v54 = vmul.f32 %v2719_v33, %v1166_v52  ;;  %v1272_v21 = vmul.f32 %v1237_v1, %v1177_v56  ;;  %v1311_v33 = vstv %s3484_s14  ;;  %s2272_s14 = scalar_lea.hbm %s4902_s9, %s2580_s10 }
  0xe6   : > { %v1275_v49 = vmul.f32 %v1249_v5, %v1177_v56  ;;  %v1276_v51 = vmul.f32 %v1253_v9, %v1177_v56  ;;  %v1277_v4 = vmul.f32 %v1257_v12, %v1177_v56  ;;  %v1278_v36 = vmul.f32 %v1261_v13, %v1177_v56  ;;  %s2275_s26 = sshll.u32 %s2272_s14, 4  ;;  %s2276_s26 = int_to_ptr.hbm [resolvable:$true] %s2275_s26 }
  0xe7   : > { %v1153_v23 = vadd.f32 %v1151_v34, %v1143_v0  ;;  %v1323_v47 = vstv %s3496_s6  ;;  %v1326_v27 = vstv %s3505_s28  ;;  %v1329_v0 = vstv %s3512_s29  ;;  %s5036_s6 = sshll.u32 %s3101_s13, 8  ;;  %s2901_s20 = sshra.s32 %s2276_s26, 4  ;;  %s2902_s20 = int_to_ptr.hbm [resolvable:$true] %s2901_s20 }
  0xe8   : > { %v1335_v52 = vstv %s3523_s1  ;;  %s4203_s8 = scalar_lea.vmem [#allocation8], %s5036_s6  ;;  %s2903_s16 = scalar_lea.hbm %s2902_s20, 256 }
  0xe9   : > { %v1162_v30 = vadd.f32 %v1160_v50, %v1153_v23  ;;  %v1332_v50 = vstv %s3517_s0  ;;  %s2273_s24 = sshll.u32 %s4203_s8, 4  ;;  %p2904_p4 = scmp.ne.s32.totalorder %s2902_s20, %s2903_s16  ;;  %s2274_s24 = int_to_ptr.vmem [resolvable:$true] %s2273_s24 }
  0xea   : > { %p2908_p7 = scmp.lt.s32.totalorder %s2902_s20, %s4902_s9  ;;  %p2909_p8 = scmp.lt.s32.totalorder %s2907_s30, %s2903_s16 }
  0xeb   : > { %v1171_v63 = vadd.f32 %v1169_v54, %v1162_v30  ;;  %v1341_v30 = vstv %s3539_s3  ;;  %p2905_p5 = pnand %p2904_p4, %p3078_p9 }
  0xec   : > { %p2910_p10 = por %p2909_p8, %p2908_p7 }
  0xed   : > { %v1176_v62 = vadd.f32 %v2720_v29, %v1171_v63  ;;  %v1320_v29 = vstv %s3490_s7  ;;  %p2906_p6 = pneg %p2905_p5 }
  0xef   : > { %v3514_v15 = vmax.f32 %v1176_v62, 0.0  ;;  %p2911_p13 = pnand %p2910_p10, %p2906_p6 }
  0xf1   : > { %v1343_v42 = vmul.f32 %v1296_v18, %v3514_v15  ;;  %v1344_v35 = vmul.f32 %v1299_v22, %v3514_v15  ;;  %v1345_v8 = vmul.f32 %v1302_v31, %v3514_v15  ;;  %v1346_v40 = vmul.f32 %v1305_v2, %v3514_v15 }
  0xf2   : > { %v1347_v41 = vmul.f32 %v1308_v32, %v3514_v15  ;;  %v1348_v44 = vmul.f32 %v1311_v33, %v3514_v15  ;;  %v1349_v7 = vmul.f32 %v1314_v20, %v3514_v15  ;;  %v1350_v45 = vmul.f32 %v1317_v48, %v3514_v15  ;;  %v3607_v33 = vpop.permute.xlu0 %1377 }
  0xf3   : > { %v3541_v46 = vadd.f32 %v1343_v42, %v1263_v10  ;;  %v3546_v34 = vadd.f32 %v1344_v35, %v1264_v11  ;;  %v3551_v23 = vadd.f32 %v1345_v8, %v1265_v38  ;;  %v3553_v54 = vadd.f32 %v1346_v40, %v1266_v14 }
  0xf4   : > { %v3555_v55 = vadd.f32 %v1347_v41, %v1267_v6  ;;  %v3558_v56 = vadd.f32 %v1348_v44, %v1268_v39  ;;  %v3560_v57 = vadd.f32 %v1349_v7, %v1269_v16  ;;  %v3562_v58 = vadd.f32 %v1350_v45, %v1270_v17 }
  0xf5   : > { %v1351_v37 = vmul.f32 %v1320_v29, %v3514_v15  ;;  %v4941_v24 = vperm.slane %v3541_v46, 0  ;;  %v4943_v59 = vperm.slane %v3541_v46, 1  ;;  %v1352_v60 = vmul.f32 %v1323_v47, %v3514_v15 }
  0xf6   : > { %v1353_v63 = vmul.f32 %v1326_v27, %v3514_v15  ;;  %v4940_v28 = vperm.slane %v3546_v34, 0  ;;  %v4942_v26 = vperm.slane %v3546_v34, 1  ;;  %v1354_v1 = vmul.f32 %v1329_v0, %v3514_v15 }
  0xf7   : > { %v1355_v43 = vmul.f32 %v1332_v50, %v3514_v15  ;;  %v4938_v61 = vperm.slane %v3551_v23, 0  ;;  %v4939_v5 = vperm.slane %v3551_v23, 1  ;;  %v4936_v9 = vperm.slane %v3553_v54, 0 }
  0xf8   : > { %v4937_v62 = vperm.slane %v3553_v54, 1  ;;  %v3577_v10 = vadd.f32 %v1351_v37, %v1271_v19  ;;  %v1356_v11 = vmul.f32 %v1335_v52, %v3514_v15  ;;  %v1357_v12 = vmul.f32 %v1338_v53, %v3514_v15 }
  0xf9   : > { %v1358_v13 = vmul.f32 %v1341_v30, %v3514_v15  ;;  %v4913_v38 = vperm.slane %v3555_v55, 0  ;;  %v4914_v14 = vperm.slane %v3555_v55, 1  ;;  %v3584_v6 = vadd.f32 %v1352_v60, %v1272_v21 }
  0xfa   : > { %v3586_v39 = vadd.f32 %v1353_v63, %v1273_v3  ;;  %v4935_v16 = vperm.slane %v3558_v56, 0  ;;  %v4912_v17 = vperm.slane %v3558_v56, 1  ;;  %v3590_v18 = vadd.f32 %v1354_v1, %v1274_v25  ;;  %v3605_v25 = vpop.permute.xlu1 %1435 }
  0xfb   : > { %v3592_v19 = vadd.f32 %v1355_v43, %v1275_v49  ;;  %v4918_v22 = vperm.slane %v3560_v57, 0  ;;  %v4915_v15 = vperm.slane %v3560_v57, 1  ;;  %v4919_v31 = vperm.slane %v3562_v58, 0 }
  0xfc   : > { %v4934_v2 = vperm.slane %v3562_v58, 1  ;;  %v4933_v21 = vperm.slane %v3577_v10, 0  ;;  %v3599_v3 = vadd.f32 %v1356_v11, %v1276_v51  ;;  %v3601_v32 = vadd.f32 %v1357_v12, %v1277_v4 }
  0xfd   : > { %v3603_v42 = vadd.f32 %v1358_v13, %v1278_v36  ;;  %v4922_v20 = vperm.slane %v3577_v10, 1  ;;  %v4932_v48 = vperm.slane %v3584_v6, 0  ;;  %v4916_v49 = vperm.slane %v3584_v6, 1 }
  0xfe   : > { %v4931_v35 = vperm.slane %v3586_v39, 0  ;;  %v4917_v8 = vperm.slane %v3586_v39, 1  ;;  %v4924_v51 = vperm.slane %v3590_v18, 0  ;;  %v4921_v4 = vperm.slane %v3590_v18, 1 }
  0xff   : > { %4976 = vst [vmem:[#allocation19_spill] sm:$0xff] %v3603_v42  ;;  %v4925_v36 = vperm.slane %v3592_v19, 0  ;;  %v1459_v40 = vmul.f32 %v4943_v59, %v3605_v25  ;;  %v1461_v41 = vmul.f32 %v4942_v26, %v3605_v25  ;;  %v1401_v44 = vmul.f32 %v4941_v24, %v3607_v33 }
 0x100   : > { %v1403_v7 = vmul.f32 %v4940_v28, %v3607_v33  ;;  %v4920_v45 = vperm.slane %v3592_v19, 1  ;;  %v4929_v29 = vperm.slane %v3599_v3, 0  ;;  %v1463_v47 = vmul.f32 %v4939_v5, %v3605_v25 }
 0x101   : > { %v1405_v27 = vmul.f32 %v4938_v61, %v3607_v33  ;;  %v4923_v0 = vperm.slane %v3599_v3, 1  ;;  %v4926_v50 = vperm.slane %v3601_v32, 0  ;;  %v1465_v52 = vmul.f32 %v4937_v62, %v3605_v25 }
 0x102   : > { %v1407_v53 = vmul.f32 %v4936_v9, %v3607_v33  ;;  %v4930_v30 = vperm.slane %v3601_v32, 1  ;;  %v1467_v37 = vmul.f32 %v4914_v14, %v3605_v25  ;;  %v1469_v60 = vmul.f32 %v4912_v17, %v3605_v25 }
 0x103   : > { %v1409_v63 = vmul.f32 %v4913_v38, %v3607_v33  ;;  %v1471_v1 = vmul.f32 %v4915_v15, %v3605_v25  ;;  %v1411_v43 = vmul.f32 %v4935_v16, %v3607_v33  ;;  %v1491_v11 = vadd.f32 %v1459_v40, %v1401_v44 }
 0x104   : > { %v1493_v12 = vadd.f32 %v1461_v41, %v1403_v7  ;;  %v1473_v13 = vmul.f32 %v4934_v2, %v3605_v25  ;;  %v1475_v17 = vmul.f32 %v4922_v20, %v3605_v25  ;;  %v1413_v38 = vmul.f32 %v4918_v22, %v3607_v33 }
 0x105   : > { %v1495_v14 = vadd.f32 %v1463_v47, %v1405_v27  ;;  %v1477_v15 = vmul.f32 %v4916_v49, %v3605_v25  ;;  %v1479_v40 = vmul.f32 %v4917_v8, %v3605_v25  ;;  %v1415_v41 = vmul.f32 %v4919_v31, %v3607_v33 }
 0x106   : > { %v1497_v44 = vadd.f32 %v1465_v52, %v1407_v53  ;;  %v1481_v7 = vmul.f32 %v4921_v4, %v3605_v25  ;;  %v1483_v47 = vmul.f32 %v4920_v45, %v3605_v25  ;;  %v1417_v27 = vmul.f32 %v4933_v21, %v3607_v33 }
 0x107   : > { %v1499_v49 = vadd.f32 %v1467_v37, %v1409_v63  ;;  %v1419_v8 = vmul.f32 %v4932_v48, %v3607_v33  ;;  %v1501_v22 = vadd.f32 %v1469_v60, %v1411_v43  ;;  %v2542_v31 = vmul.f32 -1.442695, %v1491_v11 }
 0x108   : > { %v2544_v52 = vmul.f32 -1.442695, %v1493_v12  ;;  %v1485_v53 = vmul.f32 %v4923_v0, %v3605_v25  ;;  %v1421_v45 = vmul.f32 %v4931_v35, %v3607_v33  ;;  %v1503_v4 = vadd.f32 %v1471_v1, %v1413_v38 }
 0x109   : > { %v2546_v20 = vmul.f32 -1.442695, %v1495_v14  ;;  %v1487_v37 = vmul.f32 %v4930_v30, %v3605_v25  ;;  %v1423_v60 = vmul.f32 %v4924_v51, %v3607_v33  ;;  %v1505_v63 = vadd.f32 %v1473_v13, %v1415_v41 }
 0x10a   : > { %v2548_v43 = vmul.f32 -1.442695, %v1497_v44  ;;  %v1425_v11 = vmul.f32 %v4925_v36, %v3607_v33  ;;  %v1507_v12 = vadd.f32 %v1475_v17, %v1417_v27  ;;  %2721 = vpow2.f32 %v2542_v31 }
 0x10b   : > { %v2550_v0 = vmul.f32 -1.442695, %v1499_v49  ;;  %v1427_v38 = vmul.f32 %v4929_v29, %v3607_v33  ;;  %v1509_v14 = vadd.f32 %v1477_v15, %v1419_v8  ;;  %2723 = vpow2.f32 %v2544_v52 }
 0x10c   : > { %v2552_v1 = vmul.f32 -1.442695, %v1501_v22  ;;  %v1429_v51 = vmul.f32 %v4926_v50, %v3607_v33  ;;  %v1511_v13 = vadd.f32 %v1479_v40, %v1421_v45  ;;  %2725 = vpow2.f32 %v2546_v20 }
 0x10d   : > { %v2554_v41 = vmul.f32 -1.442695, %v1503_v4  ;;  %v1513_v44 = vadd.f32 %v1481_v7, %v1423_v60  ;;  %2727 = vpow2.f32 %v2548_v43  ;;  %v2556_v36 = vmul.f32 -1.442695, %v1505_v63 }
 0x10e   : > { %v1515_v17 = vadd.f32 %v1483_v47, %v1425_v11  ;;  %2729 = vpow2.f32 %v2550_v0  ;;  %v2558_v31 = vmul.f32 -1.442695, %v1507_v12  ;;  %v4927_v49 = vperm.slane %v3603_v42, 0 }
 0x10f   : > { %v1517_v27 = vadd.f32 %v1485_v53, %v1427_v38  ;;  %2731 = vpow2.f32 %v2552_v1  ;;  %v2560_v15 = vmul.f32 -1.442695, %v1509_v14  ;;  %v4928_v22 = vperm.slane %v3603_v42, 1 }
 0x110   : > { %v2722_v8 = vpop.eup %2721  ;;  %v1519_v52 = vadd.f32 %v1487_v37, %v1429_v51  ;;  %2733 = vpow2.f32 %v2554_v41  ;;  %v2562_v50 = vmul.f32 -1.442695, %v1511_v13  ;;  %v2564_v20 = vmul.f32 -1.442695, %v1513_v44 }
 0x111   : > { %v2724_v45 = vpop.eup %2723  ;;  %2735 = vpow2.f32 %v2556_v36  ;;  %v2566_v40 = vmul.f32 -1.442695, %v1515_v17  ;;  %v2568_v0 = vmul.f32 -1.442695, %v1517_v27  ;;  %v1489_v53 = vmul.f32 %v4928_v22, %v3605_v25 }
 0x112   : > { %v2726_v4 = vpop.eup %2725  ;;  %2737 = vpow2.f32 %v2558_v31  ;;  %v1431_v51 = vmul.f32 %v4927_v49, %v3607_v33  ;;  %v2570_v37 = vmul.f32 -1.442695, %v1519_v52  ;;  %v3720_v36 = vadd.f32 1.0, %v2722_v8 }
 0x113   : > { %v2728_v7 = vpop.eup %2727  ;;  %2739 = vpow2.f32 %v2560_v15  ;;  %v3722_v43 = vadd.f32 1.0, %v2724_v45  ;;  %v3724_v12 = vadd.f32 1.0, %v2726_v4 }
 0x114   : > { %v2730_v47 = vpop.eup %2729  ;;  %2741 = vpow2.f32 %v2562_v50  ;;  %v1521_v25 = vadd.f32 %v1489_v53, %v1431_v51  ;;  %v3726_v14 = vadd.f32 1.0, %v2728_v7  ;;  %v1662_v17 = vand.u32 2147483648, %v3720_v36 }
 0x115   : > { %v2732_v60 = vpop.eup %2731  ;;  %2743 = vpow2.f32 %v2564_v20  ;;  %v3728_v50 = vadd.f32 1.0, %v2730_v47  ;;  %v1692_v15 = vand.u32 2147483648, %v3722_v43  ;;  %v1660_v45 = vand.u32 2147483647, %v3720_v36 }
 0x116   : > { %v2734_v63 = vpop.eup %2733  ;;  %2745 = vpow2.f32 %v2566_v40  ;;  %v3731_v13 = vadd.f32 1.0, %v2732_v60  ;;  %v2572_v27 = vmul.f32 -1.442695, %v1521_v25  ;;  %v3745_v4 = vor.u32 1.1754944e-38, %v1662_v17 }
 0x117   : > { %v2736_v11 = vpop.eup %2735  ;;  %2747 = vpow2.f32 %v2568_v0  ;;  %v3734_v44 = vadd.f32 1.0, %v2734_v63  ;;  %v1690_v40 = vand.u32 2147483647, %v3722_v43  ;;  %v1722_v7 = vand.u32 2147483648, %v3724_v12 }
 0x118   : > { %v2738_v38 = vpop.eup %2737  ;;  %2749 = vpow2.f32 %v2570_v37  ;;  %v3752_v47 = vadd.f32 1.0, %v2736_v11  ;;  %v3756_v51 = vor.u32 1.1754944e-38, %v1692_v15  ;;  %v1720_v25 = vand.u32 2147483647, %v3724_v12 }
 0x119   : > { %v2740_v33 = vpop.eup %2739  ;;  %2751 = vrcp.f32 %v3720_v36  ;;  %v3760_v60 = vadd.f32 1.0, %v2738_v38  ;;  %v1752_v17 = vand.u32 2147483648, %v3726_v14  ;;  %v1750_v22 = vand.u32 2147483647, %v3726_v14 }
 0x11a   : > { %v2742_v1 = vpop.eup %2741  ;;  %2753 = vrcp.f32 %v3722_v43  ;;  %v3768_v11 = vadd.f32 1.0, %v2740_v33  ;;  %vm1656_vm0 = vweird.f32 %v3720_v36  ;;  %v3778_v35 = vor.u32 1.1754944e-38, %v1722_v7 }
 0x11b   : > { %v2744_v41 = vpop.eup %2743  ;;  %2755 = vrcp.f32 %v3724_v12  ;;  %vm1686_vm1 = vweird.f32 %v3722_v43  ;;  %vm1716_vm2 = vweird.f32 %v3724_v12  ;;  %v1780_v9 = vand.u32 2147483647, %v3728_v50 }
 0x11c   : > { %v2746_v31 = vpop.eup %2745  ;;  %2757 = vrcp.f32 %v3726_v14  ;;  %vm1746_vm3 = vweird.f32 %v3726_v14  ;;  %v1782_v61 = vand.u32 2147483648, %v3728_v50  ;;  %vm1776_vm4 = vweird.f32 %v3728_v50 }
 0x11d   : > { %v2748_v8 = vpop.eup %2747  ;;  %2759 = vrcp.f32 %v3728_v50  ;;  %v3786_v21 = vadd.f32 1.0, %v2746_v31  ;;  %vm3816_vm7 = vcmp.eq.f32.partialorder %v1660_v45, 8.507059e+37  ;;  %vm3820_vm8 = vcmp.eq.f32.partialorder %v1690_v40, 8.507059e+37 }
 0x11e   : > { %v2750_v52 = vpop.eup %2749  ;;  %2761 = vrcp.f32 %v3731_v13  ;;  %v3799_v62 = vadd.f32 1.0, %v2748_v8  ;;  %v1810_v8 = vand.u32 2147483647, %v3731_v13  ;;  %vm3824_vm9 = vcmp.eq.f32.partialorder %v1720_v25, 8.507059e+37 }
 0x11f   : > { %v3743_v20 = vpop.eup %2751  ;;  %2763 = vrcp.f32 %v3734_v44  ;;  %v3809_v26 = vadd.f32 1.0, %v2750_v52  ;;  %v1783_v45 = vor.u32 1.1754944e-38, %v1782_v61  ;;  %vm3836_vm12 = vcmp.eq.f32.partialorder %v1750_v22, 8.507059e+37 }
 0x120   : > { %v3750_v0 = vpop.eup %2753  ;;  %2765 = vpow2.f32 %v2572_v27  ;;  %v1652_v53 = vmul.f32 %v3743_v20, %v3720_v36  ;;  %v3770_v27 = vadd.f32 1.0, %v2742_v1  ;;  %v3784_v1 = vadd.f32 1.0, %v2744_v41 }
 0x121   : > { %v3758_v37 = vpop.eup %2755  ;;  %v1682_v63 = vmul.f32 %v3750_v0, %v3722_v43  ;;  %vm1657_vm6 = vweird.f32 %v3743_v20  ;;  %vm1687_vm10 = vweird.f32 %v3750_v0  ;;  %vm3840_vm13 = vcmp.eq.f32.partialorder %v1780_v9, 8.507059e+37 }
 0x122   : > { %v3766_v49 = vpop.eup %2757  ;;  %v1712_v15 = vmul.f32 %v3758_v37, %v3724_v12  ;;  %v1653_v29 = vsub.f32 1.0, %v1652_v53  ;;  %vm1717_vm11 = vweird.f32 %v3758_v37  ;;  %vm3849_vm14 = vmor %vm1656_vm0, %vm1657_vm6  ;;  %v1840_v61 = vand.u32 2147483647, %v3734_v44 }
 0x123   : > { %v3775_v38 = vpop.eup %2759  ;;  %v1683_v30 = vsub.f32 1.0, %v1682_v63  ;;  %v1742_v48 = vmul.f32 %v3766_v49, %v3726_v14  ;;  %v3794_v63 = vor.u32 1.1754944e-38, %v1752_v17  ;;  %vm1747_vm15 = vweird.f32 %v3766_v49  ;;  %vm3861_vm5 = vmor %vm1686_vm1, %vm1687_vm10 }
 0x124   : > { %v3782_v33 = vpop.eup %2761  ;;  %v1713_v2 = vsub.f32 1.0, %v1712_v15  ;;  %v1772_v53 = vmul.f32 %v3775_v38, %v3728_v50  ;;  %2767 = vrcp.f32 %v3752_v47  ;;  %vm1777_vm0 = vweird.f32 %v3775_v38  ;;  %vm3873_vm6 = vmor %vm1716_vm2, %vm1717_vm11 }
 0x125   : > { %v3791_v16 = vpop.eup %2763  ;;  %v1743_v7 = vsub.f32 1.0, %v1742_v48  ;;  %v1802_v41 = vmul.f32 %v3782_v33, %v3731_v13  ;;  %v1654_v48 = vmul.f32 %v3743_v20, %v1653_v29  ;;  %v1684_v17 = vmul.f32 %v3750_v0, %v1683_v30  ;;  %vm3894_vm2 = vmor %vm1746_vm3, %vm1747_vm15 }
 0x126   : > { %v2766_v31 = vpop.eup %2765  ;;  %v1773_v15 = vsub.f32 1.0, %v1772_v53  ;;  %v1832_v5 = vmul.f32 %v3791_v16, %v3734_v44  ;;  %v1714_v28 = vmul.f32 %v3758_v37, %v1713_v2  ;;  %vm1807_vm1 = vweird.f32 %v3782_v33  ;;  %vm3901_vm11 = vmor %vm1776_vm4, %vm1777_vm0 }
 0x127   : > { %v1803_v24 = vsub.f32 1.0, %v1802_v41  ;;  %v3813_v59 = vadd.f32 1.0, %v2766_v31  ;;  %v1744_v52 = vmul.f32 %v3766_v49, %v1743_v7  ;;  %v1655_v40 = vadd.f32 %v3743_v20, %v1654_v48 }
 0x128   : > { %v1833_v53 = vsub.f32 1.0, %v1832_v5  ;;  %v1774_v5 = vmul.f32 %v3775_v38, %v1773_v15  ;;  %v1685_v31 = vadd.f32 %v3750_v0, %v1684_v17  ;;  %v1715_v25 = vadd.f32 %v3758_v37, %v1714_v28 }
 0x129   : > { %v1804_v41 = vmul.f32 %v3782_v33, %v1803_v24  ;;  %v1812_v28 = vand.u32 2147483648, %v3731_v13  ;;  %v1745_v22 = vadd.f32 %v3766_v49, %v1744_v52  ;;  %v1842_v48 = vand.u32 2147483648, %v3734_v44 }
 0x12a   : > { %v1834_v15 = vmul.f32 %v3791_v16, %v1833_v53  ;;  %v1775_v36 = vadd.f32 %v3775_v38, %v1774_v5  ;;  %vm1837_vm10 = vweird.f32 %v3791_v16  ;;  %2769 = vrcp.f32 %v3760_v60 }
 0x12b   : > { %v1805_v43 = vadd.f32 %v3782_v33, %v1804_v41  ;;  %v1659_v53 = vsel %vm3849_vm14, %v3743_v20, %v1655_v40  ;;  %v1689_v12 = vsel %vm3861_vm5, %v3750_v0, %v1685_v31  ;;  %v1719_v52 = vsel %vm3873_vm6, %v3758_v37, %v1715_v25  ;;  %v3930_v40 = vpop.eup %2767 }
 0x12c   : > { %v1835_v41 = vadd.f32 %v3791_v16, %v1834_v15  ;;  %vm3905_vm5 = vcmp.eq.f32.partialorder %v1810_v8, 8.507059e+37  ;;  %v1813_v37 = vor.u32 1.1754944e-38, %v1812_v28  ;;  %vm1836_vm14 = vweird.f32 %v3734_v44 }
 0x12d   : > { %2771 = vrcp.f32 %v3768_v11  ;;  %v1749_v14 = vsel %vm3894_vm2, %v3766_v49, %v1745_v22  ;;  %v1779_v50 = vsel %vm3901_vm11, %v3775_v38, %v1775_v36  ;;  %vm4999_vm3 = vweird.f32 %v3731_v13  ;;  %vm3952_vm0 = vmor %vm1836_vm14, %vm1837_vm10 }
 0x12e   : > { %vm3921_vm4 = vmor %vm4999_vm3, %vm1807_vm1  ;;  %vm3925_vm15 = vcmp.eq.f32.partialorder %v1840_v61, 8.507059e+37  ;;  %2773 = vrcp.f32 %v3770_v27  ;;  %v3935_v49 = vsel %vm3816_vm7, %v3745_v4, %v1659_v53  ;;  %v3940_v13 = vsel %vm3820_vm8, %v3756_v51, %v1689_v12 }
 0x12f   : > { %v3945_v38 = vsel %vm3824_vm9, %v3778_v35, %v1719_v52  ;;  %v1809_v31 = vsel %vm3921_vm4, %v3782_v33, %v1805_v43  ;;  %v1839_v4 = vsel %vm3952_vm0, %v3791_v16, %v1835_v41  ;;  %v1843_v51 = vor.u32 1.1754944e-38, %v1842_v48 }
 0x130   : > { %v1862_v2 = vmul.f32 %v3930_v40, %v3752_v47  ;;  %v1872_v35 = vand.u32 2147483648, %v3752_v47  ;;  %v3962_v30 = vpop.eup %2769  ;;  %v3967_v33 = vsel %vm3836_vm12, %v3794_v63, %v1749_v14  ;;  %v3971_v25 = vsel %vm3840_vm13, %v1783_v45, %v1779_v50 }
 0x131   : > { %v1902_v15 = vand.u32 2147483648, %v3760_v60  ;;  %2775 = vrcp.f32 %v3784_v1  ;;  %v3977_v16 = vsel %vm3905_vm5, %v1813_v37, %v1809_v31  ;;  %vm1866_vm7 = vweird.f32 %v3752_v47 }
 0x132   : > { %v1863_v24 = vsub.f32 1.0, %v1862_v2  ;;  %v1870_v28 = vand.u32 2147483647, %v3752_v47  ;;  %v1892_v42 = vmul.f32 %v3962_v30, %v3760_v60  ;;  %v3987_v45 = vsel %vm3925_vm15, %v1843_v51, %v1839_v4 }
 0x133   : > { %v3983_v63 = vpop.eup %2771  ;;  %v1900_v7 = vand.u32 2147483647, %v3760_v60  ;;  %v1932_v61 = vand.u32 2147483648, %v3768_v11  ;;  %2777 = vrcp.f32 %v3786_v21  ;;  %v1873_v36 = vor.u32 1.1754944e-38, %v1872_v35 }
 0x134   : > { %v3992_v9 = vpop.eup %2773  ;;  %v1864_v22 = vmul.f32 %v3930_v40, %v1863_v24  ;;  %v1893_v48 = vsub.f32 1.0, %v1892_v42  ;;  %vm1896_vm8 = vweird.f32 %v3760_v60  ;;  %v1922_v17 = vmul.f32 %v3983_v63, %v3768_v11 }
 0x135   : > { %v3998_v43 = vor.u32 1.1754944e-38, %v1902_v15  ;;  %vm1926_vm9 = vweird.f32 %v3768_v11  ;;  %v1930_v53 = vand.u32 2147483647, %v3768_v11  ;;  %v1952_v12 = vmul.f32 %v3992_v9, %v3770_v27 }
 0x136   : > { %v1962_v52 = vand.u32 2147483648, %v3770_v27  ;;  %vm1867_vm12 = vweird.f32 %v3930_v40  ;;  %vm4006_vm13 = vcmp.eq.f32.partialorder %v1870_v28, 8.507059e+37  ;;  %v1894_v41 = vmul.f32 %v3962_v30, %v1893_v48 }
 0x137   : > { %v1923_v20 = vsub.f32 1.0, %v1922_v17  ;;  %vm1956_vm6 = vweird.f32 %v3770_v27  ;;  %v1960_v0 = vand.u32 2147483647, %v3770_v27  ;;  %v4013_v37 = vpop.eup %2775  ;;  %v1933_v14 = vor.u32 1.1754944e-38, %v1932_v61  ;;  %vm4048_vm3 = vmor %vm1866_vm7, %vm1867_vm12 }
 0x138   : > { %v1953_v50 = vsub.f32 1.0, %v1952_v12  ;;  %v1992_v8 = vand.u32 2147483648, %v3784_v1  ;;  %2779 = vrcp.f32 %v3799_v62  ;;  %v1865_v44 = vadd.f32 %v3930_v40, %v1864_v22 }
 0x139   : > { %vm4018_vm1 = vcmp.eq.f32.partialorder %v1900_v7, 8.507059e+37  ;;  %v1924_v29 = vmul.f32 %v3983_v63, %v1923_v20  ;;  %v1982_v4 = vmul.f32 %v4013_v37, %v3784_v1  ;;  %v1990_v51 = vand.u32 2147483647, %v3784_v1  ;;  %v4026_v2 = vpop.eup %2777 }
 0x13a   : > { %vm1897_vm10 = vweird.f32 %v3962_v30  ;;  %vm4029_vm2 = vcmp.eq.f32.partialorder %v1930_v53, 8.507059e+37  ;;  %v1954_v15 = vmul.f32 %v3992_v9, %v1953_v50  ;;  %v1963_v24 = vor.u32 1.1754944e-38, %v1962_v52 }
 0x13b   : > { %vm1986_vm11 = vweird.f32 %v3784_v1  ;;  %v1895_v28 = vadd.f32 %v3962_v30, %v1894_v41  ;;  %vm4036_vm5 = vcmp.eq.f32.partialorder %v1960_v0, 8.507059e+37  ;;  %v1983_v7 = vsub.f32 1.0, %v1982_v4  ;;  %vm4070_vm7 = vmor %vm1896_vm8, %vm1897_vm10  ;;  %v2141_v4 = vld [vmem:[%s3107_s19 + $0x50] sm:$0xff] }
 0x13c   : > { %v2012_v61 = vmul.f32 %v4026_v2, %v3786_v21  ;;  %vm2016_vm14 = vweird.f32 %v3786_v21  ;;  %v2020_v22 = vand.u32 2147483647, %v3786_v21  ;;  %v1925_v17 = vadd.f32 %v3983_v63, %v1924_v29 }
 0x13d   : > { %vm1927_vm4 = vweird.f32 %v3983_v63  ;;  %vm1957_vm15 = vweird.f32 %v3992_v9  ;;  %v1993_v53 = vor.u32 1.1754944e-38, %v1992_v8  ;;  %v1869_v12 = vsel %vm4048_vm3, %v3930_v40, %v1865_v44 }
 0x13e   : > { %v1955_v52 = vadd.f32 %v3992_v9, %v1954_v15  ;;  %v1984_v41 = vmul.f32 %v4013_v37, %v1983_v7  ;;  %vm4060_vm0 = vcmp.eq.f32.partialorder %v1990_v51, 8.507059e+37  ;;  %v2013_v20 = vsub.f32 1.0, %v2012_v61  ;;  %v4064_v0 = vpop.eup %2779  ;;  %vm4085_vm8 = vmor %vm1926_vm9, %vm1927_vm4 }
 0x13f   : > { %vm1987_vm12 = vweird.f32 %v4013_v37  ;;  %v2022_v40 = vand.u32 2147483648, %v3786_v21  ;;  %vm2046_vm3 = vweird.f32 %v3799_v62  ;;  %2781 = vrcp.f32 %v3809_v26  ;;  %vm4106_vm9 = vmor %vm1956_vm6, %vm1957_vm15 }
 0x140   : > { %v1899_v8 = vsel %vm4070_vm7, %v3962_v30, %v1895_v28  ;;  %v1985_v44 = vadd.f32 %v4013_v37, %v1984_v41  ;;  %v2014_v29 = vmul.f32 %v4026_v2, %v2013_v20  ;;  %vm4091_vm10 = vcmp.eq.f32.partialorder %v2020_v22, 8.507059e+37  ;;  %vm4124_vm6 = vmor %vm1986_vm11, %vm1987_vm12 }
 0x141   : > { %v2042_v51 = vmul.f32 %v4064_v0, %v3799_v62  ;;  %v1874_v30 = vsel %vm4006_vm13, %v1873_v36, %v1869_v12  ;;  %v1929_v11 = vsel %vm4085_vm8, %v3983_v63, %v1925_v17  ;;  %v2050_v28 = vand.u32 2147483647, %v3799_v62 }
 0x142   : > { %v2052_v7 = vand.u32 2147483648, %v3799_v62  ;;  %v1959_v36 = vsel %vm4106_vm9, %v3992_v9, %v1955_v52  ;;  %v2015_v5 = vadd.f32 %v4026_v2, %v2014_v29  ;;  %vm2017_vm13 = vweird.f32 %v4026_v2  ;;  %v2135_v29 = vld [vmem:[%s3107_s19 + $0x20] sm:$0xff] }
 0x143   : > { %v2043_v63 = vsub.f32 1.0, %v2042_v51  ;;  %v1904_v27 = vsel %vm4018_vm1, %v3998_v43, %v1899_v8  ;;  %v2023_v22 = vor.u32 1.1754944e-38, %v2022_v40  ;;  %v2082_v9 = vand.u32 2147483648, %v3809_v26  ;;  %vm4143_vm11 = vmor %vm2016_vm14, %vm2017_vm13  ;;  %v2131_v40 = vld [vmem:[%s3107_s19] sm:$0xff] }
 0x144   : > { %2783 = vrcp.f32 %v3813_v59  ;;  %v1934_v48 = vsel %vm4029_vm2, %v1933_v14, %v1929_v11  ;;  %v1989_v43 = vsel %vm4124_vm6, %v4013_v37, %v1985_v44  ;;  %vm2047_vm1 = vweird.f32 %v4064_v0  ;;  %v2133_v44 = vld [vmem:[%s3107_s19 + $0x10] sm:$0xff] }
 0x145   : > { %v2044_v31 = vmul.f32 %v4064_v0, %v2043_v63  ;;  %v4137_v1 = vpop.eup %2781  ;;  %v1964_v17 = vsel %vm4036_vm5, %v1963_v24, %v1959_v36  ;;  %vm4147_vm2 = vcmp.eq.f32.partialorder %v2050_v28, 8.507059e+37  ;;  %v2053_v37 = vor.u32 1.1754944e-38, %v2052_v7  ;;  %vm4163_vm5 = vmor %vm2046_vm3, %vm2047_vm1  ;;  %v2139_v28 = vld [vmem:[%s3107_s19 + $0x40] sm:$0xff] }
 0x146   : > { %vm2076_vm4 = vweird.f32 %v3809_v26  ;;  %v2019_v35 = vsel %vm4143_vm11, %v4026_v2, %v2015_v5  ;;  %v2072_v21 = vmul.f32 %v4137_v1, %v3809_v26  ;;  %v2080_v42 = vand.u32 2147483647, %v3809_v26  ;;  %v2143_v63 = vld [vmem:[%s3107_s19 + $0x60] sm:$0xff] }
 0x147   : > { %v2045_v24 = vadd.f32 %v4064_v0, %v2044_v31  ;;  %v1994_v52 = vsel %vm4060_vm0, %v1993_v53, %v1989_v43  ;;  %v2083_v20 = vor.u32 1.1754944e-38, %v2082_v9  ;;  %v2110_v2 = vand.u32 2147483647, %v3813_v59  ;;  %v2145_v31 = vld [vmem:[%s3107_s19 + $0x70] sm:$0xff] }
 0x148   : > { %v2163_v50 = vadd.f32 1.0, %v3935_v49  ;;  %v2073_v47 = vsub.f32 1.0, %v2072_v21  ;;  %v2165_v62 = vadd.f32 1.0, %v3940_v13  ;;  %v2167_v53 = vadd.f32 1.0, %v3945_v38 }
 0x149   : > { %v2049_v8 = vsel %vm4163_vm5, %v4064_v0, %v2045_v24  ;;  %v2024_v51 = vsel %vm4091_vm10, %v2023_v22, %v2019_v35  ;;  %v2112_v49 = vand.u32 2147483648, %v3813_v59  ;;  %v2169_v11 = vadd.f32 1.0, %v3967_v33  ;;  %v2137_v0 = vld [vmem:[%s3107_s19 + $0x30] sm:$0xff] }
 0x14a   : > { %v2784_v60 = vpop.eup %2783  ;;  %v2171_v15 = vadd.f32 1.0, %v3971_v25  ;;  %v2074_v13 = vmul.f32 %v4137_v1, %v2073_v47  ;;  %vm2077_vm14 = vweird.f32 %v4137_v1  ;;  %v2173_v7 = vadd.f32 1.0, %v3977_v16  ;;  %v2849_v47 = vld [vmem:[#allocation2 + $0x128] sm:$0xff] }
 0x14b   : > { %v2102_v38 = vmul.f32 %v2784_v60, %v3813_v59  ;;  %v2054_v36 = vsel %vm4147_vm2, %v2053_v37, %v2049_v8  ;;  %v2175_v33 = vadd.f32 1.0, %v3987_v45  ;;  %v2177_v5 = vadd.f32 1.0, %v1874_v30  ;;  %vm4197_vm15 = vmor %vm2076_vm4, %vm2077_vm14  ;;  %v2856_v16 = vld [vmem:[#allocation2 + $0x208] sm:$0xff] }
 0x14c   : > { %v2195_v25 = vmul.f32 %v2163_v50, %v2131_v40  ;;  %v2075_v61 = vadd.f32 %v4137_v1, %v2074_v13  ;;  %v2197_v9 = vmul.f32 %v2165_v62, %v2133_v44  ;;  %v2199_v43 = vmul.f32 %v2167_v53, %v2135_v29  ;;  %v2851_v53 = vld [vmem:[#allocation2 + $0x168] sm:$0xff]  ;;  %v4216_v29 = vpop.permute.xlu1 %1440 }
 0x14d   : > { %v2103_v22 = vsub.f32 1.0, %v2102_v38  ;;  %v2179_v12 = vadd.f32 1.0, %v1904_v27  ;;  %v2181_v14 = vadd.f32 1.0, %v1934_v48  ;;  %v2201_v37 = vmul.f32 %v2169_v11, %v2137_v0  ;;  %v2852_v11 = vld [vmem:[#allocation2 + $0x188] sm:$0xff] }
 0x14e   : > { %v2203_v35 = vmul.f32 %v2171_v15, %v2139_v28  ;;  %2227 = vst [vmem:[%s4203_s8] sm:$0xff] %v2195_v25  ;;  %v2079_v26 = vsel %vm4197_vm15, %v4137_v1, %v2075_v61  ;;  %vm2107_vm0 = vweird.f32 %v2784_v60  ;;  %v2205_v30 = vmul.f32 %v2173_v7, %v2141_v4  ;;  %v2854_v0 = vld [vmem:[#allocation2 + $0x1c8] sm:$0xff] }
 0x14f   : > { %v2104_v45 = vmul.f32 %v2784_v60, %v2103_v22  ;;  %2229 = vst [vmem:[%s4203_s8 + $0x10] sm:$0xff] %v2197_v9  ;;  %vm2081_vm7 = vcmp.eq.f32.partialorder %v2080_v42, 8.507059e+37  ;;  %vm2106_vm12 = vweird.f32 %v3813_v59  ;;  %v2183_v27 = vadd.f32 1.0, %v1964_v17  ;;  %v2850_v59 = vld [vmem:[#allocation2 + $0x148] sm:$0xff] }
 0x150   : > { %v2207_v48 = vmul.f32 %v2175_v33, %v2143_v63  ;;  %2231 = vst [vmem:[%s4203_s8 + $0x20] sm:$0xff] %v2199_v43  ;;  %v2084_v24 = vsel %vm2081_vm7, %v2083_v20, %v2079_v26  ;;  %v2185_v41 = vadd.f32 1.0, %v1994_v52  ;;  %v2209_v50 = vmul.f32 %v2177_v5, %v2145_v31  ;;  %vm2108_vm3 = vmor %vm2106_vm12, %vm2107_vm0  ;;  %v2855_v63 = vld [vmem:[#allocation2 + $0x1e8] sm:$0xff] }
 0x151   : > { %v2105_v21 = vadd.f32 %v2784_v60, %v2104_v45  ;;  %2233 = vst [vmem:[%s4203_s8 + $0x30] sm:$0xff] %v2201_v37  ;;  %v2113_v1 = vor.u32 1.1754944e-38, %v2112_v49  ;;  %v2187_v40 = vadd.f32 1.0, %v2024_v51  ;;  %v2189_v8 = vadd.f32 1.0, %v2054_v36  ;;  %v4218_v51 = vpop.permute.xlu0 %1382 }
 0x152   : > { %v2211_v62 = vmul.f32 %v2849_v47, %v2179_v12  ;;  %2235 = vst [vmem:[%s4203_s8 + $0x40] sm:$0xff] %v2203_v35  ;;  %vm2111_vm8 = vcmp.eq.f32.partialorder %v2110_v2, 8.507059e+37  ;;  %v2213_v17 = vmul.f32 %v2850_v59, %v2181_v14  ;;  %v2191_v52 = vadd.f32 1.0, %v2084_v24  ;;  %v2853_v2 = vld [vmem:[#allocation2 + $0x1a8] sm:$0xff] }
 0x153   : > { %v2109_v42 = vsel %vm2108_vm3, %v2784_v60, %v2105_v21  ;;  %2237 = vst [vmem:[%s4203_s8 + $0x50] sm:$0xff] %v2205_v30  ;;  %v2215_v44 = vmul.f32 %v2851_v53, %v2183_v27  ;;  %v2217_v15 = vmul.f32 %v2852_v11, %v2185_v41  ;;  %v2219_v60 = vmul.f32 %v2853_v2, %v2187_v40 }
 0x154   : > { %v2114_v20 = vsel %vm2111_vm8, %v2113_v1, %v2109_v42  ;;  %2239 = vst [vmem:[%s4203_s8 + $0x60] sm:$0xff] %v2207_v48  ;;  %v2221_v28 = vmul.f32 %v2854_v0, %v2189_v8  ;;  %v5037_v13 = vperm.slane %v3541_v46, 1  ;;  %v5038_v7 = vperm.slane %v3546_v34, 1 }
 0x155   : > { %v2193_v49 = vadd.f32 1.0, %v2114_v20  ;;  %2241 = vst [vmem:[%s4203_s8 + $0x70] sm:$0xff] %v2209_v50  ;;  %v5039_v36 = vperm.slane %v3541_v46, 0  ;;  %v5040_v5 = vperm.slane %v3546_v34, 0  ;;  %v2223_v61 = vmul.f32 %v2855_v63, %v2191_v52 }
 0x156   : > { %2243 = vst [vmem:[%s4203_s8 + $0x80] sm:$0xff] %v2211_v62  ;;  %v1460_v38 = vmul.f32 %v5037_v13, %v4216_v29  ;;  %v1462_v4 = vmul.f32 %v5038_v7, %v4216_v29  ;;  %v5041_v22 = vperm.slane %v3551_v23, 1  ;;  %v5042_v43 = vperm.slane %v3551_v23, 0 }
 0x157   : > { %2245 = vst [vmem:[%s4203_s8 + $0x90] sm:$0xff] %v2213_v17  ;;  %v1402_v33 = vmul.f32 %v5039_v36, %v4218_v51  ;;  %v1404_v25 = vmul.f32 %v5040_v5, %v4218_v51  ;;  %v2225_v46 = vmul.f32 %v2856_v16, %v2193_v49  ;;  %v5043_v34 = vperm.slane %v3553_v54, 1 }
 0x158   : > { %2247 = vst [vmem:[%s4203_s8 + $0xa0] sm:$0xff] %v2215_v44  ;;  %v1464_v9 = vmul.f32 %v5041_v22, %v4216_v29  ;;  %v1406_v31 = vmul.f32 %v5042_v43, %v4218_v51  ;;  %v5044_v14 = vperm.slane %v3553_v54, 0  ;;  %v5045_v35 = vperm.slane %v3555_v55, 1 }
 0x159   : > { %2249 = vst [vmem:[%s4203_s8 + $0xb0] sm:$0xff] %v2217_v15  ;;  %v1466_v12 = vmul.f32 %v5043_v34, %v4216_v29  ;;  %v5046_v23 = vperm.slane %v3558_v56, 1  ;;  %v5047_v30 = vperm.slane %v3555_v55, 0  ;;  %v5048_v48 = vperm.slane %v3560_v57, 1 }
 0x15a   : > { %v1408_v37 = vmul.f32 %v5044_v14, %v4218_v51  ;;  %2251 = vst [vmem:[%s4203_s8 + $0xc0] sm:$0xff] %v2219_v60  ;;  %v1468_v26 = vmul.f32 %v5045_v35, %v4216_v29  ;;  %v5049_v24 = vperm.slane %v3558_v56, 0  ;;  %v1492_v41 = vadd.f32 %v1460_v38, %v1402_v33 }
 0x15b   : > { %v1470_v45 = vmul.f32 %v5046_v23, %v4216_v29  ;;  %v1410_v27 = vmul.f32 %v5047_v30, %v4218_v51  ;;  %2253 = vst [vmem:[%s4203_s8 + $0xd0] sm:$0xff] %v2221_v28  ;;  %v1472_v54 = vmul.f32 %v5048_v48, %v4216_v29  ;;  %v1494_v50 = vadd.f32 %v1462_v4, %v1404_v25 }
 0x15c   : > { %v1412_v21 = vmul.f32 %v5049_v24, %v4218_v51  ;;  %2255 = vst [vmem:[%s4203_s8 + $0xe0] sm:$0xff] %v2223_v61  ;;  %v5050_v1 = vperm.slane %v3562_v58, 1  ;;  %v5051_v55 = vperm.slane %v3577_v10, 1  ;;  %v5052_v47 = vperm.slane %v3560_v57, 0 }
 0x15d   : > { %v1496_v42 = vadd.f32 %v1464_v9, %v1406_v31  ;;  %2257 = vst [vmem:[%s4203_s8 + $0xf0] sm:$0xff] %v2225_v46  ;;  %v5053_v56 = vperm.slane %v3584_v6, 1  ;;  %v5054_v17 = vperm.slane %v3586_v39, 1  ;;  %v5055_v52 = vperm.slane %v3562_v58, 0 }
 0x15e   : > { %v1474_v40 = vmul.f32 %v5050_v1, %v4216_v29  ;;  %v1476_v8 = vmul.f32 %v5051_v55, %v4216_v29  ;;  %v1414_v62 = vmul.f32 %v5052_v47, %v4218_v51  ;;  %v1498_v44 = vadd.f32 %v1466_v12, %v1408_v37  ;;  %v5067_v47 = vld [vmem:[#allocation19_spill] sm:$0xff] }
 0x15f   : > { %v1478_v59 = vmul.f32 %v5053_v56, %v4216_v29  ;;  %v1480_v20 = vmul.f32 %v5054_v17, %v4216_v29  ;;  %v1416_v53 = vmul.f32 %v5055_v52, %v4218_v51  ;;  %v5056_v49 = vperm.slane %v3590_v18, 1 }
 0x160   : > { %v5057_v11 = vperm.slane %v3592_v19, 1  ;;  %v5058_v2 = vperm.slane %v3577_v10, 0  ;;  %v1500_v0 = vadd.f32 %v1468_v26, %v1410_v27  ;;  %v5059_v28 = vperm.slane %v3584_v6, 0 }
 0x161   : > { %v1482_v57 = vmul.f32 %v5056_v49, %v4216_v29  ;;  %v1502_v58 = vadd.f32 %v1470_v45, %v1412_v21  ;;  %v2543_v38 = vmul.f32 -1.442695, %v1492_v41  ;;  %v2545_v7 = vmul.f32 -1.442695, %v1494_v50 }
 0x162   : > { %v1484_v15 = vmul.f32 %v5057_v11, %v4216_v29  ;;  %v1418_v60 = vmul.f32 %v5058_v2, %v4218_v51  ;;  %v1420_v13 = vmul.f32 %v5059_v28, %v4218_v51  ;;  %v5060_v4 = vperm.slane %v3599_v3, 1 }
 0x163   : > { %v5061_v33 = vperm.slane %v3586_v39, 0  ;;  %v1504_v25 = vadd.f32 %v1472_v54, %v1414_v62  ;;  %v2547_v63 = vmul.f32 -1.442695, %v1496_v42  ;;  %v5062_v10 = vperm.slane %v3601_v32, 1 }
 0x164   : > { %v1486_v36 = vmul.f32 %v5060_v4, %v4216_v29  ;;  %v5063_v6 = vperm.slane %v3590_v18, 0  ;;  %v1506_v9 = vadd.f32 %v1474_v40, %v1416_v53  ;;  %v2549_v43 = vmul.f32 -1.442695, %v1498_v44 }
 0x165   : > { %v1422_v5 = vmul.f32 %v5061_v33, %v4218_v51  ;;  %v1488_v61 = vmul.f32 %v5062_v10, %v4216_v29  ;;  %v5064_v31 = vperm.slane %v3592_v19, 0  ;;  %v1508_v46 = vadd.f32 %v1476_v8, %v1418_v60 }
 0x166   : > { %v1424_v22 = vmul.f32 %v5063_v6, %v4218_v51  ;;  %2785 = vpow2.f32 %v2543_v38  ;;  %v2551_v39 = vmul.f32 -1.442695, %v1500_v0  ;;  %v5065_v34 = vperm.slane %v3599_v3, 0 }
 0x167   : > { %v1426_v16 = vmul.f32 %v5064_v31, %v4218_v51  ;;  %v1510_v14 = vadd.f32 %v1478_v59, %v1420_v13  ;;  %2787 = vpow2.f32 %v2545_v7  ;;  %v2553_v37 = vmul.f32 -1.442695, %v1502_v58 }
 0x168   : > { %v1428_v12 = vmul.f32 %v5065_v34, %v4218_v51  ;;  %v5066_v18 = vperm.slane %v3601_v32, 0  ;;  %v1512_v26 = vadd.f32 %v1480_v20, %v1422_v5  ;;  %2789 = vpow2.f32 %v2547_v63 }
 0x169   : > { %v2555_v23 = vmul.f32 -1.442695, %v1504_v25  ;;  %v1514_v45 = vadd.f32 %v1482_v57, %v1424_v22  ;;  %2791 = vpow2.f32 %v2549_v43  ;;  %v2557_v19 = vmul.f32 -1.442695, %v1506_v9 }
 0x16a   : > { %v1430_v35 = vmul.f32 %v5066_v18, %v4218_v51  ;;  %v1516_v30 = vadd.f32 %v1484_v15, %v1426_v16  ;;  %2793 = vpow2.f32 %v2551_v39  ;;  %v2559_v27 = vmul.f32 -1.442695, %v1508_v46 }
 0x16b   : > { %v1518_v48 = vadd.f32 %v1486_v36, %v1428_v12  ;;  %2795 = vpow2.f32 %v2553_v37  ;;  %v2561_v3 = vmul.f32 -1.442695, %v1510_v14  ;;  %v2563_v21 = vmul.f32 -1.442695, %v1512_v26 }
 0x16c   : > { %v2786_v54 = vpop.eup %2785  ;;  %v1520_v24 = vadd.f32 %v1488_v61, %v1430_v35  ;;  %2797 = vpow2.f32 %v2555_v23  ;;  %v2565_v32 = vmul.f32 -1.442695, %v1514_v45  ;;  %v2567_v1 = vmul.f32 -1.442695, %v1516_v30 }
 0x16d   : > { %v2788_v41 = vpop.eup %2787  ;;  %2799 = vpow2.f32 %v2557_v19  ;;  %v2569_v55 = vmul.f32 -1.442695, %v1518_v48  ;;  %v5068_v62 = vperm.slane %v5067_v47, 1  ;;  %v5069_v56 = vperm.slane %v5067_v47, 0 }
 0x16e   : > { %v2790_v50 = vpop.eup %2789  ;;  %2801 = vpow2.f32 %v2559_v27  ;;  %v2571_v17 = vmul.f32 -1.442695, %v1520_v24  ;;  %v4325_v52 = vadd.f32 1.0, %v2786_v54  ;;  %v4327_v44 = vadd.f32 1.0, %v2788_v41 }
 0x16f   : > { %v2792_v40 = vpop.eup %2791  ;;  %2803 = vpow2.f32 %v2561_v3  ;;  %v1490_v42 = vmul.f32 %v5068_v62, %v4216_v29  ;;  %v1432_v59 = vmul.f32 %v5069_v56, %v4218_v51  ;;  %v4329_v57 = vadd.f32 1.0, %v2790_v50 }
 0x170   : > { %v2794_v8 = vpop.eup %2793  ;;  %2805 = vpow2.f32 %v2563_v21  ;;  %v4331_v15 = vadd.f32 1.0, %v2792_v40  ;;  %v1677_v58 = vand.u32 2147483648, %v4325_v52  ;;  %v1707_v36 = vand.u32 2147483648, %v4327_v44 }
 0x171   : > { %v2796_v20 = vpop.eup %2795  ;;  %2807 = vpow2.f32 %v2565_v32  ;;  %v1522_v29 = vadd.f32 %v1490_v42, %v1432_v59  ;;  %v4333_v2 = vadd.f32 1.0, %v2794_v8  ;;  %v1675_v25 = vand.u32 2147483647, %v4325_v52 }
 0x172   : > { %v2798_v53 = vpop.eup %2797  ;;  %2809 = vpow2.f32 %v2567_v1  ;;  %v4336_v0 = vadd.f32 1.0, %v2796_v20  ;;  %v4350_v63 = vor.u32 1.1754944e-38, %v1677_v58  ;;  %v1705_v10 = vand.u32 2147483647, %v4327_v44 }
 0x173   : > { %v2800_v49 = vpop.eup %2799  ;;  %2811 = vpow2.f32 %v2569_v55  ;;  %v4339_v13 = vadd.f32 1.0, %v2798_v53  ;;  %v2573_v7 = vmul.f32 -1.442695, %v1522_v29  ;;  %v1737_v9 = vand.u32 2147483648, %v4329_v57 }
 0x174   : > { %v2802_v11 = vpop.eup %2801  ;;  %2813 = vpow2.f32 %v2571_v17  ;;  %v4356_v6 = vadd.f32 1.0, %v2800_v49  ;;  %v4365_v16 = vor.u32 1.1754944e-38, %v1707_v36  ;;  %v1735_v46 = vand.u32 2147483647, %v4329_v57 }
 0x175   : > { %v2804_v51 = vpop.eup %2803  ;;  %2815 = vrcp.f32 %v4325_v52  ;;  %v1767_v39 = vand.u32 2147483648, %v4331_v15  ;;  %v4371_v12 = vadd.f32 1.0, %v2802_v11  ;;  %v1765_v18 = vand.u32 2147483647, %v4331_v15 }
 0x176   : > { %v2806_v60 = vpop.eup %2805  ;;  %2817 = vrcp.f32 %v4327_v44  ;;  %v4373_v14 = vadd.f32 1.0, %v2804_v51  ;;  %vm1671_vm10 = vweird.f32 %v4325_v52  ;;  %vm1701_vm9 = vweird.f32 %v4327_v44 }
 0x177   : > { %v2808_v28 = vpop.eup %2807  ;;  %2819 = vrcp.f32 %v4329_v57  ;;  %v4380_v26 = vadd.f32 1.0, %v2806_v60  ;;  %v4390_v3 = vor.u32 1.1754944e-38, %v1737_v9  ;;  %vm1731_vm13 = vweird.f32 %v4329_v57 }
 0x178   : > { %v2810_v38 = vpop.eup %2809  ;;  %2821 = vrcp.f32 %v4331_v15  ;;  %v4387_v27 = vadd.f32 1.0, %v2808_v28  ;;  %v4399_v32 = vor.u32 1.1754944e-38, %v1767_v39  ;;  %vm1761_vm6 = vweird.f32 %v4331_v15 }
 0x179   : > { %v2812_v4 = vpop.eup %2811  ;;  %2823 = vrcp.f32 %v4333_v2  ;;  %v4396_v21 = vadd.f32 1.0, %v2810_v38  ;;  %v1795_v55 = vand.u32 2147483647, %v4333_v2  ;;  %v1797_v8 = vand.u32 2147483648, %v4333_v2 }
 0x17a   : > { %v2814_v33 = vpop.eup %2813  ;;  %2825 = vrcp.f32 %v4336_v0  ;;  %v4408_v62 = vadd.f32 1.0, %v2812_v4  ;;  %v1825_v53 = vand.u32 2147483647, %v4336_v0  ;;  %vm4421_vm4 = vcmp.eq.f32.partialorder %v1675_v25, 8.507059e+37 }
 0x17b   : > { %v4347_v5 = vpop.eup %2815  ;;  %2827 = vrcp.f32 %v4339_v13  ;;  %v4413_v17 = vadd.f32 1.0, %v2814_v33  ;;  %vm4425_vm5 = vcmp.eq.f32.partialorder %v1705_v10, 8.507059e+37  ;;  %vm4432_vm15 = vcmp.eq.f32.partialorder %v1735_v46, 8.507059e+37 }
 0x17c   : > { %v4354_v61 = vpop.eup %2817  ;;  %2829 = vpow2.f32 %v2573_v7  ;;  %v1667_v22 = vmul.f32 %v4347_v5, %v4325_v52  ;;  %vm1672_vm2 = vweird.f32 %v4347_v5  ;;  %v1798_v38 = vor.u32 1.1754944e-38, %v1797_v8 }
 0x17d   : > { %v4361_v43 = vpop.eup %2819  ;;  %v1697_v31 = vmul.f32 %v4354_v61, %v4327_v44  ;;  %vm1702_vm14 = vweird.f32 %v4354_v61  ;;  %v1827_v4 = vand.u32 2147483648, %v4336_v0  ;;  %vm4441_vm7 = vcmp.eq.f32.partialorder %v1765_v18, 8.507059e+37  ;;  %vm4454_vm3 = vmor %vm1671_vm10, %vm1672_vm2 }
 0x17e   : > { %v4369_v34 = vpop.eup %2821  ;;  %v1727_v37 = vmul.f32 %v4361_v43, %v4329_v57  ;;  %v1668_v23 = vsub.f32 1.0, %v1667_v22  ;;  %vm1732_vm0 = vweird.f32 %v4361_v43  ;;  %vm4445_vm12 = vcmp.eq.f32.partialorder %v1795_v55, 8.507059e+37  ;;  %vm4469_vm1 = vmor %vm1701_vm9, %vm1702_vm14 }
 0x17f   : > { %v4378_v35 = vpop.eup %2823  ;;  %v1698_v45 = vsub.f32 1.0, %v1697_v31  ;;  %v1757_v19 = vmul.f32 %v4369_v34, %v4331_v15  ;;  %vm1762_vm8 = vweird.f32 %v4369_v34  ;;  %vm4460_vm11 = vcmp.eq.f32.partialorder %v1825_v53, 8.507059e+37  ;;  %vm4479_vm2 = vmor %vm1731_vm13, %vm1732_vm0 }
 0x180   : > { %v4385_v30 = vpop.eup %2825  ;;  %v1728_v48 = vsub.f32 1.0, %v1727_v37  ;;  %v1787_v54 = vmul.f32 %v4378_v35, %v4333_v2  ;;  %v1669_v42 = vmul.f32 %v4347_v5, %v1668_v23  ;;  %2831 = vrcp.f32 %v4356_v6  ;;  %vm4497_vm13 = vmor %vm1761_vm6, %vm1762_vm8 }
 0x181   : > { %v4394_v24 = vpop.eup %2827  ;;  %v1758_v41 = vsub.f32 1.0, %v1757_v19  ;;  %v1817_v50 = vmul.f32 %v4385_v30, %v4336_v0  ;;  %v1699_v56 = vmul.f32 %v4354_v61, %v1698_v45  ;;  %vm1792_vm10 = vweird.f32 %v4378_v35 }
 0x182   : > { %v2830_v1 = vpop.eup %2829  ;;  %v1788_v40 = vsub.f32 1.0, %v1787_v54  ;;  %v1847_v47 = vmul.f32 %v4394_v24, %v4339_v13  ;;  %v1729_v20 = vmul.f32 %v4361_v43, %v1728_v48  ;;  %v1670_v36 = vadd.f32 %v4347_v5, %v1669_v42 }
 0x183   : > { %v1818_v59 = vsub.f32 1.0, %v1817_v50  ;;  %v4418_v11 = vadd.f32 1.0, %v2830_v1  ;;  %v1759_v60 = vmul.f32 %v4369_v34, %v1758_v41  ;;  %v1700_v33 = vadd.f32 %v4354_v61, %v1699_v56 }
 0x184   : > { %v1848_v49 = vsub.f32 1.0, %v1847_v47  ;;  %v1789_v28 = vmul.f32 %v4378_v35, %v1788_v40  ;;  %v1730_v31 = vadd.f32 %v4361_v43, %v1729_v20  ;;  %v1855_v18 = vand.u32 2147483647, %v4339_v13 }
 0x185   : > { %v1819_v7 = vmul.f32 %v4385_v30, %v1818_v59  ;;  %v1760_v39 = vadd.f32 %v4369_v34, %v1759_v60  ;;  %vm1822_vm9 = vweird.f32 %v4385_v30  ;;  %v1857_v45 = vand.u32 2147483648, %v4339_v13 }
 0x186   : > { %v1849_v22 = vmul.f32 %v4394_v24, %v1848_v49  ;;  %v1790_v37 = vadd.f32 %v4378_v35, %v1789_v28  ;;  %2833 = vrcp.f32 %v4371_v12  ;;  %v1674_v19 = vsel %vm4454_vm3, %v4347_v5, %v1670_v36 }
 0x187   : > { %v1820_v44 = vadd.f32 %v4385_v30, %v1819_v7  ;;  %v1704_v57 = vsel %vm4469_vm1, %v4354_v61, %v1700_v33  ;;  %vm1852_vm14 = vweird.f32 %v4394_v24  ;;  %v1734_v5 = vsel %vm4479_vm2, %v4361_v43, %v1730_v31  ;;  %v4533_v43 = vpop.eup %2831 }
 0x188   : > { %v1850_v54 = vadd.f32 %v4394_v24, %v1849_v22  ;;  %vm5090_vm0 = vweird.f32 %v4333_v2  ;;  %v1828_v41 = vor.u32 1.1754944e-38, %v1827_v4  ;;  %vm1851_vm6 = vweird.f32 %v4339_v13 }
 0x189   : > { %vm4508_vm3 = vmor %vm5090_vm0, %vm1792_vm10  ;;  %2835 = vrcp.f32 %v4373_v14  ;;  %v1764_v15 = vsel %vm4497_vm13, %v4369_v34, %v1760_v39  ;;  %vm5093_vm1 = vweird.f32 %v4336_v0  ;;  %vm4528_vm10 = vcmp.eq.f32.partialorder %v1855_v18, 8.507059e+37 }
 0x18a   : > { %v1794_v50 = vsel %vm4508_vm3, %v4378_v35, %v1790_v37  ;;  %vm4524_vm8 = vmor %vm5093_vm1, %vm1822_vm9  ;;  %2837 = vrcp.f32 %v4380_v26  ;;  %v4538_v34 = vsel %vm4421_vm4, %v4350_v63, %v1674_v19  ;;  %v4543_v0 = vsel %vm4425_vm5, %v4365_v16, %v1704_v57 }
 0x18b   : > { %v1824_v35 = vsel %vm4524_vm8, %v4385_v30, %v1820_v44  ;;  %vm4550_vm2 = vmor %vm1851_vm6, %vm1852_vm14  ;;  %v1887_v40 = vand.u32 2147483648, %v4356_v6  ;;  %v4558_v63 = vsel %vm4432_vm15, %v4390_v3, %v1734_v5  ;;  %v1858_v55 = vor.u32 1.1754944e-38, %v1857_v45 }
 0x18c   : > { %v1854_v16 = vsel %vm4550_vm2, %v4394_v24, %v1850_v54  ;;  %v1877_v30 = vmul.f32 %v4533_v43, %v4356_v6  ;;  %v4565_v8 = vpop.eup %2833  ;;  %v4570_v47 = vsel %vm4441_vm7, %v4399_v32, %v1764_v15  ;;  %v4574_v42 = vsel %vm4445_vm12, %v1798_v38, %v1794_v50 }
 0x18d   : > { %v1917_v3 = vand.u32 2147483648, %v4371_v12  ;;  %2839 = vrcp.f32 %v4387_v27  ;;  %v4580_v24 = vsel %vm4460_vm11, %v1828_v41, %v1824_v35  ;;  %v1885_v59 = vand.u32 2147483647, %v4356_v6 }
 0x18e   : > { %v1878_v56 = vsub.f32 1.0, %v1877_v30  ;;  %v1907_v20 = vmul.f32 %v4565_v8, %v4371_v12  ;;  %v4589_v53 = vsel %vm4528_vm10, %v1858_v55, %v1854_v16  ;;  %vm1881_vm4 = vweird.f32 %v4356_v6 }
 0x18f   : > { %v4585_v32 = vpop.eup %2835  ;;  %v4592_v49 = vor.u32 1.1754944e-38, %v1887_v40  ;;  %v1915_v29 = vand.u32 2147483647, %v4371_v12  ;;  %2841 = vrcp.f32 %v4396_v21  ;;  %vm1911_vm11 = vweird.f32 %v4371_v12 }
 0x190   : > { %v4596_v51 = vpop.eup %2837  ;;  %v1908_v60 = vsub.f32 1.0, %v1907_v20  ;;  %v1937_v28 = vmul.f32 %v4585_v32, %v4373_v14  ;;  %v1947_v58 = vand.u32 2147483648, %v4373_v14  ;;  %v1977_v38 = vand.u32 2147483648, %v4380_v26 }
 0x191   : > { %v4603_v7 = vor.u32 1.1754944e-38, %v1917_v3  ;;  %vm1941_vm5 = vweird.f32 %v4373_v14  ;;  %v1945_v4 = vand.u32 2147483647, %v4373_v14  ;;  %v1967_v36 = vmul.f32 %v4596_v51, %v4380_v26  ;;  %v2148_v14 = vld [vmem:[%s3107_s19 + $0x88] sm:$0xff] }
 0x192   : > { %v1879_v33 = vmul.f32 %v4533_v43, %v1878_v56  ;;  %vm1882_vm15 = vweird.f32 %v4533_v43  ;;  %v1938_v25 = vsub.f32 1.0, %v1937_v28  ;;  %vm1971_vm7 = vweird.f32 %v4380_v26 }
 0x193   : > { %v1975_v10 = vand.u32 2147483647, %v4380_v26  ;;  %v4613_v22 = vpop.eup %2839  ;;  %v1909_v9 = vmul.f32 %v4565_v8, %v1908_v60  ;;  %v1968_v31 = vsub.f32 1.0, %v1967_v36  ;;  %v2005_v46 = vand.u32 2147483647, %v4387_v27  ;;  %vm4659_vm2 = vmor %vm1881_vm4, %vm1882_vm15 }
 0x194   : > { %2843 = vrcp.f32 %v4408_v62  ;;  %v1939_v52 = vmul.f32 %v4585_v32, %v1938_v25  ;;  %v1948_v39 = vor.u32 1.1754944e-38, %v1947_v58  ;;  %v1978_v37 = vor.u32 1.1754944e-38, %v1977_v38 }
 0x195   : > { %v1997_v18 = vmul.f32 %v4613_v22, %v4387_v27  ;;  %v4621_v23 = vpop.eup %2841  ;;  %vm4623_vm12 = vcmp.eq.f32.partialorder %v1885_v59, 8.507059e+37  ;;  %vm1912_vm9 = vweird.f32 %v4565_v8  ;;  %vm4628_vm13 = vcmp.eq.f32.partialorder %v1915_v29, 8.507059e+37 }
 0x196   : > { %v1969_v19 = vmul.f32 %v4596_v51, %v1968_v31  ;;  %vm2001_vm14 = vweird.f32 %v4387_v27  ;;  %v2007_v57 = vand.u32 2147483648, %v4387_v27  ;;  %v1880_v48 = vadd.f32 %v4533_v43, %v1879_v33  ;;  %vm4672_vm6 = vmor %vm1911_vm11, %vm1912_vm9 }
 0x197   : > { %vm4636_vm0 = vcmp.eq.f32.partialorder %v1945_v4, 8.507059e+37  ;;  %vm4640_vm3 = vcmp.eq.f32.partialorder %v1975_v10, 8.507059e+37  ;;  %v1998_v61 = vsub.f32 1.0, %v1997_v18  ;;  %v2027_v41 = vmul.f32 %v4621_v23, %v4396_v21 }
 0x198   : > { %v2035_v15 = vand.u32 2147483647, %v4396_v21  ;;  %v1910_v50 = vadd.f32 %v4565_v8, %v1909_v9  ;;  %vm1942_vm1 = vweird.f32 %v4585_v32  ;;  %vm1972_vm8 = vweird.f32 %v4596_v51 }
 0x199   : > { %vm4651_vm10 = vcmp.eq.f32.partialorder %v2005_v46, 8.507059e+37  ;;  %v1940_v35 = vadd.f32 %v4585_v32, %v1939_v52  ;;  %v1970_v1 = vadd.f32 %v4596_v51, %v1969_v19  ;;  %v1999_v40 = vmul.f32 %v4613_v22, %v1998_v61  ;;  %vm4686_vm15 = vmor %vm1941_vm5, %vm1942_vm1  ;;  %v2132_v19 = vld [vmem:[%s3107_s19 + $0x8] sm:$0xff] }
 0x19a   : > { %v2028_v16 = vsub.f32 1.0, %v2027_v41  ;;  %v4666_v55 = vpop.eup %2843  ;;  %vm2002_vm4 = vweird.f32 %v4613_v22  ;;  %v2008_v6 = vor.u32 1.1754944e-38, %v2007_v57  ;;  %v2037_v3 = vand.u32 2147483648, %v4396_v21  ;;  %vm4705_vm5 = vmor %vm1971_vm7, %vm1972_vm8  ;;  %v2134_v41 = vld [vmem:[%s3107_s19 + $0x18] sm:$0xff] }
 0x19b   : > { %2845 = vrcp.f32 %v4413_v17  ;;  %v1884_v56 = vsel %vm4659_vm2, %v4533_v43, %v1880_v48  ;;  %v2000_v59 = vadd.f32 %v4613_v22, %v1999_v40  ;;  %vm4692_vm11 = vcmp.eq.f32.partialorder %v2035_v15, 8.507059e+37  ;;  %vm4723_vm7 = vmor %vm2001_vm14, %vm2002_vm4  ;;  %v2136_v15 = vld [vmem:[%s3107_s19 + $0x28] sm:$0xff]  ;;  %v2142_v40 = vld [vmem:[%s3107_s19 + $0x58] sm:$0xff] }
 0x19c   : > { %v2029_v20 = vmul.f32 %v4621_v23, %v2028_v16  ;;  %v2057_v60 = vmul.f32 %v4666_v55, %v4408_v62  ;;  %v1914_v43 = vsel %vm4672_vm6, %v4565_v8, %v1910_v50  ;;  %vm2032_vm9 = vweird.f32 %v4621_v23 }
 0x19d   : > { %vm2061_vm1 = vweird.f32 %v4408_v62  ;;  %v2065_v28 = vand.u32 2147483647, %v4408_v62  ;;  %v2067_v58 = vand.u32 2147483648, %v4408_v62  ;;  %v1944_v8 = vsel %vm4686_vm15, %v4585_v32, %v1940_v35  ;;  %v2138_v35 = vld [vmem:[%s3107_s19 + $0x38] sm:$0xff] }
 0x19e   : > { %v1974_v26 = vsel %vm4705_vm5, %v4596_v51, %v1970_v1  ;;  %v2030_v4 = vadd.f32 %v4621_v23, %v2029_v20  ;;  %v2058_v36 = vsub.f32 1.0, %v2057_v60  ;;  %v2004_v33 = vsel %vm4723_vm7, %v4613_v22, %v2000_v59  ;;  %v2140_v1 = vld [vmem:[%s3107_s19 + $0x48] sm:$0xff] }
 0x19f   : > { %v2095_v32 = vand.u32 2147483647, %v4413_v17  ;;  %v2097_v25 = vand.u32 2147483648, %v4413_v17  ;;  %2847 = vrcp.f32 %v4418_v11  ;;  %v1889_v27 = vsel %vm4623_vm12, %v4592_v49, %v1884_v56 }
 0x1a0   : > { %v1919_v51 = vsel %vm4628_vm13, %v4603_v7, %v1914_v43  ;;  %v2038_v10 = vor.u32 1.1754944e-38, %v2037_v3  ;;  %v2059_v9 = vmul.f32 %v4666_v55, %v2058_v36  ;;  %v1949_v22 = vsel %vm4636_vm0, %v1948_v39, %v1944_v8  ;;  %v2144_v3 = vld [vmem:[%s3107_s19 + $0x68] sm:$0xff]  ;;  %v2150_v8 = vld [vmem:[%s3107_s19 + $0x98] sm:$0xff] }
 0x1a1   : > { %v4741_v31 = vpop.eup %2845  ;;  %v1979_v46 = vsel %vm4640_vm3, %v1978_v37, %v1974_v26  ;;  %vm5122_vm12 = vweird.f32 %v4396_v21  ;;  %vm2062_vm13 = vweird.f32 %v4666_v55  ;;  %v2068_v7 = vor.u32 1.1754944e-38, %v2067_v58  ;;  %v2152_v36 = vld [vmem:[%s3107_s19 + $0xa8] sm:$0xff] }
 0x1a2   : > { %vm4751_vm14 = vmor %vm5122_vm12, %vm2032_vm9  ;;  %v2009_v52 = vsel %vm4651_vm10, %v2008_v6, %v2004_v33  ;;  %vm4761_vm0 = vcmp.eq.f32.partialorder %v2065_v28, 8.507059e+37  ;;  %v2087_v21 = vmul.f32 %v4741_v31, %v4413_v17  ;;  %vm2091_vm3 = vweird.f32 %v4413_v17 }
 0x1a3   : > { %v2034_v39 = vsel %vm4751_vm14, %v4621_v23, %v2030_v4  ;;  %v2060_v18 = vadd.f32 %v4666_v55, %v2059_v9  ;;  %vm4769_vm6 = vcmp.eq.f32.partialorder %v2095_v32, 8.507059e+37  ;;  %v2098_v45 = vor.u32 1.1754944e-38, %v2097_v25  ;;  %vm4793_vm8 = vmor %vm2061_vm1, %vm2062_vm13 }
 0x1a4   : > { %v2164_v23 = vadd.f32 1.0, %v4538_v34  ;;  %v2088_v57 = vsub.f32 1.0, %v2087_v21  ;;  %v2125_v48 = vand.u32 2147483647, %v4418_v11  ;;  %v2166_v54 = vadd.f32 1.0, %v4543_v0  ;;  %v2160_v21 = vld [vmem:[%s3107_s19 + $0xe8] sm:$0xff] }
 0x1a5   : > { %v2168_v5 = vadd.f32 1.0, %v4558_v63  ;;  %v4778_v61 = vpop.eup %2847  ;;  %v2039_v50 = vsel %vm4692_vm11, %v2038_v10, %v2034_v39  ;;  %v2127_v2 = vand.u32 2147483648, %v4418_v11  ;;  %v2170_v34 = vadd.f32 1.0, %v4570_v47 }
 0x1a6   : > { %v2172_v13 = vadd.f32 1.0, %v4574_v42  ;;  %v2089_v63 = vmul.f32 %v4741_v31, %v2088_v57  ;;  %vm2092_vm10 = vweird.f32 %v4741_v31  ;;  %v2117_v47 = vmul.f32 %v4778_v61, %v4418_v11 }
 0x1a7   : > { %v2174_v42 = vadd.f32 1.0, %v4580_v24  ;;  %v2064_v62 = vsel %vm4793_vm8, %v4666_v55, %v2060_v18  ;;  %v2176_v16 = vadd.f32 1.0, %v4589_v53  ;;  %v2178_v30 = vadd.f32 1.0, %v1889_v27  ;;  %v2146_v24 = vld [vmem:[%s3107_s19 + $0x78] sm:$0xff]  ;;  %vm4812_vm2 = vmor %vm2091_vm3, %vm2092_vm10 }
 0x1a8   : > { %v2196_v6 = vmul.f32 %v2164_v23, %v2132_v19  ;;  %v2090_v56 = vadd.f32 %v4741_v31, %v2089_v63  ;;  %v2118_v12 = vsub.f32 1.0, %v2117_v47  ;;  %v2198_v59 = vmul.f32 %v2166_v54, %v2134_v41 }
 0x1a9   : > { %v2200_v20 = vmul.f32 %v2168_v5, %v2136_v15  ;;  %v2180_v55 = vadd.f32 1.0, %v1919_v51  ;;  %v2182_v53 = vadd.f32 1.0, %v1949_v22  ;;  %v2202_v60 = vmul.f32 %v2170_v34, %v2138_v35  ;;  %v2154_v51 = vld [vmem:[%s3107_s19 + $0xb8] sm:$0xff] }
 0x1aa   : > { %v2204_v43 = vmul.f32 %v2172_v13, %v2140_v1  ;;  %2228 = vst [vmem:[%s4203_s8 + $0x8] sm:$0xff] %v2196_v6  ;;  %v2094_v28 = vsel %vm4812_vm2, %v4741_v31, %v2090_v56  ;;  %v2119_v58 = vmul.f32 %v4778_v61, %v2118_v12  ;;  %vm2122_vm4 = vweird.f32 %v4778_v61  ;;  %v2156_v31 = vld [vmem:[%s3107_s19 + $0xc8] sm:$0xff] }
 0x1ab   : > { %v2206_v17 = vmul.f32 %v2174_v42, %v2142_v40  ;;  %2230 = vst [vmem:[%s4203_s8 + $0x18] sm:$0xff] %v2198_v59  ;;  %v2069_v26 = vsel %vm4761_vm0, %v2068_v7, %v2064_v62  ;;  %vm2121_vm15 = vweird.f32 %v4418_v11  ;;  %v2184_v38 = vadd.f32 1.0, %v1979_v46  ;;  %v2158_v7 = vld [vmem:[%s3107_s19 + $0xd8] sm:$0xff] }
 0x1ac   : > { %v2208_v4 = vmul.f32 %v2176_v16, %v2144_v3  ;;  %2232 = vst [vmem:[%s4203_s8 + $0x28] sm:$0xff] %v2200_v20  ;;  %v2099_v33 = vsel %vm4769_vm6, %v2098_v45, %v2094_v28  ;;  %v2120_v32 = vadd.f32 %v4778_v61, %v2119_v58  ;;  %v2186_v25 = vadd.f32 1.0, %v2009_v52  ;;  %vm2123_vm11 = vmor %vm2121_vm15, %vm2122_vm4  ;;  %v2162_v45 = vld [vmem:[%s3107_s19 + $0xf8] sm:$0xff]  ;;  %s2260_s19 = scalar_lea.sflag [#allocation7], %s3101_s13 }
 0x1ad   : > { %v2210_v27 = vmul.f32 %v2178_v30, %v2146_v24  ;;  %2234 = vst [vmem:[%s4203_s8 + $0x38] sm:$0xff] %v2202_v60  ;;  %v2128_v11 = vor.u32 1.1754944e-38, %v2127_v2  ;;  %v2188_v10 = vadd.f32 1.0, %v2039_v50  ;;  %v2212_v9 = vmul.f32 %v2180_v55, %v2148_v14 }
 0x1ae   : > { %2236 = vst [vmem:[%s4203_s8 + $0x48] sm:$0xff] %v2204_v43  ;;  %v2124_v22 = vsel %vm2123_vm11, %v4778_v61, %v2120_v32  ;;  %vm2126_vm5 = vcmp.eq.f32.partialorder %v2125_v48, 8.507059e+37  ;;  %v2190_v46 = vadd.f32 1.0, %v2069_v26  ;;  %v2214_v49 = vmul.f32 %v2182_v53, %v2150_v8 }
 0x1af   : > { %2238 = vst [vmem:[%s4203_s8 + $0x58] sm:$0xff] %v2206_v17  ;;  %v2129_v52 = vsel %vm2126_vm5, %v2128_v11, %v2124_v22  ;;  %v2192_v39 = vadd.f32 1.0, %v2099_v33  ;;  %v2216_v37 = vmul.f32 %v2184_v38, %v2152_v36  ;;  %v2218_v44 = vmul.f32 %v2186_v25, %v2154_v51 }
 0x1b0   : > { %2240 = vst [vmem:[%s4203_s8 + $0x68] sm:$0xff] %v2208_v4  ;;  %v2194_v18 = vadd.f32 1.0, %v2129_v52  ;;  %v2220_v23 = vmul.f32 %v2188_v10, %v2156_v31  ;;  %v2222_v19 = vmul.f32 %v2190_v46, %v2158_v7 }
 0x1b1   : > { %2242 = vst [vmem:[%s4203_s8 + $0x78] sm:$0xff] %v2210_v27  ;;  %v2224_v57 = vmul.f32 %v2192_v39, %v2160_v21 }
 0x1b2   : > { %2244 = vst [vmem:[%s4203_s8 + $0x88] sm:$0xff] %v2212_v9  ;;  %v2226_v48 = vmul.f32 %v2194_v18, %v2162_v45 }
 0x1b3   : > { %2246 = vst [vmem:[%s4203_s8 + $0x98] sm:$0xff] %v2214_v49 }
 0x1b4   : > { %2248 = vst [vmem:[%s4203_s8 + $0xa8] sm:$0xff] %v2216_v37 }
 0x1b5   : > { %2250 = vst [vmem:[%s4203_s8 + $0xb8] sm:$0xff] %v2218_v44 }
 0x1b6   : > { %2252 = vst [vmem:[%s4203_s8 + $0xc8] sm:$0xff] %v2220_v23 }
 0x1b7   : > { %2254 = vst [vmem:[%s4203_s8 + $0xd8] sm:$0xff] %v2222_v19 }
 0x1b8   : > { %2256 = vst [vmem:[%s4203_s8 + $0xe8] sm:$0xff] %v2224_v57 }
 0x1b9   : > { %2258 = vst [vmem:[%s4203_s8 + $0xf8] sm:$0xff] %v2226_v48 }
 0x1ba   : > { %2914 = shalt.err (!%p2911_p13)
}
 0x1bb   : > { %s2975_s13 = smov 128   ;;  %s2976_s25 = smov 8  }
 0x1bc   : > { %2647 = dma.vmem_to_hbm [thread:$0]  (%p3078_p9), %s2274_s24, 4096, %s2276_s26, %s2260_s19, %s2975_s13, %s2975_s13, %s2976_s25  }
 0x1bd PF: > { %s5133_s15 = sld [smem:[#allocation11_spill]]  ;;  %p2654_p0 = pnand %p2535_p12, %p3085_p11 }
 0x1be   : > { %s5135_s4 = sld [smem:[#allocation15_spill]] }
 0x1bf   : > { %p2655_p1 = pneg %p2654_p0 }
 0x1c3   : > { %s2290_s5 = sand.u32 1, %s5133_s15  }
 0x1c4   : > { %s2291_s7 = scalar_lea.sflag [#allocation7], %s2290_s5 }
 0x1c5   : > { %2944 = dma.done.wait (%p2655_p1), %s2291_s7, 4096  }
 0x1c6   : > { %2946 = vsyncadd (%p2655_p1), %s2291_s7, 4294963200  ;;  %s25_s14 = sadd.s32 1, %s5135_s4   ;;  %s5136_s30 = sld [smem:[#allocation12_spill]] }
 0x1c7   : > { %p22_p2 = scmp.ge.s32.totalorder %s25_s14, 4   ;;  %s5137_s10 = sld [smem:[#allocation13_spill]] }
 0x1c8   : > { %s5138_s11 = sld [smem:[#allocation17_spill]] }
 0x1c9   : > { %s5139_s12 = sld [smem:[#allocation14_spill]]  ;;  %24 = sbr.rel (!%p22_p2) target bundleno = 16 (0x10), region = 254 }
 0x1ca   : > { %s5140_s13 = sld [smem:[#allocation16_spill]] }
 0x1ce   :  { %2297 = vsyncpa [#allocation6], 1 }
 0x1cf   :  { %2299 = vsyncpa [#allocation6 + $0x1], 1 }
 0x1d0   :  { %2300 = vsyncpa [#allocation7], 1 }
 0x1d1   :  { %2302 = vsyncpa [#allocation7 + $0x1], 1 }

</bundles_post_ra>
